<compile_context>
chip_gen: v7x
topology: tpu7x:2x2x1
jax: 0.10.0
libtpu: 0.0.40
codegen_flags: <defaults>
</compile_context>

<pallas_src>
import functools

import jax
import jax.numpy as jnp
from jax import lax  # noqa: F401  (kept for the larger-T fori_loop variant)
from jax.experimental import pallas as pl
from jax.experimental.pallas import tpu as pltpu


def _bilstm_head_kernel(x_ref,        # (T*Bp, C)   flattened (time, padded-batch) rows
                        wih_ref,      # (C, 8*Hp)   [fwd i|f|g|o | bwd i|f|g|o], Hp-wide gate blocks
                        b_ref,        # (1, 8*Hp)   b_ih + b_hh per direction, gate-padded
                        whh_f_ref,    # (Hp, 4*Hp)
                        whh_b_ref,    # (Hp, 4*Hp)
                        wfin_f_ref,   # (1, Hp)
                        wfin_b_ref,   # (1, Hp)
                        bfin_ref,     # (1, 1)
                        out_ref,      # (Bp, 1)
                        xp_f_ref,     # scratch (T*Bp, 4*Hp)
                        xp_b_ref,     # scratch (T*Bp, 4*Hp)
                        *, seq_len, batch_pad, hidden_pad):
    T, Bp, Hp = seq_len, batch_pad, hidden_pad
    G = 4 * Hp

    # ---- Input projection for BOTH directions: one dense MXU matmul, biases folded in. ----
    xp = (jnp.dot(x_ref[...], wih_ref[...], preferred_element_type=jnp.float32)
          + b_ref[...])                                   # (T*Bp, 2G), lane-dense
    xp_f_ref[...] = xp[:, :G]
    xp_b_ref[...] = xp[:, G:]

    whh_f = whh_f_ref[...]
    whh_b = whh_b_ref[...]

    def gate_math(gates, c):
        # PyTorch gate order i, f, g, o; each block is a lane-aligned Hp-wide slab.
        i = jax.nn.sigmoid(gates[:, 0 * Hp:1 * Hp])
        f = jax.nn.sigmoid(gates[:, 1 * Hp:2 * Hp])
        g = jnp.tanh(gates[:, 2 * Hp:3 * Hp])
        o = jax.nn.sigmoid(gates[:, 3 * Hp:4 * Hp])
        c_new = f * c + i * g
        return o * jnp.tanh(c_new), c_new

    z = jnp.zeros((Bp, Hp), jnp.float32)
    h_f, c_f, h_b, c_b = z, z, z, z

    # Fully unrolled recurrence (T is small & static). Forward step t and backward step
    # T-1-t are independent, so interleaving them overlaps their MXU/EUP latencies.
    for t in range(T):
        g_f = xp_f_ref[pl.ds(t * Bp, Bp), :] + jnp.dot(
            h_f, whh_f, preferred_element_type=jnp.float32)
        g_b = xp_b_ref[pl.ds((T - 1 - t) * Bp, Bp), :] + jnp.dot(
            h_b, whh_b, preferred_element_type=jnp.float32)
        h_f, c_f = gate_math(g_f, c_f)
        h_b, c_b = gate_math(g_b, c_b)

    # Final Linear(2H, 1): VPU multiply + lane reduction (avoids an N=1 MXU matmul), sigmoid.
    logits = (jnp.sum(h_f * wfin_f_ref[...], axis=-1, keepdims=True)
              + jnp.sum(h_b * wfin_b_ref[...], axis=-1, keepdims=True)
              + bfin_ref[...])
    out_ref[...] = jax.nn.sigmoid(logits)


def rnn_forward(x, params):
    """x: (B, C, T) float32. Returns (B,) sigmoid scores (matches PyTorch Z.squeeze())."""
    B, C, T = x.shape
    Hp = params["hidden_pad"]
    Bp = ((B + 7) // 8) * 8                       # pad batch to the f32 sublane multiple

    # (B, C, T) -> (T, B, C) -> pad batch -> flatten (time, batch) rows.
    x_tbc = jnp.transpose(x, (2, 0, 1)).astype(jnp.float32)
    x_tbc = jnp.pad(x_tbc, ((0, 0), (0, Bp - B), (0, 0)))
    x_flat = x_tbc.reshape(T * Bp, C)

    kernel = functools.partial(_bilstm_head_kernel,
                               seq_len=T, batch_pad=Bp, hidden_pad=Hp)
    vmem = pl.BlockSpec(memory_space=pltpu.MemorySpace.VMEM)

    out = pl.pallas_call(
        kernel,
        out_shape=jax.ShapeDtypeStruct((Bp, 1), jnp.float32),
        in_specs=[vmem] * 8,
        out_specs=vmem,
        scratch_shapes=[pltpu.VMEM((T * Bp, 4 * Hp), jnp.float32),
                        pltpu.VMEM((T * Bp, 4 * Hp), jnp.float32)],
    )(
        x_flat,
        params["wih_cat"], params["b_cat"],
        params["whh_f"], params["whh_b"],
        params["wfin_f"], params["wfin_b"], params["bfin"],
    )
    return out[:B, 0]


def init_params(key, in_channels, hidden_dim):
    """Raw weights in PyTorch nn.LSTM / nn.Linear layout, U(-1/sqrt(fan), 1/sqrt(fan))."""
    H, C = hidden_dim, in_channels
    bound = 1.0 / jnp.sqrt(jnp.float32(H))
    bound_fin = 1.0 / jnp.sqrt(jnp.float32(2 * H))
    ks = jax.random.split(key, 10)

    def u(k, shape, b=bound):
        return jax.random.uniform(k, shape, jnp.float32, -b, b)

    return {
        "hidden_dim": H,
        "wih_f": u(ks[0], (4 * H, C)), "whh_f": u(ks[1], (4 * H, H)),
        "bih_f": u(ks[2], (4 * H,)),   "bhh_f": u(ks[3], (4 * H,)),
        "wih_b": u(ks[4], (4 * H, C)), "whh_b": u(ks[5], (4 * H, H)),
        "bih_b": u(ks[6], (4 * H,)),   "bhh_b": u(ks[7], (4 * H,)),
        "w_fin": u(ks[8], (1, 2 * H), bound_fin),
        "b_fin": u(ks[9], (1,), bound_fin),
    }


def pack_params(raw, hidden_pad=128):
    """Pad/transpose raw PyTorch-layout weights into the kernel's lane-aligned layout.

    Each of the 4 LSTM gates gets its own lane-aligned hidden_pad-wide block. Padded
    columns/rows are zero, which keeps the padded part of h/c exactly zero every step
    (padded gate inputs = 0 -> g = 0 -> c_pad stays 0 -> h_pad stays 0), so the math
    is identical to the unpadded LSTM.
    """
    H = raw["hidden_dim"]
    Hp = max(hidden_pad, ((H + 127) // 128) * 128)

    def pad_gate_cols(w_t):            # (rows, 4H) -> (rows, 4*Hp)
        blocks = [jnp.pad(w_t[:, g * H:(g + 1) * H], ((0, 0), (0, Hp - H)))
                  for g in range(4)]
        return jnp.concatenate(blocks, axis=1)

    wih_f = pad_gate_cols(raw["wih_f"].T)                                   # (C, 4Hp)
    wih_b = pad_gate_cols(raw["wih_b"].T)
    whh_f = jnp.pad(pad_gate_cols(raw["whh_f"].T), ((0, Hp - H), (0, 0)))   # (Hp, 4Hp)
    whh_b = jnp.pad(pad_gate_cols(raw["whh_b"].T), ((0, Hp - H), (0, 0)))
    b_f = pad_gate_cols((raw["bih_f"] + raw["bhh_f"]).reshape(1, 4 * H))    # (1, 4Hp)
    b_b = pad_gate_cols((raw["bih_b"] + raw["bhh_b"]).reshape(1, 4 * H))

    return {
        "hidden_dim": H,
        "hidden_pad": Hp,
        "wih_cat": jnp.concatenate([wih_f, wih_b], axis=1),                 # (C, 8Hp)
        "b_cat": jnp.concatenate([b_f, b_b], axis=1),                       # (1, 8Hp)
        "whh_f": whh_f, "whh_b": whh_b,
        "wfin_f": jnp.pad(raw["w_fin"][:, :H], ((0, 0), (0, Hp - H))),      # (1, Hp)
        "wfin_b": jnp.pad(raw["w_fin"][:, H:], ((0, 0), (0, Hp - H))),
        "bfin": raw["b_fin"].reshape(1, 1),
    }


def _reference_forward(x, raw):
    """Pure-JAX reference of the same bi-LSTM + head (PyTorch semantics)."""
    B, C, T = x.shape
    H = raw["hidden_dim"]
    x_tbc = jnp.transpose(x, (2, 0, 1)).astype(jnp.float32)

    def run(order, wih, whh, b):
        h = jnp.zeros((B, H), jnp.float32)
        c = jnp.zeros((B, H), jnp.float32)
        for t in order:
            gates = x_tbc[t] @ wih.T + h @ whh.T + b
            i = jax.nn.sigmoid(gates[:, :H])
            f = jax.nn.sigmoid(gates[:, H:2 * H])
            g = jnp.tanh(gates[:, 2 * H:3 * H])
            o = jax.nn.sigmoid(gates[:, 3 * H:])
            c = f * c + i * g
            h = o * jnp.tanh(c)
        return h

    h_f = run(range(T), raw["wih_f"], raw["whh_f"], raw["bih_f"] + raw["bhh_f"])
    h_b = run(range(T - 1, -1, -1), raw["wih_b"], raw["whh_b"], raw["bih_b"] + raw["bhh_b"])
    ht = jnp.concatenate([h_f, h_b], axis=1)
    return jax.nn.sigmoid(ht @ raw["w_fin"].T + raw["b_fin"])[:, 0]


if __name__ == "__main__":
    B, C, T, H = 2, 4, 8, 32

    key = jax.random.PRNGKey(0)
    k_x, k_p = jax.random.split(key)
    x = jax.random.normal(k_x, (B, C, T), jnp.float32)      # (batch, in_channels, seq_len)

    raw = init_params(k_p, in_channels=C, hidden_dim=H)
    params = pack_params(raw)

    out = jax.block_until_ready(rnn_forward(x, params))
    ref = _reference_forward(x, raw)

    assert out.shape == (B,), out.shape
    assert jnp.allclose(out, ref, atol=1e-5, rtol=1e-5), (out, ref)
    print("KERNEL_OK")
</pallas_src>

<mosaic_0001>
module attributes {stable_mosaic.version = 11 : i64} {
  func.func @_bilstm_head_kernel(%arg0: memref<64x4xf32, #tpu.memory_space<vmem>>, %arg1: memref<4x1024xf32, #tpu.memory_space<vmem>>, %arg2: memref<1x1024xf32, #tpu.memory_space<vmem>>, %arg3: memref<128x512xf32, #tpu.memory_space<vmem>>, %arg4: memref<128x512xf32, #tpu.memory_space<vmem>>, %arg5: memref<1x128xf32, #tpu.memory_space<vmem>>, %arg6: memref<1x128xf32, #tpu.memory_space<vmem>>, %arg7: memref<1x1xf32, #tpu.memory_space<vmem>>, %arg8: memref<8x1xf32, #tpu.memory_space<vmem>>, %arg9: memref<64x512xf32, #tpu.memory_space<vmem>>, %arg10: memref<64x512xf32, #tpu.memory_space<vmem>>) attributes {dimension_semantics = [], scalar_prefetch = 0 : i64, scratch_operands = 2 : i64, tpu.core_type = #tpu.core_type<tc>} {
    %c0 = arith.constant 0 : index
    %c0_0 = arith.constant 0 : index
    %0 = vector.load %arg0[%c0, %c0_0] : memref<64x4xf32, #tpu.memory_space<vmem>>, vector<64x4xf32>
    %c0_1 = arith.constant 0 : index
    %c0_2 = arith.constant 0 : index
    %1 = vector.load %arg1[%c0_1, %c0_2] : memref<4x1024xf32, #tpu.memory_space<vmem>>, vector<4x1024xf32>
    %cst = arith.constant dense<0.000000e+00> : vector<64x1024xf32>
    %2 = tpu.matmul %0, %1, %cst {dimension_numbers = #tpu.dot_dimension_numbers<[1], [0], [0], [1], [0, 0, 1, 1], [], []>} : vector<64x4xf32>, vector<4x1024xf32>, vector<64x1024xf32> -> vector<64x1024xf32>
    %c0_3 = arith.constant 0 : index
    %c0_4 = arith.constant 0 : index
    %3 = vector.load %arg2[%c0_3, %c0_4] : memref<1x1024xf32, #tpu.memory_space<vmem>>, vector<1x1024xf32>
    %4 = vector.broadcast %3 : vector<1x1024xf32> to vector<64x1024xf32>
    %5 = arith.addf %2, %4 : vector<64x1024xf32>
    %6 = vector.extract_strided_slice %5 {offsets = [0, 0], sizes = [64, 512], strides = [1, 1]} : vector<64x1024xf32> to vector<64x512xf32>
    %c0_5 = arith.constant 0 : index
    %c0_6 = arith.constant 0 : index
    %7 = vector.load %arg9[%c0_5, %c0_6] : memref<64x512xf32, #tpu.memory_space<vmem>>, vector<64x512xf32>
    tpu.vector_store %arg9[%c0_5, %c0_6], %6 {strides = array<i32>} : memref<64x512xf32, #tpu.memory_space<vmem>>, vector<64x512xf32>,
    %8 = vector.extract_strided_slice %5 {offsets = [0, 512], sizes = [64, 512], strides = [1, 1]} : vector<64x1024xf32> to vector<64x512xf32>
    %c0_7 = arith.constant 0 : index
    %c0_8 = arith.constant 0 : index
    %9 = vector.load %arg10[%c0_7, %c0_8] : memref<64x512xf32, #tpu.memory_space<vmem>>, vector<64x512xf32>
    tpu.vector_store %arg10[%c0_7, %c0_8], %8 {strides = array<i32>} : memref<64x512xf32, #tpu.memory_space<vmem>>, vector<64x512xf32>,
    %c0_9 = arith.constant 0 : index
    %c0_10 = arith.constant 0 : index
    %10 = vector.load %arg3[%c0_9, %c0_10] : memref<128x512xf32, #tpu.memory_space<vmem>>, vector<128x512xf32>
    %c0_11 = arith.constant 0 : index
    %c0_12 = arith.constant 0 : index
    %11 = vector.load %arg4[%c0_11, %c0_12] : memref<128x512xf32, #tpu.memory_space<vmem>>, vector<128x512xf32>
    %cst_13 = arith.constant 0.000000e+00 : f32
    %12 = vector.broadcast %cst_13 : f32 to vector<8x128xf32>
    %c0_14 = arith.constant 0 : index
    %c0_15 = arith.constant 0 : index
    %13 = vector.load %arg9[%c0_14, %c0_15] : memref<64x512xf32, #tpu.memory_space<vmem>>, vector<8x512xf32>
    %cst_16 = arith.constant dense<0.000000e+00> : vector<8x512xf32>
    %14 = tpu.matmul %12, %10, %cst_16 {dimension_numbers = #tpu.dot_dimension_numbers<[1], [0], [0], [1], [0, 0, 1, 1], [], []>} : vector<8x128xf32>, vector<128x512xf32>, vector<8x512xf32> -> vector<8x512xf32>
    %15 = arith.addf %13, %14 : vector<8x512xf32>
    %c56 = arith.constant 56 : index
    %c0_17 = arith.constant 0 : index
    %16 = vector.load %arg10[%c56, %c0_17] : memref<64x512xf32, #tpu.memory_space<vmem>>, vector<8x512xf32>
    %cst_18 = arith.constant dense<0.000000e+00> : vector<8x512xf32>
    %17 = tpu.matmul %12, %11, %cst_18 {dimension_numbers = #tpu.dot_dimension_numbers<[1], [0], [0], [1], [0, 0, 1, 1], [], []>} : vector<8x128xf32>, vector<128x512xf32>, vector<8x512xf32> -> vector<8x512xf32>
    %18 = arith.addf %16, %17 : vector<8x512xf32>
    %19 = vector.extract_strided_slice %15 {offsets = [0, 0], sizes = [8, 128], strides = [1, 1]} : vector<8x512xf32> to vector<8x128xf32>
    %20 = arith.negf %19 : vector<8x128xf32>
    %21 = math.exp %20 : vector<8x128xf32>
    %cst_19 = arith.constant 1.000000e+00 : f32
    %22 = vector.broadcast %cst_19 : f32 to vector<8x128xf32>
    %23 = arith.addf %22, %21 : vector<8x128xf32>
    %24 = arith.divf %22, %23 : vector<8x128xf32>
    %25 = vector.extract_strided_slice %15 {offsets = [0, 128], sizes = [8, 128], strides = [1, 1]} : vector<8x512xf32> to vector<8x128xf32>
    %26 = arith.negf %25 : vector<8x128xf32>
    %27 = math.exp %26 : vector<8x128xf32>
    %cst_20 = arith.constant 1.000000e+00 : f32
    %28 = vector.broadcast %cst_20 : f32 to vector<8x128xf32>
    %29 = arith.addf %28, %27 : vector<8x128xf32>
    %30 = arith.divf %28, %29 : vector<8x128xf32>
    %31 = vector.extract_strided_slice %15 {offsets = [0, 256], sizes = [8, 128], strides = [1, 1]} : vector<8x512xf32> to vector<8x128xf32>
    %32 = math.tanh %31 : vector<8x128xf32>
    %33 = vector.extract_strided_slice %15 {offsets = [0, 384], sizes = [8, 128], strides = [1, 1]} : vector<8x512xf32> to vector<8x128xf32>
    %34 = arith.negf %33 : vector<8x128xf32>
    %35 = math.exp %34 : vector<8x128xf32>
    %cst_21 = arith.constant 1.000000e+00 : f32
    %36 = vector.broadcast %cst_21 : f32 to vector<8x128xf32>
    %37 = arith.addf %36, %35 : vector<8x128xf32>
    %38 = arith.divf %36, %37 : vector<8x128xf32>
    %39 = arith.mulf %30, %12 : vector<8x128xf32>
    %40 = arith.mulf %24, %32 : vector<8x128xf32>
    %41 = arith.addf %39, %40 : vector<8x128xf32>
    %42 = math.tanh %41 : vector<8x128xf32>
    %43 = arith.mulf %38, %42 : vector<8x128xf32>
    %44 = vector.extract_strided_slice %18 {offsets = [0, 0], sizes = [8, 128], strides = [1, 1]} : vector<8x512xf32> to vector<8x128xf32>
    %45 = arith.negf %44 : vector<8x128xf32>
    %46 = math.exp %45 : vector<8x128xf32>
    %cst_22 = arith.constant 1.000000e+00 : f32
    %47 = vector.broadcast %cst_22 : f32 to vector<8x128xf32>
    %48 = arith.addf %47, %46 : vector<8x128xf32>
    %49 = arith.divf %47, %48 : vector<8x128xf32>
    %50 = vector.extract_strided_slice %18 {offsets = [0, 128], sizes = [8, 128], strides = [1, 1]} : vector<8x512xf32> to vector<8x128xf32>
    %51 = arith.negf %50 : vector<8x128xf32>
    %52 = math.exp %51 : vector<8x128xf32>
    %cst_23 = arith.constant 1.000000e+00 : f32
    %53 = vector.broadcast %cst_23 : f32 to vector<8x128xf32>
    %54 = arith.addf %53, %52 : vector<8x128xf32>
    %55 = arith.divf %53, %54 : vector<8x128xf32>
    %56 = vector.extract_strided_slice %18 {offsets = [0, 256], sizes = [8, 128], strides = [1, 1]} : vector<8x512xf32> to vector<8x128xf32>
    %57 = math.tanh %56 : vector<8x128xf32>
    %58 = vector.extract_strided_slice %18 {offsets = [0, 384], sizes = [8, 128], strides = [1, 1]} : vector<8x512xf32> to vector<8x128xf32>
    %59 = arith.negf %58 : vector<8x128xf32>
    %60 = math.exp %59 : vector<8x128xf32>
    %cst_24 = arith.constant 1.000000e+00 : f32
    %61 = vector.broadcast %cst_24 : f32 to vector<8x128xf32>
    %62 = arith.addf %61, %60 : vector<8x128xf32>
    %63 = arith.divf %61, %62 : vector<8x128xf32>
    %64 = arith.mulf %55, %12 : vector<8x128xf32>
    %65 = arith.mulf %49, %57 : vector<8x128xf32>
    %66 = arith.addf %64, %65 : vector<8x128xf32>
    %67 = math.tanh %66 : vector<8x128xf32>
    %68 = arith.mulf %63, %67 : vector<8x128xf32>
    %c8 = arith.constant 8 : index
    %c0_25 = arith.constant 0 : index
    %69 = vector.load %arg9[%c8, %c0_25] : memref<64x512xf32, #tpu.memory_space<vmem>>, vector<8x512xf32>
    %cst_26 = arith.constant dense<0.000000e+00> : vector<8x512xf32>
    %70 = tpu.matmul %43, %10, %cst_26 {dimension_numbers = #tpu.dot_dimension_numbers<[1], [0], [0], [1], [0, 0, 1, 1], [], []>} : vector<8x128xf32>, vector<128x512xf32>, vector<8x512xf32> -> vector<8x512xf32>
    %71 = arith.addf %69, %70 : vector<8x512xf32>
    %c48 = arith.constant 48 : index
    %c0_27 = arith.constant 0 : index
    %72 = vector.load %arg10[%c48, %c0_27] : memref<64x512xf32, #tpu.memory_space<vmem>>, vector<8x512xf32>
    %cst_28 = arith.constant dense<0.000000e+00> : vector<8x512xf32>
    %73 = tpu.matmul %68, %11, %cst_28 {dimension_numbers = #tpu.dot_dimension_numbers<[1], [0], [0], [1], [0, 0, 1, 1], [], []>} : vector<8x128xf32>, vector<128x512xf32>, vector<8x512xf32> -> vector<8x512xf32>
    %74 = arith.addf %72, %73 : vector<8x512xf32>
    %75 = vector.extract_strided_slice %71 {offsets = [0, 0], sizes = [8, 128], strides = [1, 1]} : vector<8x512xf32> to vector<8x128xf32>
    %76 = arith.negf %75 : vector<8x128xf32>
    %77 = math.exp %76 : vector<8x128xf32>
    %cst_29 = arith.constant 1.000000e+00 : f32
    %78 = vector.broadcast %cst_29 : f32 to vector<8x128xf32>
    %79 = arith.addf %78, %77 : vector<8x128xf32>
    %80 = arith.divf %78, %79 : vector<8x128xf32>
    %81 = vector.extract_strided_slice %71 {offsets = [0, 128], sizes = [8, 128], strides = [1, 1]} : vector<8x512xf32> to vector<8x128xf32>
    %82 = arith.negf %81 : vector<8x128xf32>
    %83 = math.exp %82 : vector<8x128xf32>
    %cst_30 = arith.constant 1.000000e+00 : f32
    %84 = vector.broadcast %cst_30 : f32 to vector<8x128xf32>
    %85 = arith.addf %84, %83 : vector<8x128xf32>
    %86 = arith.divf %84, %85 : vector<8x128xf32>
    %87 = vector.extract_strided_slice %71 {offsets = [0, 256], sizes = [8, 128], strides = [1, 1]} : vector<8x512xf32> to vector<8x128xf32>
    %88 = math.tanh %87 : vector<8x128xf32>
    %89 = vector.extract_strided_slice %71 {offsets = [0, 384], sizes = [8, 128], strides = [1, 1]} : vector<8x512xf32> to vector<8x128xf32>
    %90 = arith.negf %89 : vector<8x128xf32>
    %91 = math.exp %90 : vector<8x128xf32>
    %cst_31 = arith.constant 1.000000e+00 : f32
    %92 = vector.broadcast %cst_31 : f32 to vector<8x128xf32>
    %93 = arith.addf %92, %91 : vector<8x128xf32>
    %94 = arith.divf %92, %93 : vector<8x128xf32>
    %95 = arith.mulf %86, %41 : vector<8x128xf32>
    %96 = arith.mulf %80, %88 : vector<8x128xf32>
    %97 = arith.addf %95, %96 : vector<8x128xf32>
    %98 = math.tanh %97 : vector<8x128xf32>
    %99 = arith.mulf %94, %98 : vector<8x128xf32>
    %100 = vector.extract_strided_slice %74 {offsets = [0, 0], sizes = [8, 128], strides = [1, 1]} : vector<8x512xf32> to vector<8x128xf32>
    %101 = arith.negf %100 : vector<8x128xf32>
    %102 = math.exp %101 : vector<8x128xf32>
    %cst_32 = arith.constant 1.000000e+00 : f32
    %103 = vector.broadcast %cst_32 : f32 to vector<8x128xf32>
    %104 = arith.addf %103, %102 : vector<8x128xf32>
    %105 = arith.divf %103, %104 : vector<8x128xf32>
    %106 = vector.extract_strided_slice %74 {offsets = [0, 128], sizes = [8, 128], strides = [1, 1]} : vector<8x512xf32> to vector<8x128xf32>
    %107 = arith.negf %106 : vector<8x128xf32>
    %108 = math.exp %107 : vector<8x128xf32>
    %cst_33 = arith.constant 1.000000e+00 : f32
    %109 = vector.broadcast %cst_33 : f32 to vector<8x128xf32>
    %110 = arith.addf %109, %108 : vector<8x128xf32>
    %111 = arith.divf %109, %110 : vector<8x128xf32>
    %112 = vector.extract_strided_slice %74 {offsets = [0, 256], sizes = [8, 128], strides = [1, 1]} : vector<8x512xf32> to vector<8x128xf32>
    %113 = math.tanh %112 : vector<8x128xf32>
    %114 = vector.extract_strided_slice %74 {offsets = [0, 384], sizes = [8, 128], strides = [1, 1]} : vector<8x512xf32> to vector<8x128xf32>
    %115 = arith.negf %114 : vector<8x128xf32>
    %116 = math.exp %115 : vector<8x128xf32>
    %cst_34 = arith.constant 1.000000e+00 : f32
    %117 = vector.broadcast %cst_34 : f32 to vector<8x128xf32>
    %118 = arith.addf %117, %116 : vector<8x128xf32>
    %119 = arith.divf %117, %118 : vector<8x128xf32>
    %120 = arith.mulf %111, %66 : vector<8x128xf32>
    %121 = arith.mulf %105, %113 : vector<8x128xf32>
    %122 = arith.addf %120, %121 : vector<8x128xf32>
    %123 = math.tanh %122 : vector<8x128xf32>
    %124 = arith.mulf %119, %123 : vector<8x128xf32>
    %c16 = arith.constant 16 : index
    %c0_35 = arith.constant 0 : index
    %125 = vector.load %arg9[%c16, %c0_35] : memref<64x512xf32, #tpu.memory_space<vmem>>, vector<8x512xf32>
    %cst_36 = arith.constant dense<0.000000e+00> : vector<8x512xf32>
    %126 = tpu.matmul %99, %10, %cst_36 {dimension_numbers = #tpu.dot_dimension_numbers<[1], [0], [0], [1], [0, 0, 1, 1], [], []>} : vector<8x128xf32>, vector<128x512xf32>, vector<8x512xf32> -> vector<8x512xf32>
    %127 = arith.addf %125, %126 : vector<8x512xf32>
    %c40 = arith.constant 40 : index
    %c0_37 = arith.constant 0 : index
    %128 = vector.load %arg10[%c40, %c0_37] : memref<64x512xf32, #tpu.memory_space<vmem>>, vector<8x512xf32>
    %cst_38 = arith.constant dense<0.000000e+00> : vector<8x512xf32>
    %129 = tpu.matmul %124, %11, %cst_38 {dimension_numbers = #tpu.dot_dimension_numbers<[1], [0], [0], [1], [0, 0, 1, 1], [], []>} : vector<8x128xf32>, vector<128x512xf32>, vector<8x512xf32> -> vector<8x512xf32>
    %130 = arith.addf %128, %129 : vector<8x512xf32>
    %131 = vector.extract_strided_slice %127 {offsets = [0, 0], sizes = [8, 128], strides = [1, 1]} : vector<8x512xf32> to vector<8x128xf32>
    %132 = arith.negf %131 : vector<8x128xf32>
    %133 = math.exp %132 : vector<8x128xf32>
    %cst_39 = arith.constant 1.000000e+00 : f32
    %134 = vector.broadcast %cst_39 : f32 to vector<8x128xf32>
    %135 = arith.addf %134, %133 : vector<8x128xf32>
    %136 = arith.divf %134, %135 : vector<8x128xf32>
    %137 = vector.extract_strided_slice %127 {offsets = [0, 128], sizes = [8, 128], strides = [1, 1]} : vector<8x512xf32> to vector<8x128xf32>
    %138 = arith.negf %137 : vector<8x128xf32>
    %139 = math.exp %138 : vector<8x128xf32>
    %cst_40 = arith.constant 1.000000e+00 : f32
    %140 = vector.broadcast %cst_40 : f32 to vector<8x128xf32>
    %141 = arith.addf %140, %139 : vector<8x128xf32>
    %142 = arith.divf %140, %141 : vector<8x128xf32>
    %143 = vector.extract_strided_slice %127 {offsets = [0, 256], sizes = [8, 128], strides = [1, 1]} : vector<8x512xf32> to vector<8x128xf32>
    %144 = math.tanh %143 : vector<8x128xf32>
    %145 = vector.extract_strided_slice %127 {offsets = [0, 384], sizes = [8, 128], strides = [1, 1]} : vector<8x512xf32> to vector<8x128xf32>
    %146 = arith.negf %145 : vector<8x128xf32>
    %147 = math.exp %146 : vector<8x128xf32>
    %cst_41 = arith.constant 1.000000e+00 : f32
    %148 = vector.broadcast %cst_41 : f32 to vector<8x128xf32>
    %149 = arith.addf %148, %147 : vector<8x128xf32>
    %150 = arith.divf %148, %149 : vector<8x128xf32>
    %151 = arith.mulf %142, %97 : vector<8x128xf32>
    %152 = arith.mulf %136, %144 : vector<8x128xf32>
    %153 = arith.addf %151, %152 : vector<8x128xf32>
    %154 = math.tanh %153 : vector<8x128xf32>
    %155 = arith.mulf %150, %154 : vector<8x128xf32>
    %156 = vector.extract_strided_slice %130 {offsets = [0, 0], sizes = [8, 128], strides = [1, 1]} : vector<8x512xf32> to vector<8x128xf32>
    %157 = arith.negf %156 : vector<8x128xf32>
    %158 = math.exp %157 : vector<8x128xf32>
    %cst_42 = arith.constant 1.000000e+00 : f32
    %159 = vector.broadcast %cst_42 : f32 to vector<8x128xf32>
    %160 = arith.addf %159, %158 : vector<8x128xf32>
    %161 = arith.divf %159, %160 : vector<8x128xf32>
    %162 = vector.extract_strided_slice %130 {offsets = [0, 128], sizes = [8, 128], strides = [1, 1]} : vector<8x512xf32> to vector<8x128xf32>
    %163 = arith.negf %162 : vector<8x128xf32>
    %164 = math.exp %163 : vector<8x128xf32>
    %cst_43 = arith.constant 1.000000e+00 : f32
    %165 = vector.broadcast %cst_43 : f32 to vector<8x128xf32>
    %166 = arith.addf %165, %164 : vector<8x128xf32>
    %167 = arith.divf %165, %166 : vector<8x128xf32>
    %168 = vector.extract_strided_slice %130 {offsets = [0, 256], sizes = [8, 128], strides = [1, 1]} : vector<8x512xf32> to vector<8x128xf32>
    %169 = math.tanh %168 : vector<8x128xf32>
    %170 = vector.extract_strided_slice %130 {offsets = [0, 384], sizes = [8, 128], strides = [1, 1]} : vector<8x512xf32> to vector<8x128xf32>
    %171 = arith.negf %170 : vector<8x128xf32>
    %172 = math.exp %171 : vector<8x128xf32>
    %cst_44 = arith.constant 1.000000e+00 : f32
    %173 = vector.broadcast %cst_44 : f32 to vector<8x128xf32>
    %174 = arith.addf %173, %172 : vector<8x128xf32>
    %175 = arith.divf %173, %174 : vector<8x128xf32>
    %176 = arith.mulf %167, %122 : vector<8x128xf32>
    %177 = arith.mulf %161, %169 : vector<8x128xf32>
    %178 = arith.addf %176, %177 : vector<8x128xf32>
    %179 = math.tanh %178 : vector<8x128xf32>
    %180 = arith.mulf %175, %179 : vector<8x128xf32>
    %c24 = arith.constant 24 : index
    %c0_45 = arith.constant 0 : index
    %181 = vector.load %arg9[%c24, %c0_45] : memref<64x512xf32, #tpu.memory_space<vmem>>, vector<8x512xf32>
    %cst_46 = arith.constant dense<0.000000e+00> : vector<8x512xf32>
    %182 = tpu.matmul %155, %10, %cst_46 {dimension_numbers = #tpu.dot_dimension_numbers<[1], [0], [0], [1], [0, 0, 1, 1], [], []>} : vector<8x128xf32>, vector<128x512xf32>, vector<8x512xf32> -> vector<8x512xf32>
    %183 = arith.addf %181, %182 : vector<8x512xf32>
    %c32 = arith.constant 32 : index
    %c0_47 = arith.constant 0 : index
    %184 = vector.load %arg10[%c32, %c0_47] : memref<64x512xf32, #tpu.memory_space<vmem>>, vector<8x512xf32>
    %cst_48 = arith.constant dense<0.000000e+00> : vector<8x512xf32>
    %185 = tpu.matmul %180, %11, %cst_48 {dimension_numbers = #tpu.dot_dimension_numbers<[1], [0], [0], [1], [0, 0, 1, 1], [], []>} : vector<8x128xf32>, vector<128x512xf32>, vector<8x512xf32> -> vector<8x512xf32>
    %186 = arith.addf %184, %185 : vector<8x512xf32>
    %187 = vector.extract_strided_slice %183 {offsets = [0, 0], sizes = [8, 128], strides = [1, 1]} : vector<8x512xf32> to vector<8x128xf32>
    %188 = arith.negf %187 : vector<8x128xf32>
    %189 = math.exp %188 : vector<8x128xf32>
    %cst_49 = arith.constant 1.000000e+00 : f32
    %190 = vector.broadcast %cst_49 : f32 to vector<8x128xf32>
    %191 = arith.addf %190, %189 : vector<8x128xf32>
    %192 = arith.divf %190, %191 : vector<8x128xf32>
    %193 = vector.extract_strided_slice %183 {offsets = [0, 128], sizes = [8, 128], strides = [1, 1]} : vector<8x512xf32> to vector<8x128xf32>
    %194 = arith.negf %193 : vector<8x128xf32>
    %195 = math.exp %194 : vector<8x128xf32>
    %cst_50 = arith.constant 1.000000e+00 : f32
    %196 = vector.broadcast %cst_50 : f32 to vector<8x128xf32>
    %197 = arith.addf %196, %195 : vector<8x128xf32>
    %198 = arith.divf %196, %197 : vector<8x128xf32>
    %199 = vector.extract_strided_slice %183 {offsets = [0, 256], sizes = [8, 128], strides = [1, 1]} : vector<8x512xf32> to vector<8x128xf32>
    %200 = math.tanh %199 : vector<8x128xf32>
    %201 = vector.extract_strided_slice %183 {offsets = [0, 384], sizes = [8, 128], strides = [1, 1]} : vector<8x512xf32> to vector<8x128xf32>
    %202 = arith.negf %201 : vector<8x128xf32>
    %203 = math.exp %202 : vector<8x128xf32>
    %cst_51 = arith.constant 1.000000e+00 : f32
    %204 = vector.broadcast %cst_51 : f32 to vector<8x128xf32>
    %205 = arith.addf %204, %203 : vector<8x128xf32>
    %206 = arith.divf %204, %205 : vector<8x128xf32>
    %207 = arith.mulf %198, %153 : vector<8x128xf32>
    %208 = arith.mulf %192, %200 : vector<8x128xf32>
    %209 = arith.addf %207, %208 : vector<8x128xf32>
    %210 = math.tanh %209 : vector<8x128xf32>
    %211 = arith.mulf %206, %210 : vector<8x128xf32>
    %212 = vector.extract_strided_slice %186 {offsets = [0, 0], sizes = [8, 128], strides = [1, 1]} : vector<8x512xf32> to vector<8x128xf32>
    %213 = arith.negf %212 : vector<8x128xf32>
    %214 = math.exp %213 : vector<8x128xf32>
    %cst_52 = arith.constant 1.000000e+00 : f32
    %215 = vector.broadcast %cst_52 : f32 to vector<8x128xf32>
    %216 = arith.addf %215, %214 : vector<8x128xf32>
    %217 = arith.divf %215, %216 : vector<8x128xf32>
    %218 = vector.extract_strided_slice %186 {offsets = [0, 128], sizes = [8, 128], strides = [1, 1]} : vector<8x512xf32> to vector<8x128xf32>
    %219 = arith.negf %218 : vector<8x128xf32>
    %220 = math.exp %219 : vector<8x128xf32>
    %cst_53 = arith.constant 1.000000e+00 : f32
    %221 = vector.broadcast %cst_53 : f32 to vector<8x128xf32>
    %222 = arith.addf %221, %220 : vector<8x128xf32>
    %223 = arith.divf %221, %222 : vector<8x128xf32>
    %224 = vector.extract_strided_slice %186 {offsets = [0, 256], sizes = [8, 128], strides = [1, 1]} : vector<8x512xf32> to vector<8x128xf32>
    %225 = math.tanh %224 : vector<8x128xf32>
    %226 = vector.extract_strided_slice %186 {offsets = [0, 384], sizes = [8, 128], strides = [1, 1]} : vector<8x512xf32> to vector<8x128xf32>
    %227 = arith.negf %226 : vector<8x128xf32>
    %228 = math.exp %227 : vector<8x128xf32>
    %cst_54 = arith.constant 1.000000e+00 : f32
    %229 = vector.broadcast %cst_54 : f32 to vector<8x128xf32>
    %230 = arith.addf %229, %228 : vector<8x128xf32>
    %231 = arith.divf %229, %230 : vector<8x128xf32>
    %232 = arith.mulf %223, %178 : vector<8x128xf32>
    %233 = arith.mulf %217, %225 : vector<8x128xf32>
    %234 = arith.addf %232, %233 : vector<8x128xf32>
    %235 = math.tanh %234 : vector<8x128xf32>
    %236 = arith.mulf %231, %235 : vector<8x128xf32>
    %c32_55 = arith.constant 32 : index
    %c0_56 = arith.constant 0 : index
    %237 = vector.load %arg9[%c32_55, %c0_56] : memref<64x512xf32, #tpu.memory_space<vmem>>, vector<8x512xf32>
    %cst_57 = arith.constant dense<0.000000e+00> : vector<8x512xf32>
    %238 = tpu.matmul %211, %10, %cst_57 {dimension_numbers = #tpu.dot_dimension_numbers<[1], [0], [0], [1], [0, 0, 1, 1], [], []>} : vector<8x128xf32>, vector<128x512xf32>, vector<8x512xf32> -> vector<8x512xf32>
    %239 = arith.addf %237, %238 : vector<8x512xf32>
    %c24_58 = arith.constant 24 : index
    %c0_59 = arith.constant 0 : index
    %240 = vector.load %arg10[%c24_58, %c0_59] : memref<64x512xf32, #tpu.memory_space<vmem>>, vector<8x512xf32>
    %cst_60 = arith.constant dense<0.000000e+00> : vector<8x512xf32>
    %241 = tpu.matmul %236, %11, %cst_60 {dimension_numbers = #tpu.dot_dimension_numbers<[1], [0], [0], [1], [0, 0, 1, 1], [], []>} : vector<8x128xf32>, vector<128x512xf32>, vector<8x512xf32> -> vector<8x512xf32>
    %242 = arith.addf %240, %241 : vector<8x512xf32>
    %243 = vector.extract_strided_slice %239 {offsets = [0, 0], sizes = [8, 128], strides = [1, 1]} : vector<8x512xf32> to vector<8x128xf32>
    %244 = arith.negf %243 : vector<8x128xf32>
    %245 = math.exp %244 : vector<8x128xf32>
    %cst_61 = arith.constant 1.000000e+00 : f32
    %246 = vector.broadcast %cst_61 : f32 to vector<8x128xf32>
    %247 = arith.addf %246, %245 : vector<8x128xf32>
    %248 = arith.divf %246, %247 : vector<8x128xf32>
    %249 = vector.extract_strided_slice %239 {offsets = [0, 128], sizes = [8, 128], strides = [1, 1]} : vector<8x512xf32> to vector<8x128xf32>
    %250 = arith.negf %249 : vector<8x128xf32>
    %251 = math.exp %250 : vector<8x128xf32>
    %cst_62 = arith.constant 1.000000e+00 : f32
    %252 = vector.broadcast %cst_62 : f32 to vector<8x128xf32>
    %253 = arith.addf %252, %251 : vector<8x128xf32>
    %254 = arith.divf %252, %253 : vector<8x128xf32>
    %255 = vector.extract_strided_slice %239 {offsets = [0, 256], sizes = [8, 128], strides = [1, 1]} : vector<8x512xf32> to vector<8x128xf32>
    %256 = math.tanh %255 : vector<8x128xf32>
    %257 = vector.extract_strided_slice %239 {offsets = [0, 384], sizes = [8, 128], strides = [1, 1]} : vector<8x512xf32> to vector<8x128xf32>
    %258 = arith.negf %257 : vector<8x128xf32>
    %259 = math.exp %258 : vector<8x128xf32>
    %cst_63 = arith.constant 1.000000e+00 : f32
    %260 = vector.broadcast %cst_63 : f32 to vector<8x128xf32>
    %261 = arith.addf %260, %259 : vector<8x128xf32>
    %262 = arith.divf %260, %261 : vector<8x128xf32>
    %263 = arith.mulf %254, %209 : vector<8x128xf32>
    %264 = arith.mulf %248, %256 : vector<8x128xf32>
    %265 = arith.addf %263, %264 : vector<8x128xf32>
    %266 = math.tanh %265 : vector<8x128xf32>
    %267 = arith.mulf %262, %266 : vector<8x128xf32>
    %268 = vector.extract_strided_slice %242 {offsets = [0, 0], sizes = [8, 128], strides = [1, 1]} : vector<8x512xf32> to vector<8x128xf32>
    %269 = arith.negf %268 : vector<8x128xf32>
    %270 = math.exp %269 : vector<8x128xf32>
    %cst_64 = arith.constant 1.000000e+00 : f32
    %271 = vector.broadcast %cst_64 : f32 to vector<8x128xf32>
    %272 = arith.addf %271, %270 : vector<8x128xf32>
    %273 = arith.divf %271, %272 : vector<8x128xf32>
    %274 = vector.extract_strided_slice %242 {offsets = [0, 128], sizes = [8, 128], strides = [1, 1]} : vector<8x512xf32> to vector<8x128xf32>
    %275 = arith.negf %274 : vector<8x128xf32>
    %276 = math.exp %275 : vector<8x128xf32>
    %cst_65 = arith.constant 1.000000e+00 : f32
    %277 = vector.broadcast %cst_65 : f32 to vector<8x128xf32>
    %278 = arith.addf %277, %276 : vector<8x128xf32>
    %279 = arith.divf %277, %278 : vector<8x128xf32>
    %280 = vector.extract_strided_slice %242 {offsets = [0, 256], sizes = [8, 128], strides = [1, 1]} : vector<8x512xf32> to vector<8x128xf32>
    %281 = math.tanh %280 : vector<8x128xf32>
    %282 = vector.extract_strided_slice %242 {offsets = [0, 384], sizes = [8, 128], strides = [1, 1]} : vector<8x512xf32> to vector<8x128xf32>
    %283 = arith.negf %282 : vector<8x128xf32>
    %284 = math.exp %283 : vector<8x128xf32>
    %cst_66 = arith.constant 1.000000e+00 : f32
    %285 = vector.broadcast %cst_66 : f32 to vector<8x128xf32>
    %286 = arith.addf %285, %284 : vector<8x128xf32>
    %287 = arith.divf %285, %286 : vector<8x128xf32>
    %288 = arith.mulf %279, %234 : vector<8x128xf32>
    %289 = arith.mulf %273, %281 : vector<8x128xf32>
    %290 = arith.addf %288, %289 : vector<8x128xf32>
    %291 = math.tanh %290 : vector<8x128xf32>
    %292 = arith.mulf %287, %291 : vector<8x128xf32>
    %c40_67 = arith.constant 40 : index
    %c0_68 = arith.constant 0 : index
    %293 = vector.load %arg9[%c40_67, %c0_68] : memref<64x512xf32, #tpu.memory_space<vmem>>, vector<8x512xf32>
    %cst_69 = arith.constant dense<0.000000e+00> : vector<8x512xf32>
    %294 = tpu.matmul %267, %10, %cst_69 {dimension_numbers = #tpu.dot_dimension_numbers<[1], [0], [0], [1], [0, 0, 1, 1], [], []>} : vector<8x128xf32>, vector<128x512xf32>, vector<8x512xf32> -> vector<8x512xf32>
    %295 = arith.addf %293, %294 : vector<8x512xf32>
    %c16_70 = arith.constant 16 : index
    %c0_71 = arith.constant 0 : index
    %296 = vector.load %arg10[%c16_70, %c0_71] : memref<64x512xf32, #tpu.memory_space<vmem>>, vector<8x512xf32>
    %cst_72 = arith.constant dense<0.000000e+00> : vector<8x512xf32>
    %297 = tpu.matmul %292, %11, %cst_72 {dimension_numbers = #tpu.dot_dimension_numbers<[1], [0], [0], [1], [0, 0, 1, 1], [], []>} : vector<8x128xf32>, vector<128x512xf32>, vector<8x512xf32> -> vector<8x512xf32>
    %298 = arith.addf %296, %297 : vector<8x512xf32>
    %299 = vector.extract_strided_slice %295 {offsets = [0, 0], sizes = [8, 128], strides = [1, 1]} : vector<8x512xf32> to vector<8x128xf32>
    %300 = arith.negf %299 : vector<8x128xf32>
    %301 = math.exp %300 : vector<8x128xf32>
    %cst_73 = arith.constant 1.000000e+00 : f32
    %302 = vector.broadcast %cst_73 : f32 to vector<8x128xf32>
    %303 = arith.addf %302, %301 : vector<8x128xf32>
    %304 = arith.divf %302, %303 : vector<8x128xf32>
    %305 = vector.extract_strided_slice %295 {offsets = [0, 128], sizes = [8, 128], strides = [1, 1]} : vector<8x512xf32> to vector<8x128xf32>
    %306 = arith.negf %305 : vector<8x128xf32>
    %307 = math.exp %306 : vector<8x128xf32>
    %cst_74 = arith.constant 1.000000e+00 : f32
    %308 = vector.broadcast %cst_74 : f32 to vector<8x128xf32>
    %309 = arith.addf %308, %307 : vector<8x128xf32>
    %310 = arith.divf %308, %309 : vector<8x128xf32>
    %311 = vector.extract_strided_slice %295 {offsets = [0, 256], sizes = [8, 128], strides = [1, 1]} : vector<8x512xf32> to vector<8x128xf32>
    %312 = math.tanh %311 : vector<8x128xf32>
    %313 = vector.extract_strided_slice %295 {offsets = [0, 384], sizes = [8, 128], strides = [1, 1]} : vector<8x512xf32> to vector<8x128xf32>
    %314 = arith.negf %313 : vector<8x128xf32>
    %315 = math.exp %314 : vector<8x128xf32>
    %cst_75 = arith.constant 1.000000e+00 : f32
    %316 = vector.broadcast %cst_75 : f32 to vector<8x128xf32>
    %317 = arith.addf %316, %315 : vector<8x128xf32>
    %318 = arith.divf %316, %317 : vector<8x128xf32>
    %319 = arith.mulf %310, %265 : vector<8x128xf32>
    %320 = arith.mulf %304, %312 : vector<8x128xf32>
    %321 = arith.addf %319, %320 : vector<8x128xf32>
    %322 = math.tanh %321 : vector<8x128xf32>
    %323 = arith.mulf %318, %322 : vector<8x128xf32>
    %324 = vector.extract_strided_slice %298 {offsets = [0, 0], sizes = [8, 128], strides = [1, 1]} : vector<8x512xf32> to vector<8x128xf32>
    %325 = arith.negf %324 : vector<8x128xf32>
    %326 = math.exp %325 : vector<8x128xf32>
    %cst_76 = arith.constant 1.000000e+00 : f32
    %327 = vector.broadcast %cst_76 : f32 to vector<8x128xf32>
    %328 = arith.addf %327, %326 : vector<8x128xf32>
    %329 = arith.divf %327, %328 : vector<8x128xf32>
    %330 = vector.extract_strided_slice %298 {offsets = [0, 128], sizes = [8, 128], strides = [1, 1]} : vector<8x512xf32> to vector<8x128xf32>
    %331 = arith.negf %330 : vector<8x128xf32>
    %332 = math.exp %331 : vector<8x128xf32>
    %cst_77 = arith.constant 1.000000e+00 : f32
    %333 = vector.broadcast %cst_77 : f32 to vector<8x128xf32>
    %334 = arith.addf %333, %332 : vector<8x128xf32>
    %335 = arith.divf %333, %334 : vector<8x128xf32>
    %336 = vector.extract_strided_slice %298 {offsets = [0, 256], sizes = [8, 128], strides = [1, 1]} : vector<8x512xf32> to vector<8x128xf32>
    %337 = math.tanh %336 : vector<8x128xf32>
    %338 = vector.extract_strided_slice %298 {offsets = [0, 384], sizes = [8, 128], strides = [1, 1]} : vector<8x512xf32> to vector<8x128xf32>
    %339 = arith.negf %338 : vector<8x128xf32>
    %340 = math.exp %339 : vector<8x128xf32>
    %cst_78 = arith.constant 1.000000e+00 : f32
    %341 = vector.broadcast %cst_78 : f32 to vector<8x128xf32>
    %342 = arith.addf %341, %340 : vector<8x128xf32>
    %343 = arith.divf %341, %342 : vector<8x128xf32>
    %344 = arith.mulf %335, %290 : vector<8x128xf32>
    %345 = arith.mulf %329, %337 : vector<8x128xf32>
    %346 = arith.addf %344, %345 : vector<8x128xf32>
    %347 = math.tanh %346 : vector<8x128xf32>
    %348 = arith.mulf %343, %347 : vector<8x128xf32>
    %c48_79 = arith.constant 48 : index
    %c0_80 = arith.constant 0 : index
    %349 = vector.load %arg9[%c48_79, %c0_80] : memref<64x512xf32, #tpu.memory_space<vmem>>, vector<8x512xf32>
    %cst_81 = arith.constant dense<0.000000e+00> : vector<8x512xf32>
    %350 = tpu.matmul %323, %10, %cst_81 {dimension_numbers = #tpu.dot_dimension_numbers<[1], [0], [0], [1], [0, 0, 1, 1], [], []>} : vector<8x128xf32>, vector<128x512xf32>, vector<8x512xf32> -> vector<8x512xf32>
    %351 = arith.addf %349, %350 : vector<8x512xf32>
    %c8_82 = arith.constant 8 : index
    %c0_83 = arith.constant 0 : index
    %352 = vector.load %arg10[%c8_82, %c0_83] : memref<64x512xf32, #tpu.memory_space<vmem>>, vector<8x512xf32>
    %cst_84 = arith.constant dense<0.000000e+00> : vector<8x512xf32>
    %353 = tpu.matmul %348, %11, %cst_84 {dimension_numbers = #tpu.dot_dimension_numbers<[1], [0], [0], [1], [0, 0, 1, 1], [], []>} : vector<8x128xf32>, vector<128x512xf32>, vector<8x512xf32> -> vector<8x512xf32>
    %354 = arith.addf %352, %353 : vector<8x512xf32>
    %355 = vector.extract_strided_slice %351 {offsets = [0, 0], sizes = [8, 128], strides = [1, 1]} : vector<8x512xf32> to vector<8x128xf32>
    %356 = arith.negf %355 : vector<8x128xf32>
    %357 = math.exp %356 : vector<8x128xf32>
    %cst_85 = arith.constant 1.000000e+00 : f32
    %358 = vector.broadcast %cst_85 : f32 to vector<8x128xf32>
    %359 = arith.addf %358, %357 : vector<8x128xf32>
    %360 = arith.divf %358, %359 : vector<8x128xf32>
    %361 = vector.extract_strided_slice %351 {offsets = [0, 128], sizes = [8, 128], strides = [1, 1]} : vector<8x512xf32> to vector<8x128xf32>
    %362 = arith.negf %361 : vector<8x128xf32>
    %363 = math.exp %362 : vector<8x128xf32>
    %cst_86 = arith.constant 1.000000e+00 : f32
    %364 = vector.broadcast %cst_86 : f32 to vector<8x128xf32>
    %365 = arith.addf %364, %363 : vector<8x128xf32>
    %366 = arith.divf %364, %365 : vector<8x128xf32>
    %367 = vector.extract_strided_slice %351 {offsets = [0, 256], sizes = [8, 128], strides = [1, 1]} : vector<8x512xf32> to vector<8x128xf32>
    %368 = math.tanh %367 : vector<8x128xf32>
    %369 = vector.extract_strided_slice %351 {offsets = [0, 384], sizes = [8, 128], strides = [1, 1]} : vector<8x512xf32> to vector<8x128xf32>
    %370 = arith.negf %369 : vector<8x128xf32>
    %371 = math.exp %370 : vector<8x128xf32>
    %cst_87 = arith.constant 1.000000e+00 : f32
    %372 = vector.broadcast %cst_87 : f32 to vector<8x128xf32>
    %373 = arith.addf %372, %371 : vector<8x128xf32>
    %374 = arith.divf %372, %373 : vector<8x128xf32>
    %375 = arith.mulf %366, %321 : vector<8x128xf32>
    %376 = arith.mulf %360, %368 : vector<8x128xf32>
    %377 = arith.addf %375, %376 : vector<8x128xf32>
    %378 = math.tanh %377 : vector<8x128xf32>
    %379 = arith.mulf %374, %378 : vector<8x128xf32>
    %380 = vector.extract_strided_slice %354 {offsets = [0, 0], sizes = [8, 128], strides = [1, 1]} : vector<8x512xf32> to vector<8x128xf32>
    %381 = arith.negf %380 : vector<8x128xf32>
    %382 = math.exp %381 : vector<8x128xf32>
    %cst_88 = arith.constant 1.000000e+00 : f32
    %383 = vector.broadcast %cst_88 : f32 to vector<8x128xf32>
    %384 = arith.addf %383, %382 : vector<8x128xf32>
    %385 = arith.divf %383, %384 : vector<8x128xf32>
    %386 = vector.extract_strided_slice %354 {offsets = [0, 128], sizes = [8, 128], strides = [1, 1]} : vector<8x512xf32> to vector<8x128xf32>
    %387 = arith.negf %386 : vector<8x128xf32>
    %388 = math.exp %387 : vector<8x128xf32>
    %cst_89 = arith.constant 1.000000e+00 : f32
    %389 = vector.broadcast %cst_89 : f32 to vector<8x128xf32>
    %390 = arith.addf %389, %388 : vector<8x128xf32>
    %391 = arith.divf %389, %390 : vector<8x128xf32>
    %392 = vector.extract_strided_slice %354 {offsets = [0, 256], sizes = [8, 128], strides = [1, 1]} : vector<8x512xf32> to vector<8x128xf32>
    %393 = math.tanh %392 : vector<8x128xf32>
    %394 = vector.extract_strided_slice %354 {offsets = [0, 384], sizes = [8, 128], strides = [1, 1]} : vector<8x512xf32> to vector<8x128xf32>
    %395 = arith.negf %394 : vector<8x128xf32>
    %396 = math.exp %395 : vector<8x128xf32>
    %cst_90 = arith.constant 1.000000e+00 : f32
    %397 = vector.broadcast %cst_90 : f32 to vector<8x128xf32>
    %398 = arith.addf %397, %396 : vector<8x128xf32>
    %399 = arith.divf %397, %398 : vector<8x128xf32>
    %400 = arith.mulf %391, %346 : vector<8x128xf32>
    %401 = arith.mulf %385, %393 : vector<8x128xf32>
    %402 = arith.addf %400, %401 : vector<8x128xf32>
    %403 = math.tanh %402 : vector<8x128xf32>
    %404 = arith.mulf %399, %403 : vector<8x128xf32>
    %c56_91 = arith.constant 56 : index
    %c0_92 = arith.constant 0 : index
    %405 = vector.load %arg9[%c56_91, %c0_92] : memref<64x512xf32, #tpu.memory_space<vmem>>, vector<8x512xf32>
    %cst_93 = arith.constant dense<0.000000e+00> : vector<8x512xf32>
    %406 = tpu.matmul %379, %10, %cst_93 {dimension_numbers = #tpu.dot_dimension_numbers<[1], [0], [0], [1], [0, 0, 1, 1], [], []>} : vector<8x128xf32>, vector<128x512xf32>, vector<8x512xf32> -> vector<8x512xf32>
    %407 = arith.addf %405, %406 : vector<8x512xf32>
    %c0_94 = arith.constant 0 : index
    %c0_95 = arith.constant 0 : index
    %408 = vector.load %arg10[%c0_94, %c0_95] : memref<64x512xf32, #tpu.memory_space<vmem>>, vector<8x512xf32>
    %cst_96 = arith.constant dense<0.000000e+00> : vector<8x512xf32>
    %409 = tpu.matmul %404, %11, %cst_96 {dimension_numbers = #tpu.dot_dimension_numbers<[1], [0], [0], [1], [0, 0, 1, 1], [], []>} : vector<8x128xf32>, vector<128x512xf32>, vector<8x512xf32> -> vector<8x512xf32>
    %410 = arith.addf %408, %409 : vector<8x512xf32>
    %411 = vector.extract_strided_slice %407 {offsets = [0, 0], sizes = [8, 128], strides = [1, 1]} : vector<8x512xf32> to vector<8x128xf32>
    %412 = arith.negf %411 : vector<8x128xf32>
    %413 = math.exp %412 : vector<8x128xf32>
    %cst_97 = arith.constant 1.000000e+00 : f32
    %414 = vector.broadcast %cst_97 : f32 to vector<8x128xf32>
    %415 = arith.addf %414, %413 : vector<8x128xf32>
    %416 = arith.divf %414, %415 : vector<8x128xf32>
    %417 = vector.extract_strided_slice %407 {offsets = [0, 128], sizes = [8, 128], strides = [1, 1]} : vector<8x512xf32> to vector<8x128xf32>
    %418 = arith.negf %417 : vector<8x128xf32>
    %419 = math.exp %418 : vector<8x128xf32>
    %cst_98 = arith.constant 1.000000e+00 : f32
    %420 = vector.broadcast %cst_98 : f32 to vector<8x128xf32>
    %421 = arith.addf %420, %419 : vector<8x128xf32>
    %422 = arith.divf %420, %421 : vector<8x128xf32>
    %423 = vector.extract_strided_slice %407 {offsets = [0, 256], sizes = [8, 128], strides = [1, 1]} : vector<8x512xf32> to vector<8x128xf32>
    %424 = math.tanh %423 : vector<8x128xf32>
    %425 = vector.extract_strided_slice %407 {offsets = [0, 384], sizes = [8, 128], strides = [1, 1]} : vector<8x512xf32> to vector<8x128xf32>
    %426 = arith.negf %425 : vector<8x128xf32>
    %427 = math.exp %426 : vector<8x128xf32>
    %cst_99 = arith.constant 1.000000e+00 : f32
    %428 = vector.broadcast %cst_99 : f32 to vector<8x128xf32>
    %429 = arith.addf %428, %427 : vector<8x128xf32>
    %430 = arith.divf %428, %429 : vector<8x128xf32>
    %431 = arith.mulf %422, %377 : vector<8x128xf32>
    %432 = arith.mulf %416, %424 : vector<8x128xf32>
    %433 = arith.addf %431, %432 : vector<8x128xf32>
    %434 = math.tanh %433 : vector<8x128xf32>
    %435 = arith.mulf %430, %434 : vector<8x128xf32>
    %436 = vector.extract_strided_slice %410 {offsets = [0, 0], sizes = [8, 128], strides = [1, 1]} : vector<8x512xf32> to vector<8x128xf32>
    %437 = arith.negf %436 : vector<8x128xf32>
    %438 = math.exp %437 : vector<8x128xf32>
    %cst_100 = arith.constant 1.000000e+00 : f32
    %439 = vector.broadcast %cst_100 : f32 to vector<8x128xf32>
    %440 = arith.addf %439, %438 : vector<8x128xf32>
    %441 = arith.divf %439, %440 : vector<8x128xf32>
    %442 = vector.extract_strided_slice %410 {offsets = [0, 128], sizes = [8, 128], strides = [1, 1]} : vector<8x512xf32> to vector<8x128xf32>
    %443 = arith.negf %442 : vector<8x128xf32>
    %444 = math.exp %443 : vector<8x128xf32>
    %cst_101 = arith.constant 1.000000e+00 : f32
    %445 = vector.broadcast %cst_101 : f32 to vector<8x128xf32>
    %446 = arith.addf %445, %444 : vector<8x128xf32>
    %447 = arith.divf %445, %446 : vector<8x128xf32>
    %448 = vector.extract_strided_slice %410 {offsets = [0, 256], sizes = [8, 128], strides = [1, 1]} : vector<8x512xf32> to vector<8x128xf32>
    %449 = math.tanh %448 : vector<8x128xf32>
    %450 = vector.extract_strided_slice %410 {offsets = [0, 384], sizes = [8, 128], strides = [1, 1]} : vector<8x512xf32> to vector<8x128xf32>
    %451 = arith.negf %450 : vector<8x128xf32>
    %452 = math.exp %451 : vector<8x128xf32>
    %cst_102 = arith.constant 1.000000e+00 : f32
    %453 = vector.broadcast %cst_102 : f32 to vector<8x128xf32>
    %454 = arith.addf %453, %452 : vector<8x128xf32>
    %455 = arith.divf %453, %454 : vector<8x128xf32>
    %456 = arith.mulf %447, %402 : vector<8x128xf32>
    %457 = arith.mulf %441, %449 : vector<8x128xf32>
    %458 = arith.addf %456, %457 : vector<8x128xf32>
    %459 = math.tanh %458 : vector<8x128xf32>
    %460 = arith.mulf %455, %459 : vector<8x128xf32>
    %c0_103 = arith.constant 0 : index
    %c0_104 = arith.constant 0 : index
    %461 = vector.load %arg5[%c0_103, %c0_104] : memref<1x128xf32, #tpu.memory_space<vmem>>, vector<1x128xf32>
    %462 = vector.broadcast %461 : vector<1x128xf32> to vector<8x128xf32>
    %463 = arith.mulf %435, %462 : vector<8x128xf32>
    %cst_105 = arith.constant dense<0.000000e+00> : vector<8xf32>
    %464 = vector.multi_reduction <add>, %463, %cst_105 [1] : vector<8x128xf32> to vector<8xf32>
    %465 = vector.shape_cast %464 : vector<8xf32> to vector<8x1xf32>
    %c0_106 = arith.constant 0 : index
    %c0_107 = arith.constant 0 : index
    %466 = vector.load %arg6[%c0_106, %c0_107] : memref<1x128xf32, #tpu.memory_space<vmem>>, vector<1x128xf32>
    %467 = vector.broadcast %466 : vector<1x128xf32> to vector<8x128xf32>
    %468 = arith.mulf %460, %467 : vector<8x128xf32>
    %cst_108 = arith.constant dense<0.000000e+00> : vector<8xf32>
    %469 = vector.multi_reduction <add>, %468, %cst_108 [1] : vector<8x128xf32> to vector<8xf32>
    %470 = vector.shape_cast %469 : vector<8xf32> to vector<8x1xf32>
    %471 = arith.addf %465, %470 : vector<8x1xf32>
    %c0_109 = arith.constant 0 : index
    %c0_110 = arith.constant 0 : index
    %472 = vector.load %arg7[%c0_109, %c0_110] : memref<1x1xf32, #tpu.memory_space<vmem>>, vector<1x1xf32>
    %473 = vector.broadcast %472 : vector<1x1xf32> to vector<8x1xf32>
    %474 = arith.addf %471, %473 : vector<8x1xf32>
    %475 = arith.negf %474 : vector<8x1xf32>
    %476 = math.exp %475 : vector<8x1xf32>
    %cst_111 = arith.constant 1.000000e+00 : f32
    %477 = vector.broadcast %cst_111 : f32 to vector<8x1xf32>
    %478 = arith.addf %477, %476 : vector<8x1xf32>
    %479 = arith.divf %477, %478 : vector<8x1xf32>
    %c0_112 = arith.constant 0 : index
    %c0_113 = arith.constant 0 : index
    %480 = vector.load %arg8[%c0_112, %c0_113] : memref<8x1xf32, #tpu.memory_space<vmem>>, vector<8x1xf32>
    tpu.vector_store %arg8[%c0_112, %c0_113], %479 {strides = array<i32>} : memref<8x1xf32, #tpu.memory_space<vmem>>, vector<8x1xf32>,
    return
  }
}

</mosaic_0001>

<bundles_post_ra>
// kernel: tpu_custom_call.1
= control target key start
LH: loop header
LB: loop body
LE: loop exit
PB: predicated region body
PF: predicated region fallthrough
CT: control target
= control target key end

     0   :  { %s6252_s0 = inlined_call_operand.vmem [shape: f32[64,4], index: 0, kind: input, shape index: {}]   ;;  %s6253_s1 = inlined_call_operand.vmem [shape: f32[4,1024], index: 1, kind: input, shape index: {}]   ;;  %s6254_s2 = inlined_call_operand.vmem [shape: f32[1,1024], index: 2, kind: input, shape index: {}]   ;;  %s6255_s3 = inlined_call_operand.hbm [shape: f32[128,512], index: 3, kind: input, shape index: {}]   ;;  %s6256_s4 = inlined_call_operand.hbm [shape: f32[128,512], index: 4, kind: input, shape index: {}]   ;;  %s6257_s5 = inlined_call_operand.vmem [shape: f32[1,128], index: 5, kind: input, shape index: {}]   ;;  %s6258_s6 = inlined_call_operand.vmem [shape: f32[1,128], index: 6, kind: input, shape index: {}]   ;;  %s6259_s7 = inlined_call_operand.<no memory space> [shape: f32[1,1], index: 7, kind: input, shape index: {}]   ;;  %s6260_s8 = inlined_call_operand.vmem [shape: f32[8,1], index: 8, kind: output, shape index: {}]  }
   0x1   :  { %v13_v0 = vstv %s6259_s7 }
   0x2   :  { %14 = vst [vmem:[#allocation4] sm:$0x1] %v13_v0 }
   0x3   :  { %15 = vsyncpa [#allocation6], 0 }
   0x4   :  { %16 = vsyncpa [#allocation8], 0  ;;  %s5195_s29 = smov [#allocation5]   ;;  %s5147_s11 = scalar_lea.hbm %s6255_s3, 8192 }
   0x5   :  { %s28_s30 = sshll.u32 %s5195_s29, 4  ;;  %p5148_p0 = scmp.ne.s32.totalorder %s6255_s3, %s5147_s11  ;;  %s29_s30 = int_to_ptr.vmem [resolvable:$true] %s28_s30 }
   0x6   :  { %p5151_p1 = scmp.lt.u32.totalorder %s5147_s11, %s6255_s3 }
   0x8   :  { %p5153_p2 = pnand %p5151_p1, %p5148_p0 }
   0xa   :  { %5156 = shalt.err (!%p5153_p2)
}
   0xb   :  { %s5157_s7 = scalar_lea.vmem %s29_s30, 8192  ;;  %p5162_p4 = scmp.lt.s32.totalorder %s29_s30, %s29_s30 }
   0xc   :  { %p5158_p3 = scmp.ne.s32.totalorder %s29_s30, %s5157_s7  ;;  %p5163_p5 = scmp.lt.s32.totalorder %s5157_s7, %s5157_s7 }
   0xe   :  { %p5164_p6 = por %p5163_p5, %p5162_p4 }
  0x10   :  { %p5165_p7 = pnand %p5164_p6, %p5158_p3 }
  0x12   :  { %5168 = shalt.err (!%p5165_p7)
}
  0x13   :  { %s5196_s16 = smov 512   ;;  %s5197_s17 = smov 32  }
  0x14   :  { %34 = dma.hbm_to_vmem [thread:$0]  %s6255_s3, 8192, %s29_s30, [#allocation6], %s5196_s16, %s5196_s16, %s5197_s17  }
  0x15   :  { %s5198_s20 = smov [#allocation7]   ;;  %s5169_s24 = scalar_lea.hbm %s6256_s4, 8192 }
  0x16   :  { %s40_s21 = sshll.u32 %s5198_s20, 4  ;;  %p5170_p8 = scmp.ne.s32.totalorder %s6256_s4, %s5169_s24  ;;  %s41_s21 = int_to_ptr.vmem [resolvable:$true] %s40_s21 }
  0x17   :  { %p5173_p9 = scmp.lt.u32.totalorder %s5169_s24, %s6256_s4 }
  0x19   :  { %p5175_p10 = pnand %p5173_p9, %p5170_p8 }
  0x1b   :  { %5178 = shalt.err (!%p5175_p10)
}
  0x1c   :  { %s5179_s29 = scalar_lea.vmem %s41_s21, 8192  ;;  %p5184_p12 = scmp.lt.s32.totalorder %s41_s21, %s41_s21 }
  0x1d   :  { %p5180_p11 = scmp.ne.s32.totalorder %s41_s21, %s5179_s29  ;;  %p5185_p13 = scmp.lt.s32.totalorder %s5179_s29, %s5179_s29 }
  0x1f   :  { %p5186_p0 = por %p5185_p13, %p5184_p12 }
  0x21   :  { %p5187_p1 = pnand %p5186_p0, %p5180_p11 }
  0x23   :  { %5190 = shalt.err (!%p5187_p1)
}
  0x24   :  { %46 = dma.hbm_to_vmem [thread:$0]  %s6256_s4, 8192, %s41_s21, [#allocation8], %s5196_s16, %s5196_s16, %s5197_s17  }
  0x25   :  { %5191 = dma.done.wait [#allocation6], 8192  }
  0x26   :  { %5192 = vsyncadd [#allocation6], 4294959104 }
  0x27   :  { %5193 = dma.done.wait [#allocation8], 8192  }
  0x28   :  { %5194 = vsyncadd [#allocation8], 4294959104  ;;  %v6261_v1 = vmov 0.0   ;;  %v67_v2 = vld [vmem:[%s6253_s1] sm:$0xff]  ;;  %vm146_vm0 = vcmask 1043456   ;;  %v68_v3 = vld [vmem:[%s6253_s1 + $0x8] sm:$0xff] }
  0x29   :  { %227 = vmatprep.mubr.f32.mxu0 %v6261_v1  ;;  %340 = vmatprep.mubr.f32.mxu1 %v6261_v1  ;;  %v117_v4 = vcombine.high %v67_v2, %v67_v2  ;;  %v118_v5 = vcombine.high %v68_v3, %v68_v3  ;;  %v69_v6 = vld [vmem:[%s6253_s1 + $0x10] sm:$0xff]  ;;  %v5286_v7 = vld [vmem:[%s6252_s0] sm:$0xff]  ;;  %vm121_vm1 = vcmask 31744   ;;  %v70_v9 = vld [vmem:[%s6253_s1 + $0x18] sm:$0xff]  ;;  %vm3626_vm2 = vcmask 7168  }
  0x2a   :  { %v119_v8 = vcombine.high %v69_v6, %v69_v6  ;;  %v120_v10 = vcombine.high %v70_v9, %v70_v9  ;;  %v680_v11 = vld [vmem:[#allocation5 + $0x8] sm:$0xff]  ;;  %v682_v14 = vld [vmem:[#allocation5 + $0x18] sm:$0xff]  ;;  %v679_v24 = vld [vmem:[#allocation5] sm:$0xff] }
  0x2b   :  { %3634 = vmatprep.subr.msk.mxu0 %vm146_vm0, %v117_v4  ;;  %3644 = vmatprep.subr.msk.mxu1 %vm146_vm0, %v118_v5  ;;  %v684_v12 = vld [vmem:[#allocation5 + $0x28] sm:$0xff]  ;;  %v686_v15 = vld [vmem:[#allocation5 + $0x38] sm:$0xff]  ;;  %v683_v25 = vld [vmem:[#allocation5 + $0x20] sm:$0xff] }
  0x2c   :  { %3635 = vmatpush1.msk.msra.mxu0 %vm146_vm0, %v67_v2  ;;  %3645 = vmatpush1.msk.msra.mxu1 %vm146_vm0, %v68_v3  ;;  %v5299_v13 = vpack.c.bf16 %v684_v12, %v680_v11  ;;  %v5306_v16 = vld [vmem:[%s6252_s0 + $0x8] sm:$0xff]  ;;  %v5312_v17 = vpack.c.bf16 %v686_v15, %v682_v14  ;;  %v5323_v18 = vld [vmem:[%s6252_s0 + $0x10] sm:$0xff]  ;;  %v5336_v19 = vld [vmem:[%s6252_s0 + $0x18] sm:$0xff]  ;;  %v5388_v32 = vpack.c.bf16 %v683_v25, %v679_v24 }
  0x2d   :  { %3636 = vmatmul.mubr.msk.f32.vlgmr.msra.gmra.mrb[0].mxu0 %vm121_vm1, %v5286_v7  ;;  %3646 = vmatmul.mubr.msk.f32.vlgmr.msra.gmra.mrb[0].mxu1 %vm121_vm1, %v5286_v7  ;;  %v5347_v20 = vld [vmem:[%s6252_s0 + $0x20] sm:$0xff]  ;;  %v5358_v21 = vld [vmem:[%s6252_s0 + $0x28] sm:$0xff]  ;;  %v5369_v22 = vld [vmem:[%s6252_s0 + $0x30] sm:$0xff] }
  0x2e   :  { %3654 = vmatprep.subr.msk.mxu0 %vm146_vm0, %v119_v8  ;;  %233 = vmatprep.mubr.f32.mxu0 %v6261_v1  ;;  %v5380_v23 = vld [vmem:[%s6252_s0 + $0x38] sm:$0xff]  ;;  %v688_v28 = vld [vmem:[#allocation5 + $0x48] sm:$0xff]  ;;  %v687_v34 = vld [vmem:[#allocation5 + $0x40] sm:$0xff] }
  0x2f   :  { %3655 = vmatpush1.msk.msra.mxu0 %vm146_vm0, %v69_v6  ;;  %346 = vmatprep.mubr.f32.mxu1 %v6261_v1  ;;  %v681_v26 = vld [vmem:[#allocation5 + $0x10] sm:$0xff]  ;;  %v692_v29 = vld [vmem:[#allocation5 + $0x68] sm:$0xff]  ;;  %v690_v30 = vld [vmem:[#allocation5 + $0x58] sm:$0xff] }
  0x30   :  { %3664 = vmatprep.subr.msk.mxu1 %vm146_vm0, %v120_v10  ;;  %3727 = vmatprep.subr.bf16.mxu0 %v5299_v13  ;;  %v685_v27 = vld [vmem:[#allocation5 + $0x30] sm:$0xff]  ;;  %v694_v31 = vld [vmem:[#allocation5 + $0x78] sm:$0xff]  ;;  %v691_v35 = vld [vmem:[#allocation5 + $0x60] sm:$0xff]  ;;  %v5392_v38 = vpack.c.bf16 %v692_v29, %v688_v28 }
  0x31   :  { %3637 = vmatmul.mubr.msk.f32.gmra.mrb[2].mxu0 %vm121_vm1, %v5306_v16  ;;  %3647 = vmatmul.mubr.msk.f32.gmra.mrb[2].mxu1 %vm121_vm1, %v5306_v16  ;;  %v5390_v33 = vpack.c.bf16 %v685_v27, %v681_v26  ;;  %v689_v36 = vld [vmem:[#allocation5 + $0x50] sm:$0xff]  ;;  %v5394_v39 = vpack.c.bf16 %v694_v31, %v690_v30  ;;  %v696_v40 = vld [vmem:[#allocation5 + $0x88] sm:$0xff]  ;;  %v698_v42 = vld [vmem:[#allocation5 + $0x98] sm:$0xff]  ;;  %v5402_v44 = vpack.c.bf16 %v691_v35, %v687_v34 }
  0x32   :  { %239 = vmatprep.mubr.f32.mxu0 %v6261_v1  ;;  %352 = vmatprep.mubr.f32.mxu1 %v6261_v1  ;;  %v693_v37 = vld [vmem:[#allocation5 + $0x70] sm:$0xff]  ;;  %v700_v41 = vld [vmem:[#allocation5 + $0xa8] sm:$0xff]  ;;  %v702_v43 = vld [vmem:[#allocation5 + $0xb8] sm:$0xff] }
  0x33   :  { %3665 = vmatpush1.msk.msra.mxu1 %vm146_vm0, %v70_v9  ;;  %v5404_v45 = vpack.c.bf16 %v693_v37, %v689_v36  ;;  %v695_v46 = vld [vmem:[#allocation5 + $0x80] sm:$0xff]  ;;  %v697_v48 = vld [vmem:[#allocation5 + $0x90] sm:$0xff]  ;;  %v5410_v50 = vpack.c.bf16 %v700_v41, %v696_v40  ;;  %v5412_v51 = vpack.c.bf16 %v702_v43, %v698_v42  ;;  %v704_v52 = vld [vmem:[#allocation5 + $0xc8] sm:$0xff] }
  0x34   :  { %3759 = vmatprep.subr.bf16.mxu1 %v5312_v17  ;;  %v699_v47 = vld [vmem:[#allocation5 + $0xa0] sm:$0xff]  ;;  %v701_v49 = vld [vmem:[#allocation5 + $0xb0] sm:$0xff]  ;;  %v708_v53 = vld [vmem:[#allocation5 + $0xe8] sm:$0xff] }
  0x35   :  { %3638 = vmatmul.mubr.msk.f32.gmra.mrb[4].mxu0 %vm121_vm1, %v5323_v18  ;;  %3648 = vmatmul.mubr.msk.f32.gmra.mrb[4].mxu1 %vm121_vm1, %v5323_v18  ;;  %6346 = vst [vmem:[#allocation11_spill] sm:$0xff] %v5410_v50  ;;  %6347 = vst [vmem:[#allocation12_spill] sm:$0xff] %v5412_v51  ;;  %v706_v54 = vld [vmem:[#allocation5 + $0xd8] sm:$0xff]  ;;  %v5420_v56 = vpack.c.bf16 %v699_v47, %v695_v46  ;;  %v5422_v57 = vpack.c.bf16 %v701_v49, %v697_v48  ;;  %v703_v58 = vld [vmem:[#allocation5 + $0xc0] sm:$0xff] }
  0x36   :  { %245 = vmatprep.mubr.f32.mxu0 %v6261_v1  ;;  %358 = vmatprep.mubr.f32.mxu1 %v6261_v1  ;;  %v710_v55 = vld [vmem:[#allocation5 + $0xf8] sm:$0xff]  ;;  %v707_v59 = vld [vmem:[#allocation5 + $0xe0] sm:$0xff]  ;;  %v705_v60 = vld [vmem:[#allocation5 + $0xd0] sm:$0xff]  ;;  %v5428_v62 = vpack.c.bf16 %v708_v53, %v704_v52 }
  0x37   :  { %6348 = vst [vmem:[#allocation13_spill] sm:$0xff] %v5420_v56  ;;  %6349 = vst [vmem:[#allocation14_spill] sm:$0xff] %v5422_v57  ;;  %v709_v61 = vld [vmem:[#allocation5 + $0xf0] sm:$0xff]  ;;  %v5430_v63 = vpack.c.bf16 %v710_v55, %v706_v54  ;;  %v712_v0 = vld [vmem:[#allocation5 + $0x108] sm:$0xff]  ;;  %v5438_v5 = vpack.c.bf16 %v707_v59, %v703_v58 }
  0x38   :  { %6350 = vst [vmem:[#allocation15_spill] sm:$0xff] %v5428_v62  ;;  %v716_v2 = vld [vmem:[#allocation5 + $0x128] sm:$0xff]  ;;  %v714_v3 = vld [vmem:[#allocation5 + $0x118] sm:$0xff]  ;;  %v5440_v6 = vpack.c.bf16 %v709_v61, %v705_v60  ;;  %v715_v8 = vld [vmem:[#allocation5 + $0x120] sm:$0xff] }
  0x39   :  { %3639 = vmatmul.mubr.msk.f32.gmra.mrb[6].mxu0 %vm121_vm1, %v5336_v19  ;;  %3649 = vmatmul.mubr.msk.f32.gmra.mrb[6].mxu1 %vm121_vm1, %v5336_v19  ;;  %6351 = vst [vmem:[#allocation16_spill] sm:$0xff] %v5430_v63  ;;  %v718_v4 = vld [vmem:[#allocation5 + $0x138] sm:$0xff]  ;;  %6352 = vst [vmem:[#allocation17_spill] sm:$0xff] %v5438_v5  ;;  %v713_v9 = vld [vmem:[#allocation5 + $0x110] sm:$0xff]  ;;  %v5446_v11 = vpack.c.bf16 %v716_v2, %v712_v0 }
  0x3a   :  { %251 = vmatprep.mubr.f32.mxu0 %v6261_v1  ;;  %364 = vmatprep.mubr.f32.mxu1 %v6261_v1  ;;  %6353 = vst [vmem:[#allocation18_spill] sm:$0xff] %v5440_v6  ;;  %v717_v10 = vld [vmem:[#allocation5 + $0x130] sm:$0xff]  ;;  %v5448_v12 = vpack.c.bf16 %v718_v4, %v714_v3  ;;  %v720_v14 = vld [vmem:[#allocation5 + $0x148] sm:$0xff]  ;;  %v719_v26 = vld [vmem:[#allocation5 + $0x140] sm:$0xff] }
  0x3b   :  { %6354 = vst [vmem:[#allocation19_spill] sm:$0xff] %v5446_v11  ;;  %v724_v15 = vld [vmem:[#allocation5 + $0x168] sm:$0xff]  ;;  %v5458_v25 = vpack.c.bf16 %v717_v10, %v713_v9  ;;  %v723_v27 = vld [vmem:[#allocation5 + $0x160] sm:$0xff]  ;;  %v721_v28 = vld [vmem:[#allocation5 + $0x150] sm:$0xff] }
  0x3c   :  { %6355 = vst [vmem:[#allocation20_spill] sm:$0xff] %v5448_v12  ;;  %v725_v29 = vld [vmem:[#allocation5 + $0x170] sm:$0xff]  ;;  %v728_v31 = vld [vmem:[#allocation5 + $0x188] sm:$0xff]  ;;  %v730_v35 = vld [vmem:[#allocation5 + $0x198] sm:$0xff]  ;;  %v5474_v37 = vpack.c.bf16 %v723_v27, %v719_v26 }
  0x3d   :  { %3640 = vmatmul.mubr.msk.f32.gmra.mrb[8].mxu0 %vm121_vm1, %v5347_v20  ;;  %3650 = vmatmul.mubr.msk.f32.gmra.mrb[8].mxu1 %vm121_vm1, %v5347_v20  ;;  %6357 = vst [vmem:[#allocation22_spill] sm:$0xff] %v5458_v25  ;;  %v732_v34 = vld [vmem:[#allocation5 + $0x1a8] sm:$0xff]  ;;  %v734_v36 = vld [vmem:[#allocation5 + $0x1b8] sm:$0xff]  ;;  %v5476_v40 = vpack.c.bf16 %v725_v29, %v721_v28  ;;  %v727_v41 = vld [vmem:[#allocation5 + $0x180] sm:$0xff] }
  0x3e   :  { %257 = vmatprep.mubr.f32.mxu0 %v6261_v1  ;;  %370 = vmatprep.mubr.f32.mxu1 %v6261_v1  ;;  %6360 = vst [vmem:[#allocation25_spill] sm:$0xff] %v5474_v37  ;;  %v731_v42 = vld [vmem:[#allocation5 + $0x1a0] sm:$0xff]  ;;  %v729_v43 = vld [vmem:[#allocation5 + $0x190] sm:$0xff]  ;;  %v5484_v47 = vpack.c.bf16 %v734_v36, %v730_v35  ;;  %v736_v48 = vld [vmem:[#allocation5 + $0x1c8] sm:$0xff] }
  0x3f   :  { %6361 = vst [vmem:[#allocation26_spill] sm:$0xff] %v5476_v40  ;;  %v733_v46 = vld [vmem:[#allocation5 + $0x1b0] sm:$0xff]  ;;  %v740_v49 = vld [vmem:[#allocation5 + $0x1e8] sm:$0xff]  ;;  %v738_v52 = vld [vmem:[#allocation5 + $0x1d8] sm:$0xff]  ;;  %v5492_v54 = vpack.c.bf16 %v731_v42, %v727_v41 }
  0x40   :  { %6363 = vst [vmem:[#allocation28_spill] sm:$0xff] %v5484_v47  ;;  %v742_v53 = vld [vmem:[#allocation5 + $0x1f8] sm:$0xff]  ;;  %v5494_v55 = vpack.c.bf16 %v733_v46, %v729_v43  ;;  %v735_v58 = vld [vmem:[#allocation5 + $0x1c0] sm:$0xff]  ;;  %v737_v60 = vld [vmem:[#allocation5 + $0x1d0] sm:$0xff] }
  0x41   :  { %3641 = vmatmul.mubr.msk.f32.gmra.mrb[10].mxu0 %vm121_vm1, %v5358_v21  ;;  %3651 = vmatmul.mubr.msk.f32.gmra.mrb[10].mxu1 %vm121_vm1, %v5358_v21  ;;  %6364 = vst [vmem:[#allocation29_spill] sm:$0xff] %v5492_v54  ;;  %v739_v59 = vld [vmem:[#allocation5 + $0x1e0] sm:$0xff]  ;;  %v741_v61 = vld [vmem:[#allocation5 + $0x1f0] sm:$0xff]  ;;  %v5502_v0 = vpack.c.bf16 %v742_v53, %v738_v52  ;;  %v744_v2 = vld [vmem:[#allocation7 + $0x8] sm:$0xff] }
  0x42   :  { %263 = vmatprep.mubr.f32.mxu0 %v6261_v1  ;;  %376 = vmatprep.mubr.f32.mxu1 %v6261_v1  ;;  %6365 = vst [vmem:[#allocation30_spill] sm:$0xff] %v5494_v55  ;;  %v748_v3 = vld [vmem:[#allocation7 + $0x28] sm:$0xff]  ;;  %v746_v4 = vld [vmem:[#allocation7 + $0x18] sm:$0xff]  ;;  %v5512_v9 = vpack.c.bf16 %v741_v61, %v737_v60  ;;  %v743_v10 = vld [vmem:[#allocation7] sm:$0xff] }
  0x43   :  { %6367 = vst [vmem:[#allocation32_spill] sm:$0xff] %v5502_v0  ;;  %v756_v27 = vld [vmem:[#allocation7 + $0x68] sm:$0xff]  ;;  %v754_v28 = vld [vmem:[#allocation7 + $0x58] sm:$0xff]  ;;  %v751_v35 = vld [vmem:[#allocation7 + $0x40] sm:$0xff] }
  0x44   :  { %6369 = vst [vmem:[#allocation34_spill] sm:$0xff] %v5512_v9  ;;  %v758_v29 = vld [vmem:[#allocation7 + $0x78] sm:$0xff]  ;;  %v755_v36 = vld [vmem:[#allocation7 + $0x60] sm:$0xff]  ;;  %v753_v43 = vld [vmem:[#allocation7 + $0x50] sm:$0xff] }
  0x45   :  { %3642 = vmatmul.mubr.msk.f32.gmra.mrb[12].mxu0 %vm121_vm1, %v5369_v22  ;;  %3652 = vmatmul.mubr.msk.f32.gmra.mrb[12].mxu1 %vm121_vm1, %v5369_v22  ;;  %v5536_v42 = vpack.c.bf16 %v758_v29, %v754_v28  ;;  %v760_v46 = vld [vmem:[#allocation7 + $0x88] sm:$0xff]  ;;  %v766_v52 = vld [vmem:[#allocation7 + $0xb8] sm:$0xff]  ;;  %v5544_v53 = vpack.c.bf16 %v755_v36, %v751_v35  ;;  %v763_v60 = vld [vmem:[#allocation7 + $0xa0] sm:$0xff] }
  0x46   :  { %269 = vmatprep.mubr.f32.mxu0 %v6261_v1  ;;  %382 = vmatprep.mubr.f32.mxu1 %v6261_v1  ;;  %v771_v28 = vld [vmem:[#allocation7 + $0xe0] sm:$0xff]  ;;  %v769_v36 = vld [vmem:[#allocation7 + $0xd0] sm:$0xff] }
  0x49   :  { %3643 = vmatmul.mubr.msk.f32.gmra.mrb[14].mxu0 %vm121_vm1, %v5380_v23  ;;  %3653 = vmatmul.mubr.msk.f32.gmra.mrb[14].mxu1 %vm121_vm1, %v5380_v23 }
  0x4a   :  { %453 = vmatprep.mubr.f32.mxu0 %v6261_v1  ;;  %566 = vmatprep.mubr.f32.mxu1 %v6261_v1 }
  0x4d   :  { %3656 = vmatmul.mubr.msk.f32.vlgmr.msra.gmra.mrb[16].mxu0 %vm121_vm1, %v5286_v7  ;;  %3666 = vmatmul.mubr.msk.f32.vlgmr.msra.gmra.mrb[16].mxu1 %vm121_vm1, %v5286_v7  ;;  %v711_v7 = vld [vmem:[#allocation5 + $0x100] sm:$0xff] }
  0x4e   :  { %3729 = vmatpush1.bf16.msra.mxu0 %v5388_v32  ;;  %3761 = vmatpush1.bf16.msra.mxu1 %v5390_v33  ;;  %v5456_v24 = vpack.c.bf16 %v715_v8, %v711_v7  ;;  %v750_v7 = vld [vmem:[#allocation7 + $0x38] sm:$0xff]  ;;  %v5510_v8 = vpack.c.bf16 %v739_v59, %v735_v58  ;;  %v759_v59 = vld [vmem:[#allocation7 + $0x80] sm:$0xff] }
  0x4f   :  { %459 = vmatprep.mubr.f32.mxu0 %v6261_v1  ;;  %572 = vmatprep.mubr.f32.mxu1 %v6261_v1  ;;  %v5520_v26 = vpack.c.bf16 %v750_v7, %v746_v4  ;;  %v765_v4 = vld [vmem:[#allocation7 + $0xb0] sm:$0xff]  ;;  %v768_v7 = vld [vmem:[#allocation7 + $0xc8] sm:$0xff] }
  0x50   :  { %3731 = vmatprep.subr.bf16.mxu0 %v5392_v38  ;;  %3763 = vmatprep.subr.bf16.mxu1 %v5394_v39  ;;  %6356 = vst [vmem:[#allocation21_spill] sm:$0xff] %v5456_v24  ;;  %6368 = vst [vmem:[#allocation33_spill] sm:$0xff] %v5510_v8 }
  0x51   :  { %3657 = vmatmul.mubr.msk.f32.gmra.mrb[18].mxu0 %vm121_vm1, %v5306_v16  ;;  %3667 = vmatmul.mubr.msk.f32.gmra.mrb[18].mxu1 %vm121_vm1, %v5306_v16  ;;  %v722_v16 = vld [vmem:[#allocation5 + $0x158] sm:$0xff]  ;;  %6371 = vst [vmem:[#allocation36_spill] sm:$0xff] %v5520_v26 }
  0x52   :  { %3733 = vmatpush1.bf16.msra.mxu0 %v5402_v44  ;;  %3765 = vmatpush1.bf16.msra.mxu1 %v5404_v45 }
  0x53   :  { %465 = vmatprep.mubr.f32.mxu0 %v6261_v1  ;;  %578 = vmatprep.mubr.f32.mxu1 %v6261_v1 }
  0x54   :  { %3735 = vmatprep.subr.bf16.mxu0 %v5410_v50  ;;  %3767 = vmatprep.subr.bf16.mxu1 %v5412_v51 }
  0x55   :  { %3658 = vmatmul.mubr.msk.f32.gmra.mrb[20].mxu0 %vm121_vm1, %v5323_v18  ;;  %3668 = vmatmul.mubr.msk.f32.gmra.mrb[20].mxu1 %vm121_vm1, %v5323_v18  ;;  %v726_v18 = vld [vmem:[#allocation5 + $0x178] sm:$0xff] }
  0x56   :  { %3737 = vmatpush1.bf16.msra.mxu0 %v5420_v56  ;;  %3769 = vmatpush1.bf16.msra.mxu1 %v5422_v57  ;;  %v5466_v30 = vpack.c.bf16 %v726_v18, %v722_v16  ;;  %v749_v16 = vld [vmem:[#allocation7 + $0x30] sm:$0xff]  ;;  %v5518_v18 = vpack.c.bf16 %v748_v3, %v744_v2 }
  0x57   :  { %471 = vmatprep.mubr.f32.mxu0 %v6261_v1  ;;  %584 = vmatprep.mubr.f32.mxu1 %v6261_v1  ;;  %v761_v3 = vld [vmem:[#allocation7 + $0x90] sm:$0xff] }
  0x58   :  { %3739 = vmatprep.subr.bf16.mxu0 %v5428_v62  ;;  %3771 = vmatprep.subr.bf16.mxu1 %v5430_v63  ;;  %6359 = vst [vmem:[#allocation24_spill] sm:$0xff] %v5466_v30  ;;  %6370 = vst [vmem:[#allocation35_spill] sm:$0xff] %v5518_v18 }
  0x59   :  { %3659 = vmatmul.mubr.msk.f32.gmra.mrb[22].mxu0 %vm121_vm1, %v5336_v19  ;;  %3669 = vmatmul.mubr.msk.f32.gmra.mrb[22].mxu1 %vm121_vm1, %v5336_v19  ;;  %v5464_v19 = vpack.c.bf16 %v724_v15, %v720_v14  ;;  %v747_v14 = vld [vmem:[#allocation7 + $0x20] sm:$0xff]  ;;  %v745_v15 = vld [vmem:[#allocation7 + $0x10] sm:$0xff] }
  0x5a   :  { %3741 = vmatpush1.bf16.msra.mxu0 %v5438_v5  ;;  %3773 = vmatpush1.bf16.msra.mxu1 %v5440_v6 }
  0x5b   :  { %477 = vmatprep.mubr.f32.mxu0 %v6261_v1  ;;  %590 = vmatprep.mubr.f32.mxu1 %v6261_v1  ;;  %6358 = vst [vmem:[#allocation23_spill] sm:$0xff] %v5464_v19 }
  0x5c   :  { %3743 = vmatprep.subr.bf16.mxu0 %v5446_v11  ;;  %3775 = vmatprep.subr.bf16.mxu1 %v5448_v12 }
  0x5d   :  { %3660 = vmatmul.mubr.msk.f32.gmra.mrb[24].mxu0 %vm121_vm1, %v5347_v20  ;;  %3670 = vmatmul.mubr.msk.f32.gmra.mrb[24].mxu1 %vm121_vm1, %v5347_v20  ;;  %v5482_v20 = vpack.c.bf16 %v732_v34, %v728_v31  ;;  %v5528_v31 = vpack.c.bf16 %v747_v14, %v743_v10  ;;  %v5530_v34 = vpack.c.bf16 %v749_v16, %v745_v15  ;;  %v772_v10 = vld [vmem:[#allocation7 + $0xe8] sm:$0xff]  ;;  %v770_v14 = vld [vmem:[#allocation7 + $0xd8] sm:$0xff] }
  0x5e   :  { %3745 = vmatpush1.bf16.msra.mxu0 %v5456_v24  ;;  %3777 = vmatpush1.bf16.msra.mxu1 %v5458_v25  ;;  %v774_v15 = vld [vmem:[#allocation7 + $0xf8] sm:$0xff]  ;;  %v5558_v16 = vpack.c.bf16 %v763_v60, %v759_v59  ;;  %v5564_v29 = vpack.c.bf16 %v772_v10, %v768_v7  ;;  %v775_v60 = vld [vmem:[#allocation7 + $0x100] sm:$0xff]  ;;  %v777_v10 = vld [vmem:[#allocation7 + $0x110] sm:$0xff] }
  0x5f   :  { %483 = vmatprep.mubr.f32.mxu0 %v6261_v1  ;;  %596 = vmatprep.mubr.f32.mxu1 %v6261_v1  ;;  %6362 = vst [vmem:[#allocation27_spill] sm:$0xff] %v5482_v20  ;;  %v5566_v35 = vpack.c.bf16 %v774_v15, %v770_v14  ;;  %v781_v14 = vld [vmem:[#allocation7 + $0x130] sm:$0xff]  ;;  %v784_v15 = vld [vmem:[#allocation7 + $0x148] sm:$0xff] }
  0x60   :  { %3747 = vmatprep.subr.bf16.mxu0 %v5464_v19  ;;  %3779 = vmatprep.subr.bf16.mxu1 %v5466_v30  ;;  %6372 = vst [vmem:[#allocation37_spill] sm:$0xff] %v5558_v16  ;;  %6374 = vst [vmem:[#allocation39_spill] sm:$0xff] %v5564_v29 }
  0x61   :  { %3661 = vmatmul.mubr.msk.f32.gmra.mrb[26].mxu0 %vm121_vm1, %v5358_v21  ;;  %3671 = vmatmul.mubr.msk.f32.gmra.mrb[26].mxu1 %vm121_vm1, %v5358_v21  ;;  %v5500_v21 = vpack.c.bf16 %v740_v49, %v736_v48  ;;  %v764_v48 = vld [vmem:[#allocation7 + $0xa8] sm:$0xff]  ;;  %v762_v49 = vld [vmem:[#allocation7 + $0x98] sm:$0xff]  ;;  %6375 = vst [vmem:[#allocation40_spill] sm:$0xff] %v5566_v35 }
  0x62   :  { %3749 = vmatpush1.bf16.msra.mxu0 %v5474_v37  ;;  %3781 = vmatpush1.bf16.msra.mxu1 %v5476_v40  ;;  %v5550_v61 = vpack.c.bf16 %v764_v48, %v760_v46  ;;  %v5552_v2 = vpack.c.bf16 %v766_v52, %v762_v49  ;;  %v780_v46 = vld [vmem:[#allocation7 + $0x128] sm:$0xff]  ;;  %v778_v48 = vld [vmem:[#allocation7 + $0x118] sm:$0xff] }
  0x63   :  { %489 = vmatprep.mubr.f32.mxu0 %v6261_v1  ;;  %602 = vmatprep.mubr.f32.mxu1 %v6261_v1  ;;  %6366 = vst [vmem:[#allocation31_spill] sm:$0xff] %v5500_v21  ;;  %v782_v49 = vld [vmem:[#allocation7 + $0x138] sm:$0xff] }
  0x64   :  { %3751 = vmatprep.subr.bf16.mxu0 %v5482_v20  ;;  %3783 = vmatprep.subr.bf16.mxu1 %v5484_v47  ;;  %v5578_v7 = vpack.c.bf16 %v782_v49, %v778_v48  ;;  %v785_v48 = vld [vmem:[#allocation7 + $0x150] sm:$0xff] }
  0x65   :  { %3662 = vmatmul.mubr.msk.f32.gmra.mrb[28].mxu0 %vm121_vm1, %v5369_v22  ;;  %3672 = vmatmul.mubr.msk.f32.gmra.mrb[28].mxu1 %vm121_vm1, %v5369_v22  ;;  %v752_v22 = vld [vmem:[#allocation7 + $0x48] sm:$0xff]  ;;  %v789_v49 = vld [vmem:[#allocation7 + $0x170] sm:$0xff] }
  0x66   :  { %3753 = vmatpush1.bf16.msra.mxu0 %v5492_v54  ;;  %3785 = vmatpush1.bf16.msra.mxu1 %v5494_v55  ;;  %v5534_v41 = vpack.c.bf16 %v756_v27, %v752_v22  ;;  %v5560_v22 = vpack.c.bf16 %v765_v4, %v761_v3  ;;  %v767_v27 = vld [vmem:[#allocation7 + $0xc0] sm:$0xff]  ;;  %6379 = vst [vmem:[#allocation44_spill] sm:$0xff] %v5578_v7 }
  0x67   :  { %495 = vmatprep.mubr.f32.mxu0 %v6261_v1  ;;  %608 = vmatprep.mubr.f32.mxu1 %v6261_v1  ;;  %v5570_v52 = vpack.c.bf16 %v771_v28, %v767_v27  ;;  %v779_v3 = vld [vmem:[#allocation7 + $0x120] sm:$0xff]  ;;  %v5584_v28 = vpack.c.bf16 %v781_v14, %v777_v10 }
  0x68   :  { %3755 = vmatprep.subr.bf16.mxu0 %v5500_v21  ;;  %3787 = vmatprep.subr.bf16.mxu1 %v5502_v0  ;;  %6373 = vst [vmem:[#allocation38_spill] sm:$0xff] %v5560_v22  ;;  %v5582_v27 = vpack.c.bf16 %v779_v3, %v775_v60  ;;  %v5596_v3 = vpack.c.bf16 %v789_v49, %v785_v48  ;;  %v791_v10 = vld [vmem:[#allocation7 + $0x180] sm:$0xff]  ;;  %v805_v49 = vld [vmem:[#allocation7 + $0x1f0] sm:$0xff] }
  0x69   :  { %3663 = vmatmul.mubr.msk.f32.gmra.mrb[30].mxu0 %vm121_vm1, %v5380_v23  ;;  %3673 = vmatmul.mubr.msk.f32.gmra.mrb[30].mxu1 %vm121_vm1, %v5380_v23  ;;  %v757_v23 = vld [vmem:[#allocation7 + $0x70] sm:$0xff]  ;;  %6376 = vst [vmem:[#allocation41_spill] sm:$0xff] %v5570_v52  ;;  %6381 = vst [vmem:[#allocation46_spill] sm:$0xff] %v5584_v28  ;;  %v795_v14 = vld [vmem:[#allocation7 + $0x1a0] sm:$0xff] }
  0x6a   :  { %3757 = vmatpush1.bf16.msra.mxu0 %v5510_v8  ;;  %3789 = vmatpush1.bf16.msra.mxu1 %v5512_v9  ;;  %v5546_v58 = vpack.c.bf16 %v757_v23, %v753_v43  ;;  %v773_v43 = vld [vmem:[#allocation7 + $0xf0] sm:$0xff]  ;;  %v776_v23 = vld [vmem:[#allocation7 + $0x108] sm:$0xff]  ;;  %6380 = vst [vmem:[#allocation45_spill] sm:$0xff] %v5582_v27  ;;  %v799_v48 = vld [vmem:[#allocation7 + $0x1c0] sm:$0xff] }
  0x6b   :  { %875 = vmatprep.mubr.f32.mxu0 %v6261_v1  ;;  %946 = vmatprep.mubr.f32.mxu1 %v6261_v1  ;;  %v5572_v59 = vpack.c.bf16 %v773_v43, %v769_v36  ;;  %v5576_v4 = vpack.c.bf16 %v780_v46, %v776_v23  ;;  %v783_v36 = vld [vmem:[#allocation7 + $0x140] sm:$0xff] }
  0x6c   :  { %3791 = vmatprep.subr.bf16.mxu0 %v5518_v18  ;;  %3823 = vmatprep.subr.bf16.mxu1 %v5520_v26  ;;  %v787_v43 = vld [vmem:[#allocation7 + $0x160] sm:$0xff] }
  0x6d   :  { %876 = vmatmul.mubr.f32.vlgmr.msra.gmra.mrb[0].mxu0 %v6261_v1  ;;  %947 = vmatmul.mubr.f32.vlgmr.msra.gmra.mrb[0].mxu1 %v6261_v1  ;;  %6377 = vst [vmem:[#allocation42_spill] sm:$0xff] %v5572_v59  ;;  %6378 = vst [vmem:[#allocation43_spill] sm:$0xff] %v5576_v4  ;;  %v5594_v60 = vpack.c.bf16 %v787_v43, %v783_v36  ;;  %v5606_v36 = vpack.c.bf16 %v795_v14, %v791_v10 }
  0x6e   :  { %3793 = vmatpush1.bf16.msra.mxu0 %v5528_v31  ;;  %3825 = vmatpush1.bf16.msra.mxu1 %v5530_v34 }
  0x6f   :  { %3795 = vmatprep.subr.bf16.mxu0 %v5534_v41  ;;  %3827 = vmatprep.subr.bf16.mxu1 %v5536_v42 }
  0x70   :  { %1025 = vmatprep.mubr.f32.mxu0 %v6261_v1  ;;  %1096 = vmatprep.mubr.f32.mxu1 %v6261_v1  ;;  %v788_v1 = vld [vmem:[#allocation7 + $0x168] sm:$0xff] }
  0x71   :  { %v5588_v23 = vpack.c.bf16 %v788_v1, %v784_v15  ;;  %v797_v15 = vld [vmem:[#allocation7 + $0x1b0] sm:$0xff] }
  0x72   :  { %3797 = vmatpush1.bf16.msra.mxu0 %v5544_v53  ;;  %3829 = vmatpush1.bf16.msra.mxu1 %v5546_v58 }
  0x73   :  { %3799 = vmatprep.subr.bf16.mxu0 %v5550_v61  ;;  %3831 = vmatprep.subr.bf16.mxu1 %v5552_v2 }
  0x76   :  { %3801 = vmatpush1.bf16.msra.mxu0 %v5558_v16  ;;  %3833 = vmatpush1.bf16.msra.mxu1 %v5560_v22  ;;  %v786_v16 = vld [vmem:[#allocation7 + $0x158] sm:$0xff] }
  0x77   :  { %3803 = vmatprep.subr.bf16.mxu0 %v5564_v29  ;;  %3835 = vmatprep.subr.bf16.mxu1 %v5566_v35  ;;  %v790_v22 = vld [vmem:[#allocation7 + $0x178] sm:$0xff]  ;;  %v792_v35 = vld [vmem:[#allocation7 + $0x188] sm:$0xff] }
  0x78   :  { %v5590_v46 = vpack.c.bf16 %v790_v22, %v786_v16  ;;  %v794_v29 = vld [vmem:[#allocation7 + $0x198] sm:$0xff]  ;;  %v793_v22 = vld [vmem:[#allocation7 + $0x190] sm:$0xff] }
  0x79   :  { %v5608_v43 = vpack.c.bf16 %v797_v15, %v793_v22  ;;  %v71_v22 = vld [vmem:[%s6254_s2] sm:$0xff] }
  0x7a   :  { %3805 = vmatpush1.bf16.msra.mxu0 %v5570_v52  ;;  %3837 = vmatpush1.bf16.msra.mxu1 %v5572_v59  ;;  %v796_v52 = vld [vmem:[#allocation7 + $0x1a8] sm:$0xff]  ;;  %v798_v59 = vld [vmem:[#allocation7 + $0x1b8] sm:$0xff] }
  0x7b   :  { %3807 = vmatprep.subr.bf16.mxu0 %v5576_v4  ;;  %3839 = vmatprep.subr.bf16.mxu1 %v5578_v7  ;;  %v5600_v1 = vpack.c.bf16 %v796_v52, %v792_v35  ;;  %v5602_v16 = vpack.c.bf16 %v798_v59, %v794_v29  ;;  %v800_v7 = vld [vmem:[#allocation7 + $0x1c8] sm:$0xff]  ;;  %v802_v4 = vld [vmem:[#allocation7 + $0x1d8] sm:$0xff]  ;;  %v803_v52 = vld [vmem:[#allocation7 + $0x1e0] sm:$0xff] }
  0x7c   :  { %v801_v59 = vld [vmem:[#allocation7 + $0x1d0] sm:$0xff]  ;;  %v5618_v10 = vpack.c.bf16 %v803_v52, %v799_v48 }
  0x7d   :  { %v5620_v14 = vpack.c.bf16 %v805_v49, %v801_v59 }
  0x7e   :  { %3809 = vmatpush1.bf16.msra.mxu0 %v5582_v27  ;;  %3841 = vmatpush1.bf16.msra.mxu1 %v5584_v28  ;;  %v804_v27 = vld [vmem:[#allocation7 + $0x1e8] sm:$0xff]  ;;  %v806_v28 = vld [vmem:[#allocation7 + $0x1f8] sm:$0xff] }
  0x7f   :  { %3811 = vmatprep.subr.bf16.mxu0 %v5588_v23  ;;  %3843 = vmatprep.subr.bf16.mxu1 %v5590_v46  ;;  %v5612_v29 = vpack.c.bf16 %v804_v27, %v800_v7  ;;  %v5614_v35 = vpack.c.bf16 %v806_v28, %v802_v4  ;;  %v6382_v4 = vmov 0.0   ;;  %v73_v7 = vlaneseq }
  0x81   :  { %v74_v27 = vshrl.u32 %v73_v7, 7 }
  0x82   :  { %3813 = vmatpush1.bf16.msra.mxu0 %v5594_v60  ;;  %3845 = vmatpush1.bf16.msra.mxu1 %v5596_v3 }
  0x83   :  { %3815 = vmatprep.subr.bf16.mxu0 %v5600_v1  ;;  %3847 = vmatprep.subr.bf16.mxu1 %v5602_v16  ;;  %v75_v28 = vsub.s32 0, %v74_v27  ;;  %v79_v15 = vsub.s32 1, %v74_v27 }
  0x85   :  { %v5667_v48 = vrot.slane %v71_v22, %v75_v28  ;;  %v5669_v52 = vrot.slane %v71_v22, %v79_v15 }
  0x86   :  { %3817 = vmatpush1.bf16.msra.mxu0 %v5606_v36  ;;  %3849 = vmatpush1.bf16.msra.mxu1 %v5608_v43 }
  0x87   :  { %3819 = vmatprep.subr.bf16.mxu0 %v5612_v29  ;;  %3851 = vmatprep.subr.bf16.mxu1 %v5614_v35  ;;  %6383 = vst [vmem:[#allocation47_spill] sm:$0xff] %v5667_v48  ;;  %6384 = vst [vmem:[#allocation48_spill] sm:$0xff] %v5669_v52 }
  0x8a   :  { %3821 = vmatpush1.bf16.msra.mxu0 %v5618_v10  ;;  %3853 = vmatpush1.bf16.msra.mxu1 %v5620_v14 }
  0x8b   :  { %3855 = vmatprep.subr.bf16.mxu0 %v5299_v13  ;;  %3887 = vmatprep.subr.bf16.mxu1 %v5312_v17 }
  0x8d   :  { %1026 = vmatmul.mubr.f32.vlgmr.msra.gmra.mrb[30].mxu0 %v6382_v4  ;;  %1097 = vmatmul.mubr.f32.vlgmr.msra.gmra.mrb[30].mxu1 %v6382_v4 }
  0x8e   :  { %3857 = vmatpush1.bf16.msra.mxu0 %v5388_v32  ;;  %3889 = vmatpush1.bf16.msra.mxu1 %v5390_v33 }
  0x8f   :  { %3859 = vmatprep.subr.bf16.mxu0 %v5392_v38  ;;  %3891 = vmatprep.subr.bf16.mxu1 %v5394_v39 }
  0x90   :  { %1223 = vmatprep.mubr.f32.mxu0 %v6382_v4  ;;  %1294 = vmatprep.mubr.f32.mxu1 %v6382_v4 }
  0x92   :  { %3861 = vmatpush1.bf16.msra.mxu0 %v5402_v44  ;;  %3893 = vmatpush1.bf16.msra.mxu1 %v5404_v45 }
  0x93   :  { %3863 = vmatprep.subr.bf16.mxu0 %v5410_v50  ;;  %3895 = vmatprep.subr.bf16.mxu1 %v5412_v51 }
  0x96   :  { %3865 = vmatpush1.bf16.msra.mxu0 %v5420_v56  ;;  %3897 = vmatpush1.bf16.msra.mxu1 %v5422_v57 }
  0x97   :  { %3867 = vmatprep.subr.bf16.mxu0 %v5428_v62  ;;  %3899 = vmatprep.subr.bf16.mxu1 %v5430_v63 }
  0x9a   :  { %3869 = vmatpush1.bf16.msra.mxu0 %v5438_v5  ;;  %3901 = vmatpush1.bf16.msra.mxu1 %v5440_v6 }
  0x9b   :  { %3871 = vmatprep.subr.bf16.mxu0 %v5446_v11  ;;  %3903 = vmatprep.subr.bf16.mxu1 %v5448_v12 }
  0x9e   :  { %3873 = vmatpush1.bf16.msra.mxu0 %v5456_v24  ;;  %3905 = vmatpush1.bf16.msra.mxu1 %v5458_v25 }
  0x9f   :  { %3875 = vmatprep.subr.bf16.mxu0 %v5464_v19  ;;  %3907 = vmatprep.subr.bf16.mxu1 %v5466_v30 }
  0xa2   :  { %3877 = vmatpush1.bf16.msra.mxu0 %v5474_v37  ;;  %3909 = vmatpush1.bf16.msra.mxu1 %v5476_v40 }
  0xa3   :  { %3879 = vmatprep.subr.bf16.mxu0 %v5482_v20  ;;  %3911 = vmatprep.subr.bf16.mxu1 %v5484_v47 }
  0xa6   :  { %3881 = vmatpush1.bf16.msra.mxu0 %v5492_v54  ;;  %3913 = vmatpush1.bf16.msra.mxu1 %v5494_v55  ;;  %v83_v54 = vsub.s32 2, %v74_v27 }
  0xa7   :  { %3883 = vmatprep.subr.bf16.mxu0 %v5500_v21  ;;  %3915 = vmatprep.subr.bf16.mxu1 %v5502_v0 }
  0xa8   :  { %v5676_v15 = vrot.slane %v71_v22, %v83_v54 }
  0xaa   :  { %3885 = vmatpush1.bf16.msra.mxu0 %v5510_v8  ;;  %3917 = vmatpush1.bf16.msra.mxu1 %v5512_v9  ;;  %v87_v8 = vsub.s32 3, %v74_v27  ;;  %6386 = vst [vmem:[#allocation50_spill] sm:$0xff] %v5676_v15 }
  0xab   :  { %3919 = vmatprep.subr.bf16.mxu0 %v5518_v18  ;;  %3951 = vmatprep.subr.bf16.mxu1 %v5520_v26 }
  0xac   :  { %v5673_v55 = vrot.slane %v71_v22, %v87_v8  ;;  %v91_v8 = vsub.s32 4, %v74_v27 }
  0xae   :  { %6385 = vst [vmem:[#allocation49_spill] sm:$0xff] %v5673_v55 }
 0x140   :  { %v877_v59 = vpop.f32.mrb[0].mxu0  ;;  %v948_v49 = vpop.f32.mrb[0].mxu1 }
 0x141   :  { %v4750_v9 = vadd.f32 %v877_v59, %v5667_v48  ;;  %v879_v18 = vpop.f32.mrb[1].mxu0  ;;  %v950_v0 = vpop.f32.mrb[1].mxu1  ;;  %v4766_v20 = vadd.f32 %v948_v49, %v5676_v15 }
 0x142   :  { %v4751_v26 = vadd.f32 %v879_v18, %v5669_v52  ;;  %v4767_v28 = vadd.f32 %v950_v0, %v5673_v55  ;;  %v5679_v55 = vrot.slane %v71_v22, %v91_v8 }
 0x143   :  { %v3674_v7 = vmul.f32 -1.442695, %v4750_v9 }
 0x144   :  { %v3675_v21 = vmul.f32 -1.442695, %v4751_v26  ;;  %v3676_v47 = vmul.f32 -1.442695, %v4767_v28  ;;  %v95_v26 = vsub.s32 5, %v74_v27  ;;  %6387 = vst [vmem:[#allocation51_spill] sm:$0xff] %v5679_v55 }
 0x145   :  { %4887 = vpow2.f32 %v3674_v7 }
 0x146   :  { %4889 = vpow2.f32 %v3675_v21  ;;  %v5681_v49 = vrot.slane %v71_v22, %v95_v26 }
 0x147   :  { %4891 = vpow2.f32 %v3676_v47  ;;  %v103_v47 = vsub.s32 7, %v74_v27 }
 0x148   :  { %4893 = vtanh.f32 %v4766_v20 }
 0x14f   :  { %v4888_v40 = vpop.eup %4887 }
 0x150   :  { %v4890_v59 = vpop.eup %4889  ;;  %v1110_v48 = vadd.f32 1.0, %v4888_v40 }
 0x151   :  { %v1116_v18 = vadd.f32 1.0, %v4890_v59  ;;  %v4892_v9 = vpop.eup %4891 }
 0x152   :  { %4895 = vrcp.f32 %v1110_v48  ;;  %v4894_v7 = vpop.eup %4893  ;;  %v1123_v54 = vadd.f32 1.0, %v4892_v9 }
 0x153   :  { %4897 = vrcp.f32 %v1116_v18 }
 0x154   :  { %4899 = vrcp.f32 %v1123_v54 }
 0x15c   :  { %v4896_v21 = vpop.eup %4895 }
 0x15d   :  { %v4898_v52 = vpop.eup %4897  ;;  %v1127_v0 = vmul.f32 %v4896_v21, %v4894_v7  ;;  %v5688_v21 = vrot.slane %v71_v22, %v103_v47 }
 0x15e   :  { %v1126_v28 = vmul.f32 0.0, %v4898_v52  ;;  %v99_v52 = vsub.s32 6, %v74_v27  ;;  %v4900_v54 = vpop.eup %4899 }
 0x160   :  { %v5683_v15 = vadd.f32 %v1127_v0, %v1126_v28  ;;  %v1027_v40 = vpop.f32.mrb[30].mxu0  ;;  %v1098_v20 = vpop.f32.mrb[30].mxu1  ;;  %v5691_v0 = vrot.slane %v71_v22, %v99_v52  ;;  %v6391_v22 = vld [vmem:[#allocation39_spill] sm:$0xff] }
 0x161   :  { %v4796_v48 = vadd.f32 %v1027_v40, %v5679_v55  ;;  %v1029_v59 = vpop.f32.mrb[31].mxu0  ;;  %v1100_v18 = vpop.f32.mrb[31].mxu1 }
 0x162   :  { %6388 = vst [vmem:[#allocation52_spill] sm:$0xff] %v5683_v15  ;;  %4901 = vtanh.f32 %v5683_v15  ;;  %v4797_v7 = vadd.f32 %v1029_v59, %v5681_v49  ;;  %v4813_v26 = vadd.f32 %v1100_v18, %v5688_v21  ;;  %v4812_v55 = vadd.f32 %v1098_v20, %v5691_v0 }
 0x163   :  { %v3677_v9 = vmul.f32 -1.442695, %v4796_v48 }
 0x164   :  { %v3678_v8 = vmul.f32 -1.442695, %v4797_v7  ;;  %v3679_v40 = vmul.f32 -1.442695, %v4813_v26  ;;  %v6393_v7 = vld [vmem:[#allocation41_spill] sm:$0xff] }
 0x165   :  { %4903 = vpow2.f32 %v3677_v9  ;;  %v6394_v9 = vld [vmem:[#allocation42_spill] sm:$0xff] }
 0x166   :  { %4905 = vpow2.f32 %v3678_v8 }
 0x167   :  { %4907 = vpow2.f32 %v3679_v40 }
 0x168   :  { %4909 = vtanh.f32 %v4812_v55  ;;  %v6390_v55 = vld [vmem:[#allocation38_spill] sm:$0xff] }
 0x16c   :  { %v4902_v28 = vpop.eup %4901 }
 0x16d   :  { %v1130_v37 = vmul.f32 %v4902_v28, %v4900_v54  ;;  %v6395_v54 = vld [vmem:[#allocation43_spill] sm:$0xff]  ;;  %v6396_v28 = vld [vmem:[#allocation44_spill] sm:$0xff] }
 0x16f   :  { %v4904_v15 = vpop.eup %4903  ;;  %1224 = vmatmul.mubr.f32.vlgmr.msra.gmra.mrb[2].mxu0 %v1130_v37  ;;  %1295 = vmatmul.mubr.f32.vlgmr.msra.gmra.mrb[2].mxu1 %v1130_v37  ;;  %v6389_v37 = vld [vmem:[#allocation37_spill] sm:$0xff] }
 0x170   :  { %v4906_v48 = vpop.eup %4905  ;;  %v1134_v59 = vadd.f32 1.0, %v4904_v15  ;;  %3921 = vmatpush1.bf16.msra.mxu0 %v5528_v31  ;;  %3953 = vmatpush1.bf16.msra.mxu1 %v5530_v34  ;;  %v6392_v15 = vld [vmem:[#allocation40_spill] sm:$0xff] }
 0x171   :  { %v1140_v27 = vadd.f32 1.0, %v4906_v48  ;;  %3923 = vmatprep.subr.bf16.mxu0 %v5534_v41  ;;  %3955 = vmatprep.subr.bf16.mxu1 %v5536_v42  ;;  %v4908_v20 = vpop.eup %4907 }
 0x172   :  { %4911 = vrcp.f32 %v1134_v59  ;;  %1373 = vmatprep.mubr.f32.mxu0 %v6382_v4  ;;  %1444 = vmatprep.mubr.f32.mxu1 %v6382_v4  ;;  %v4910_v47 = vpop.eup %4909  ;;  %v1147_v26 = vadd.f32 1.0, %v4908_v20  ;;  %v6397_v59 = vld [vmem:[#allocation45_spill] sm:$0xff] }
 0x173   :  { %4913 = vrcp.f32 %v1140_v27  ;;  %v6398_v27 = vld [vmem:[#allocation46_spill] sm:$0xff] }
 0x174   :  { %3925 = vmatpush1.bf16.msra.mxu0 %v5544_v53  ;;  %3957 = vmatpush1.bf16.msra.mxu1 %v5546_v58  ;;  %4915 = vrcp.f32 %v1147_v26  ;;  %v6401_v26 = vld [vmem:[#allocation27_spill] sm:$0xff] }
 0x175   :  { %3927 = vmatprep.subr.bf16.mxu0 %v5550_v61  ;;  %3959 = vmatprep.subr.bf16.mxu1 %v5552_v2 }
 0x178   :  { %3929 = vmatpush1.bf16.msra.mxu0 %v6389_v37  ;;  %3961 = vmatpush1.bf16.msra.mxu1 %v6390_v55 }
 0x179   :  { %3931 = vmatprep.subr.bf16.mxu0 %v6391_v22  ;;  %3963 = vmatprep.subr.bf16.mxu1 %v6392_v15 }
 0x17c   :  { %v4912_v18 = vpop.eup %4911  ;;  %3933 = vmatpush1.bf16.msra.mxu0 %v6393_v7  ;;  %3965 = vmatpush1.bf16.msra.mxu1 %v6394_v9 }
 0x17d   :  { %v4914_v8 = vpop.eup %4913  ;;  %v1151_v52 = vmul.f32 %v4912_v18, %v4910_v47  ;;  %3935 = vmatprep.subr.bf16.mxu0 %v6395_v54  ;;  %3967 = vmatprep.subr.bf16.mxu1 %v6396_v28 }
 0x17e   :  { %v1150_v40 = vmul.f32 0.0, %v4914_v8  ;;  %v4916_v20 = vpop.eup %4915  ;;  %v6399_v8 = vld [vmem:[#allocation25_spill] sm:$0xff] }
 0x180   :  { %v5712_v48 = vadd.f32 %v1151_v52, %v1150_v40  ;;  %3937 = vmatpush1.bf16.msra.mxu0 %v6397_v59  ;;  %3969 = vmatpush1.bf16.msra.mxu1 %v6398_v27  ;;  %v6400_v52 = vld [vmem:[#allocation26_spill] sm:$0xff]  ;;  %v6402_v40 = vld [vmem:[#allocation28_spill] sm:$0xff] }
 0x181   :  { %3939 = vmatprep.subr.bf16.mxu0 %v5588_v23  ;;  %3971 = vmatprep.subr.bf16.mxu1 %v5590_v46 }
 0x182   :  { %4917 = vtanh.f32 %v5712_v48 }
 0x184   :  { %3941 = vmatpush1.bf16.msra.mxu0 %v5594_v60  ;;  %3973 = vmatpush1.bf16.msra.mxu1 %v5596_v3 }
 0x185   :  { %3943 = vmatprep.subr.bf16.mxu0 %v5600_v1  ;;  %3975 = vmatprep.subr.bf16.mxu1 %v5602_v16 }
 0x188   :  { %3945 = vmatpush1.bf16.msra.mxu0 %v5606_v36  ;;  %3977 = vmatpush1.bf16.msra.mxu1 %v5608_v43 }
 0x189   :  { %3947 = vmatprep.subr.bf16.mxu0 %v5612_v29  ;;  %3979 = vmatprep.subr.bf16.mxu1 %v5614_v35 }
 0x18c   :  { %v4918_v47 = vpop.eup %4917  ;;  %3949 = vmatpush1.bf16.msra.mxu0 %v5618_v10  ;;  %3981 = vmatpush1.bf16.msra.mxu1 %v5620_v14 }
 0x18d   :  { %v1154_v18 = vmul.f32 %v4918_v47, %v4916_v20  ;;  %3983 = vmatprep.subr.bf16.mxu0 %v5299_v13  ;;  %4015 = vmatprep.subr.bf16.mxu1 %v5312_v17  ;;  %v6403_v20 = vld [vmem:[#allocation29_spill] sm:$0xff]  ;;  %v6404_v47 = vld [vmem:[#allocation30_spill] sm:$0xff] }
 0x18f   :  { %1374 = vmatmul.mubr.f32.vlgmr.msra.gmra.mrb[28].mxu0 %v1154_v18  ;;  %1445 = vmatmul.mubr.f32.vlgmr.msra.gmra.mrb[28].mxu1 %v1154_v18  ;;  %v6405_v18 = vld [vmem:[#allocation31_spill] sm:$0xff] }
 0x190   :  { %3985 = vmatpush1.bf16.msra.mxu0 %v5388_v32  ;;  %4017 = vmatpush1.bf16.msra.mxu1 %v5390_v33 }
 0x191   :  { %3987 = vmatprep.subr.bf16.mxu0 %v5392_v38  ;;  %4019 = vmatprep.subr.bf16.mxu1 %v5394_v39 }
 0x192   :  { %1571 = vmatprep.mubr.f32.mxu0 %v6382_v4  ;;  %1642 = vmatprep.mubr.f32.mxu1 %v6382_v4 }
 0x194   :  { %3989 = vmatpush1.bf16.msra.mxu0 %v5402_v44  ;;  %4021 = vmatpush1.bf16.msra.mxu1 %v5404_v45 }
 0x195   :  { %3991 = vmatprep.subr.bf16.mxu0 %v5410_v50  ;;  %4023 = vmatprep.subr.bf16.mxu1 %v5412_v51 }
 0x198   :  { %3993 = vmatpush1.bf16.msra.mxu0 %v5420_v56  ;;  %4025 = vmatpush1.bf16.msra.mxu1 %v5422_v57 }
 0x199   :  { %3995 = vmatprep.subr.bf16.mxu0 %v5428_v62  ;;  %4027 = vmatprep.subr.bf16.mxu1 %v5430_v63 }
 0x19c   :  { %3997 = vmatpush1.bf16.msra.mxu0 %v5438_v5  ;;  %4029 = vmatpush1.bf16.msra.mxu1 %v5440_v6  ;;  %v6412_v6 = vld [vmem:[#allocation48_spill] sm:$0xff] }
 0x19d   :  { %3999 = vmatprep.subr.bf16.mxu0 %v5446_v11  ;;  %4031 = vmatprep.subr.bf16.mxu1 %v5448_v12  ;;  %v6411_v12 = vld [vmem:[#allocation47_spill] sm:$0xff] }
 0x1a0   :  { %4001 = vmatpush1.bf16.msra.mxu0 %v5456_v24  ;;  %4033 = vmatpush1.bf16.msra.mxu1 %v5458_v25  ;;  %v6406_v24 = vld [vmem:[#allocation32_spill] sm:$0xff]  ;;  %v6407_v25 = vld [vmem:[#allocation33_spill] sm:$0xff] }
 0x1a1   :  { %4003 = vmatprep.subr.bf16.mxu0 %v5464_v19  ;;  %4035 = vmatprep.subr.bf16.mxu1 %v5466_v30  ;;  %v6408_v19 = vld [vmem:[#allocation34_spill] sm:$0xff]  ;;  %v6409_v30 = vld [vmem:[#allocation35_spill] sm:$0xff] }
 0x1a4   :  { %4005 = vmatpush1.bf16.msra.mxu0 %v6399_v8  ;;  %4037 = vmatpush1.bf16.msra.mxu1 %v6400_v52  ;;  %v6410_v8 = vld [vmem:[#allocation36_spill] sm:$0xff] }
 0x1a5   :  { %4007 = vmatprep.subr.bf16.mxu0 %v6401_v26  ;;  %4039 = vmatprep.subr.bf16.mxu1 %v6402_v40 }
 0x1a8   :  { %4009 = vmatpush1.bf16.msra.mxu0 %v6403_v20  ;;  %4041 = vmatpush1.bf16.msra.mxu1 %v6404_v47 }
 0x1a9   :  { %4011 = vmatprep.subr.bf16.mxu0 %v6405_v18  ;;  %4043 = vmatprep.subr.bf16.mxu1 %v6406_v24  ;;  %v6413_v24 = vld [vmem:[#allocation49_spill] sm:$0xff] }
 0x1ac   :  { %4013 = vmatpush1.bf16.msra.mxu0 %v6407_v25  ;;  %4045 = vmatpush1.bf16.msra.mxu1 %v6408_v19  ;;  %v6414_v19 = vld [vmem:[#allocation50_spill] sm:$0xff] }
 0x1ad   :  { %4047 = vmatprep.subr.bf16.mxu0 %v6409_v30  ;;  %4079 = vmatprep.subr.bf16.mxu1 %v6410_v8 }
 0x242   :  { %v1225_v52 = vpop.f32.mrb[2].mxu0  ;;  %v1296_v26 = vpop.f32.mrb[2].mxu1 }
 0x243   :  { %v4752_v40 = vadd.f32 %v1225_v52, %v6411_v12  ;;  %v1227_v11 = vpop.f32.mrb[3].mxu0  ;;  %v1298_v20 = vpop.f32.mrb[3].mxu1  ;;  %v4768_v62 = vadd.f32 %v1296_v26, %v6414_v19  ;;  %v6416_v19 = vld [vmem:[#allocation51_spill] sm:$0xff] }
 0x244   :  { %v4753_v47 = vadd.f32 %v1227_v11, %v6412_v6  ;;  %v4769_v25 = vadd.f32 %v1298_v20, %v6413_v24 }
 0x245   :  { %v3680_v5 = vmul.f32 -1.442695, %v4752_v40 }
 0x246   :  { %v3681_v18 = vmul.f32 -1.442695, %v4753_v47  ;;  %v3682_v63 = vmul.f32 -1.442695, %v4769_v25 }
 0x247   :  { %4919 = vpow2.f32 %v3680_v5 }
 0x248   :  { %4921 = vpow2.f32 %v3681_v18  ;;  %v6415_v18 = vld [vmem:[#allocation52_spill] sm:$0xff] }
 0x249   :  { %4923 = vpow2.f32 %v3682_v63 }
 0x24a   :  { %4925 = vtanh.f32 %v4768_v62 }
 0x251   :  { %v4920_v30 = vpop.eup %4919 }
 0x252   :  { %v4922_v57 = vpop.eup %4921  ;;  %v1458_v8 = vadd.f32 1.0, %v4920_v30 }
 0x253   :  { %v1464_v56 = vadd.f32 1.0, %v4922_v57  ;;  %v4924_v52 = vpop.eup %4923 }
 0x254   :  { %4927 = vrcp.f32 %v1458_v8  ;;  %v4926_v12 = vpop.eup %4925  ;;  %v1471_v5 = vadd.f32 1.0, %v4924_v52 }
 0x255   :  { %4929 = vrcp.f32 %v1464_v56 }
 0x256   :  { %4931 = vrcp.f32 %v1471_v5 }
 0x25e   :  { %v4928_v11 = vpop.eup %4927 }
 0x25f   :  { %v4930_v40 = vpop.eup %4929  ;;  %v1475_v47 = vmul.f32 %v4928_v11, %v4926_v12 }
 0x260   :  { %v1474_v6 = vmul.f32 %v4930_v40, %v6415_v18  ;;  %v4932_v52 = vpop.eup %4931 }
 0x262   :  { %v5770_v20 = vadd.f32 %v1475_v47, %v1474_v6  ;;  %v1375_v25 = vpop.f32.mrb[28].mxu0  ;;  %v1446_v26 = vpop.f32.mrb[28].mxu1 }
 0x263   :  { %v4794_v30 = vadd.f32 %v1375_v25, %v6416_v19  ;;  %v1377_v63 = vpop.f32.mrb[29].mxu0  ;;  %v1448_v62 = vpop.f32.mrb[29].mxu1  ;;  %v4810_v40 = vadd.f32 %v1446_v26, %v5691_v0 }
 0x264   :  { %v4795_v57 = vadd.f32 %v1377_v63, %v5681_v49  ;;  %4933 = vtanh.f32 %v5770_v20  ;;  %v4811_v12 = vadd.f32 %v1448_v62, %v5688_v21 }
 0x265   :  { %v3683_v56 = vmul.f32 -1.442695, %v4794_v30 }
 0x266   :  { %v3684_v8 = vmul.f32 -1.442695, %v4795_v57  ;;  %v3685_v11 = vmul.f32 -1.442695, %v4811_v12 }
 0x267   :  { %4935 = vpow2.f32 %v3683_v56 }
 0x268   :  { %4937 = vpow2.f32 %v3684_v8 }
 0x269   :  { %4939 = vpow2.f32 %v3685_v11 }
 0x26a   :  { %4941 = vtanh.f32 %v4810_v40  ;;  %v6417_v40 = vld [vmem:[#allocation13_spill] sm:$0xff] }
 0x26e   :  { %v4934_v6 = vpop.eup %4933 }
 0x26f   :  { %v1478_v47 = vmul.f32 %v4934_v6, %v4932_v52 }
 0x271   :  { %v4936_v5 = vpop.eup %4935  ;;  %1572 = vmatmul.mubr.f32.vlgmr.msra.gmra.mrb[4].mxu0 %v1478_v47  ;;  %1643 = vmatmul.mubr.f32.vlgmr.msra.gmra.mrb[4].mxu1 %v1478_v47  ;;  %v6418_v47 = vld [vmem:[#allocation14_spill] sm:$0xff] }
 0x272   :  { %v4938_v18 = vpop.eup %4937  ;;  %v1482_v25 = vadd.f32 1.0, %v4936_v5  ;;  %4049 = vmatpush1.bf16.msra.mxu0 %v5528_v31  ;;  %4081 = vmatpush1.bf16.msra.mxu1 %v5530_v34  ;;  %v6419_v5 = vld [vmem:[#allocation15_spill] sm:$0xff] }
 0x273   :  { %v1488_v30 = vadd.f32 1.0, %v4938_v18  ;;  %4051 = vmatprep.subr.bf16.mxu0 %v5534_v41  ;;  %4083 = vmatprep.subr.bf16.mxu1 %v5536_v42  ;;  %v4940_v26 = vpop.eup %4939  ;;  %v6420_v18 = vld [vmem:[#allocation16_spill] sm:$0xff] }
 0x274   :  { %4943 = vrcp.f32 %v1482_v25  ;;  %1721 = vmatprep.mubr.f32.mxu0 %v6382_v4  ;;  %1792 = vmatprep.mubr.f32.mxu1 %v6382_v4  ;;  %v4942_v63 = vpop.eup %4941  ;;  %v1495_v8 = vadd.f32 1.0, %v4940_v26  ;;  %v6421_v25 = vld [vmem:[#allocation17_spill] sm:$0xff]  ;;  %v6423_v26 = vld [vmem:[#allocation19_spill] sm:$0xff] }
 0x275   :  { %4945 = vrcp.f32 %v1488_v30  ;;  %v6422_v30 = vld [vmem:[#allocation18_spill] sm:$0xff] }
 0x276   :  { %4053 = vmatpush1.bf16.msra.mxu0 %v5544_v53  ;;  %4085 = vmatpush1.bf16.msra.mxu1 %v5546_v58  ;;  %4947 = vrcp.f32 %v1495_v8  ;;  %v6428_v8 = vld [vmem:[#allocation24_spill] sm:$0xff] }
 0x277   :  { %4055 = vmatprep.subr.bf16.mxu0 %v5550_v61  ;;  %4087 = vmatprep.subr.bf16.mxu1 %v5552_v2 }
 0x27a   :  { %4057 = vmatpush1.bf16.msra.mxu0 %v6389_v37  ;;  %4089 = vmatpush1.bf16.msra.mxu1 %v6390_v55 }
 0x27b   :  { %4059 = vmatprep.subr.bf16.mxu0 %v6391_v22  ;;  %4091 = vmatprep.subr.bf16.mxu1 %v6392_v15 }
 0x27e   :  { %v4944_v62 = vpop.eup %4943  ;;  %4061 = vmatpush1.bf16.msra.mxu0 %v6393_v7  ;;  %4093 = vmatpush1.bf16.msra.mxu1 %v6394_v9 }
 0x27f   :  { %v4946_v57 = vpop.eup %4945  ;;  %v1499_v56 = vmul.f32 %v4944_v62, %v4942_v63  ;;  %4063 = vmatprep.subr.bf16.mxu0 %v6395_v54  ;;  %4095 = vmatprep.subr.bf16.mxu1 %v6396_v28  ;;  %v6424_v63 = vld [vmem:[#allocation20_spill] sm:$0xff]  ;;  %v6425_v62 = vld [vmem:[#allocation21_spill] sm:$0xff] }
 0x280   :  { %v1498_v12 = vmul.f32 %v4946_v57, %v5712_v48  ;;  %v4948_v48 = vpop.eup %4947  ;;  %v6426_v57 = vld [vmem:[#allocation22_spill] sm:$0xff] }
 0x282   :  { %v5796_v52 = vadd.f32 %v1499_v56, %v1498_v12  ;;  %4065 = vmatpush1.bf16.msra.mxu0 %v6397_v59  ;;  %4097 = vmatpush1.bf16.msra.mxu1 %v6398_v27  ;;  %v6427_v56 = vld [vmem:[#allocation23_spill] sm:$0xff]  ;;  %v6429_v12 = vld [vmem:[#allocation25_spill] sm:$0xff] }
 0x283   :  { %4067 = vmatprep.subr.bf16.mxu0 %v5588_v23  ;;  %4099 = vmatprep.subr.bf16.mxu1 %v5590_v46 }
 0x284   :  { %4949 = vtanh.f32 %v5796_v52 }
 0x286   :  { %4069 = vmatpush1.bf16.msra.mxu0 %v5594_v60  ;;  %4101 = vmatpush1.bf16.msra.mxu1 %v5596_v3 }
 0x287   :  { %4071 = vmatprep.subr.bf16.mxu0 %v5600_v1  ;;  %4103 = vmatprep.subr.bf16.mxu1 %v5602_v16 }
 0x28a   :  { %4073 = vmatpush1.bf16.msra.mxu0 %v5606_v36  ;;  %4105 = vmatpush1.bf16.msra.mxu1 %v5608_v43 }
 0x28b   :  { %4075 = vmatprep.subr.bf16.mxu0 %v5612_v29  ;;  %4107 = vmatprep.subr.bf16.mxu1 %v5614_v35 }
 0x28e   :  { %v4950_v6 = vpop.eup %4949  ;;  %4077 = vmatpush1.bf16.msra.mxu0 %v5618_v10  ;;  %4109 = vmatpush1.bf16.msra.mxu1 %v5620_v14 }
 0x28f   :  { %v1502_v11 = vmul.f32 %v4950_v6, %v4948_v48  ;;  %4111 = vmatprep.subr.bf16.mxu0 %v5299_v13  ;;  %4143 = vmatprep.subr.bf16.mxu1 %v5312_v17  ;;  %v6430_v48 = vld [vmem:[#allocation26_spill] sm:$0xff]  ;;  %v6431_v6 = vld [vmem:[#allocation27_spill] sm:$0xff] }
 0x291   :  { %1722 = vmatmul.mubr.f32.vlgmr.msra.gmra.mrb[26].mxu0 %v1502_v11  ;;  %1793 = vmatmul.mubr.f32.vlgmr.msra.gmra.mrb[26].mxu1 %v1502_v11  ;;  %v6432_v11 = vld [vmem:[#allocation28_spill] sm:$0xff] }
 0x292   :  { %4113 = vmatpush1.bf16.msra.mxu0 %v5388_v32  ;;  %4145 = vmatpush1.bf16.msra.mxu1 %v5390_v33 }
 0x293   :  { %4115 = vmatprep.subr.bf16.mxu0 %v5392_v38  ;;  %4147 = vmatprep.subr.bf16.mxu1 %v5394_v39 }
 0x294   :  { %1919 = vmatprep.mubr.f32.mxu0 %v6382_v4  ;;  %1990 = vmatprep.mubr.f32.mxu1 %v6382_v4 }
 0x296   :  { %4117 = vmatpush1.bf16.msra.mxu0 %v5402_v44  ;;  %4149 = vmatpush1.bf16.msra.mxu1 %v5404_v45 }
 0x297   :  { %4119 = vmatprep.subr.bf16.mxu0 %v5410_v50  ;;  %4151 = vmatprep.subr.bf16.mxu1 %v5412_v51 }
 0x29a   :  { %4121 = vmatpush1.bf16.msra.mxu0 %v6417_v40  ;;  %4153 = vmatpush1.bf16.msra.mxu1 %v6418_v47 }
 0x29b   :  { %4123 = vmatprep.subr.bf16.mxu0 %v6419_v5  ;;  %4155 = vmatprep.subr.bf16.mxu1 %v6420_v18  ;;  %v6442_v5 = vld [vmem:[#allocation48_spill] sm:$0xff] }
 0x29e   :  { %4125 = vmatpush1.bf16.msra.mxu0 %v6421_v25  ;;  %4157 = vmatpush1.bf16.msra.mxu1 %v6422_v30  ;;  %v6433_v30 = vld [vmem:[#allocation29_spill] sm:$0xff]  ;;  %v6441_v25 = vld [vmem:[#allocation47_spill] sm:$0xff] }
 0x29f   :  { %4127 = vmatprep.subr.bf16.mxu0 %v6423_v26  ;;  %4159 = vmatprep.subr.bf16.mxu1 %v6424_v63  ;;  %v6434_v26 = vld [vmem:[#allocation30_spill] sm:$0xff]  ;;  %v6435_v63 = vld [vmem:[#allocation31_spill] sm:$0xff] }
 0x2a2   :  { %4129 = vmatpush1.bf16.msra.mxu0 %v6425_v62  ;;  %4161 = vmatpush1.bf16.msra.mxu1 %v6426_v57  ;;  %v6436_v62 = vld [vmem:[#allocation32_spill] sm:$0xff]  ;;  %v6437_v57 = vld [vmem:[#allocation33_spill] sm:$0xff] }
 0x2a3   :  { %4131 = vmatprep.subr.bf16.mxu0 %v6427_v56  ;;  %4163 = vmatprep.subr.bf16.mxu1 %v6428_v8  ;;  %v6438_v56 = vld [vmem:[#allocation34_spill] sm:$0xff]  ;;  %v6439_v8 = vld [vmem:[#allocation35_spill] sm:$0xff] }
 0x2a6   :  { %4133 = vmatpush1.bf16.msra.mxu0 %v6429_v12  ;;  %4165 = vmatpush1.bf16.msra.mxu1 %v6430_v48  ;;  %v6440_v12 = vld [vmem:[#allocation36_spill] sm:$0xff] }
 0x2a7   :  { %4135 = vmatprep.subr.bf16.mxu0 %v6431_v6  ;;  %4167 = vmatprep.subr.bf16.mxu1 %v6432_v11 }
 0x2aa   :  { %4137 = vmatpush1.bf16.msra.mxu0 %v6433_v30  ;;  %4169 = vmatpush1.bf16.msra.mxu1 %v6434_v26 }
 0x2ab   :  { %4139 = vmatprep.subr.bf16.mxu0 %v6435_v63  ;;  %4171 = vmatprep.subr.bf16.mxu1 %v6436_v62 }
 0x2ae   :  { %4141 = vmatpush1.bf16.msra.mxu0 %v6437_v57  ;;  %4173 = vmatpush1.bf16.msra.mxu1 %v6438_v56  ;;  %v6443_v56 = vld [vmem:[#allocation50_spill] sm:$0xff] }
 0x2af   :  { %4175 = vmatprep.subr.bf16.mxu0 %v6439_v8  ;;  %4207 = vmatprep.subr.bf16.mxu1 %v6440_v12 }
 0x344   :  { %v1573_v48 = vpop.f32.mrb[4].mxu0  ;;  %v1644_v6 = vpop.f32.mrb[4].mxu1 }
 0x345   :  { %v4754_v11 = vadd.f32 %v1573_v48, %v6441_v25  ;;  %v1575_v18 = vpop.f32.mrb[5].mxu0  ;;  %v1646_v30 = vpop.f32.mrb[5].mxu1  ;;  %v4770_v40 = vadd.f32 %v1644_v6, %v6443_v56 }
 0x346   :  { %v4755_v26 = vadd.f32 %v1575_v18, %v6442_v5  ;;  %v4771_v57 = vadd.f32 %v1646_v30, %v6413_v24 }
 0x347   :  { %v3686_v47 = vmul.f32 -1.442695, %v4754_v11 }
 0x348   :  { %v3687_v63 = vmul.f32 -1.442695, %v4755_v26  ;;  %v3688_v62 = vmul.f32 -1.442695, %v4771_v57 }
 0x349   :  { %4951 = vpow2.f32 %v3686_v47 }
 0x34a   :  { %4953 = vpow2.f32 %v3687_v63 }
 0x34b   :  { %4955 = vpow2.f32 %v3688_v62 }
 0x34c   :  { %4957 = vtanh.f32 %v4770_v40 }
 0x353   :  { %v4952_v8 = vpop.eup %4951 }
 0x354   :  { %v4954_v51 = vpop.eup %4953  ;;  %v1806_v12 = vadd.f32 1.0, %v4952_v8 }
 0x355   :  { %v1812_v50 = vadd.f32 1.0, %v4954_v51  ;;  %v4956_v48 = vpop.eup %4955 }
 0x356   :  { %4959 = vrcp.f32 %v1806_v12  ;;  %v4958_v25 = vpop.eup %4957  ;;  %v1819_v47 = vadd.f32 1.0, %v4956_v48 }
 0x357   :  { %4961 = vrcp.f32 %v1812_v50 }
 0x358   :  { %4963 = vrcp.f32 %v1819_v47 }
 0x360   :  { %v4960_v18 = vpop.eup %4959 }
 0x361   :  { %v4962_v11 = vpop.eup %4961  ;;  %v1823_v26 = vmul.f32 %v4960_v18, %v4958_v25 }
 0x362   :  { %v1822_v63 = vmul.f32 %v4962_v11, %v5770_v20  ;;  %v4964_v20 = vpop.eup %4963 }
 0x364   :  { %v5854_v30 = vadd.f32 %v1823_v26, %v1822_v63  ;;  %v1723_v57 = vpop.f32.mrb[26].mxu0  ;;  %v1794_v6 = vpop.f32.mrb[26].mxu1 }
 0x365   :  { %v4792_v8 = vadd.f32 %v1723_v57, %v6416_v19  ;;  %v1725_v62 = vpop.f32.mrb[27].mxu0  ;;  %v1796_v40 = vpop.f32.mrb[27].mxu1  ;;  %v4808_v11 = vadd.f32 %v1794_v6, %v5691_v0 }
 0x366   :  { %v4793_v51 = vadd.f32 %v1725_v62, %v5681_v49  ;;  %4965 = vtanh.f32 %v5854_v30  ;;  %v4809_v25 = vadd.f32 %v1796_v40, %v5688_v21 }
 0x367   :  { %v3689_v50 = vmul.f32 -1.442695, %v4792_v8 }
 0x368   :  { %v3690_v12 = vmul.f32 -1.442695, %v4793_v51  ;;  %v3691_v18 = vmul.f32 -1.442695, %v4809_v25 }
 0x369   :  { %4967 = vpow2.f32 %v3689_v50 }
 0x36a   :  { %4969 = vpow2.f32 %v3690_v12 }
 0x36b   :  { %4971 = vpow2.f32 %v3691_v18 }
 0x36c   :  { %4973 = vtanh.f32 %v4808_v11  ;;  %v6444_v11 = vld [vmem:[#allocation11_spill] sm:$0xff] }
 0x370   :  { %v4966_v48 = vpop.eup %4965 }
 0x371   :  { %v1826_v26 = vmul.f32 %v4966_v48, %v4964_v20 }
 0x373   :  { %v4968_v47 = vpop.eup %4967  ;;  %1920 = vmatmul.mubr.f32.vlgmr.msra.gmra.mrb[6].mxu0 %v1826_v26  ;;  %1991 = vmatmul.mubr.f32.vlgmr.msra.gmra.mrb[6].mxu1 %v1826_v26  ;;  %v6445_v26 = vld [vmem:[#allocation12_spill] sm:$0xff] }
 0x374   :  { %v4970_v63 = vpop.eup %4969  ;;  %v1830_v57 = vadd.f32 1.0, %v4968_v47  ;;  %4177 = vmatpush1.bf16.msra.mxu0 %v5528_v31  ;;  %4209 = vmatpush1.bf16.msra.mxu1 %v5530_v34  ;;  %v6446_v47 = vld [vmem:[#allocation13_spill] sm:$0xff] }
 0x375   :  { %v1836_v8 = vadd.f32 1.0, %v4970_v63  ;;  %4179 = vmatprep.subr.bf16.mxu0 %v5534_v41  ;;  %4211 = vmatprep.subr.bf16.mxu1 %v5536_v42  ;;  %v4972_v6 = vpop.eup %4971  ;;  %v6447_v63 = vld [vmem:[#allocation14_spill] sm:$0xff] }
 0x376   :  { %4975 = vrcp.f32 %v1830_v57  ;;  %2069 = vmatprep.mubr.f32.mxu0 %v6382_v4  ;;  %2140 = vmatprep.mubr.f32.mxu1 %v6382_v4  ;;  %v4974_v62 = vpop.eup %4973  ;;  %v1843_v12 = vadd.f32 1.0, %v4972_v6  ;;  %v6448_v57 = vld [vmem:[#allocation15_spill] sm:$0xff]  ;;  %v6450_v6 = vld [vmem:[#allocation17_spill] sm:$0xff] }
 0x377   :  { %4977 = vrcp.f32 %v1836_v8  ;;  %v6449_v8 = vld [vmem:[#allocation16_spill] sm:$0xff] }
 0x378   :  { %4181 = vmatpush1.bf16.msra.mxu0 %v5544_v53  ;;  %4213 = vmatpush1.bf16.msra.mxu1 %v5546_v58  ;;  %4979 = vrcp.f32 %v1843_v12  ;;  %v6455_v12 = vld [vmem:[#allocation22_spill] sm:$0xff] }
 0x379   :  { %4183 = vmatprep.subr.bf16.mxu0 %v5550_v61  ;;  %4215 = vmatprep.subr.bf16.mxu1 %v5552_v2 }
 0x37c   :  { %4185 = vmatpush1.bf16.msra.mxu0 %v6389_v37  ;;  %4217 = vmatpush1.bf16.msra.mxu1 %v6390_v55 }
 0x37d   :  { %4187 = vmatprep.subr.bf16.mxu0 %v6391_v22  ;;  %4219 = vmatprep.subr.bf16.mxu1 %v6392_v15 }
 0x380   :  { %v4976_v40 = vpop.eup %4975  ;;  %4189 = vmatpush1.bf16.msra.mxu0 %v6393_v7  ;;  %4221 = vmatpush1.bf16.msra.mxu1 %v6394_v9 }
 0x381   :  { %v4978_v51 = vpop.eup %4977  ;;  %v1847_v50 = vmul.f32 %v4976_v40, %v4974_v62  ;;  %4191 = vmatprep.subr.bf16.mxu0 %v6395_v54  ;;  %4223 = vmatprep.subr.bf16.mxu1 %v6396_v28  ;;  %v6451_v62 = vld [vmem:[#allocation18_spill] sm:$0xff]  ;;  %v6452_v40 = vld [vmem:[#allocation19_spill] sm:$0xff] }
 0x382   :  { %v1846_v25 = vmul.f32 %v4978_v51, %v5796_v52  ;;  %v4980_v52 = vpop.eup %4979  ;;  %v6453_v51 = vld [vmem:[#allocation20_spill] sm:$0xff] }
 0x384   :  { %v5880_v20 = vadd.f32 %v1847_v50, %v1846_v25  ;;  %4193 = vmatpush1.bf16.msra.mxu0 %v6397_v59  ;;  %4225 = vmatpush1.bf16.msra.mxu1 %v6398_v27  ;;  %v6454_v50 = vld [vmem:[#allocation21_spill] sm:$0xff]  ;;  %v6456_v25 = vld [vmem:[#allocation23_spill] sm:$0xff] }
 0x385   :  { %4195 = vmatprep.subr.bf16.mxu0 %v5588_v23  ;;  %4227 = vmatprep.subr.bf16.mxu1 %v5590_v46 }
 0x386   :  { %4981 = vtanh.f32 %v5880_v20 }
 0x388   :  { %4197 = vmatpush1.bf16.msra.mxu0 %v5594_v60  ;;  %4229 = vmatpush1.bf16.msra.mxu1 %v5596_v3 }
 0x389   :  { %4199 = vmatprep.subr.bf16.mxu0 %v5600_v1  ;;  %4231 = vmatprep.subr.bf16.mxu1 %v5602_v16 }
 0x38c   :  { %4201 = vmatpush1.bf16.msra.mxu0 %v5606_v36  ;;  %4233 = vmatpush1.bf16.msra.mxu1 %v5608_v43 }
 0x38d   :  { %4203 = vmatprep.subr.bf16.mxu0 %v5612_v29  ;;  %4235 = vmatprep.subr.bf16.mxu1 %v5614_v35 }
 0x390   :  { %v4982_v48 = vpop.eup %4981  ;;  %4205 = vmatpush1.bf16.msra.mxu0 %v5618_v10  ;;  %4237 = vmatpush1.bf16.msra.mxu1 %v5620_v14 }
 0x391   :  { %v1850_v18 = vmul.f32 %v4982_v48, %v4980_v52  ;;  %4239 = vmatprep.subr.bf16.mxu0 %v5299_v13  ;;  %4271 = vmatprep.subr.bf16.mxu1 %v5312_v17  ;;  %v6457_v52 = vld [vmem:[#allocation24_spill] sm:$0xff]  ;;  %v6458_v48 = vld [vmem:[#allocation25_spill] sm:$0xff] }
 0x393   :  { %2070 = vmatmul.mubr.f32.vlgmr.msra.gmra.mrb[24].mxu0 %v1850_v18  ;;  %2141 = vmatmul.mubr.f32.vlgmr.msra.gmra.mrb[24].mxu1 %v1850_v18  ;;  %v6459_v18 = vld [vmem:[#allocation26_spill] sm:$0xff] }
 0x394   :  { %4241 = vmatpush1.bf16.msra.mxu0 %v5388_v32  ;;  %4273 = vmatpush1.bf16.msra.mxu1 %v5390_v33 }
 0x395   :  { %4243 = vmatprep.subr.bf16.mxu0 %v5392_v38  ;;  %4275 = vmatprep.subr.bf16.mxu1 %v5394_v39 }
 0x396   :  { %2267 = vmatprep.mubr.f32.mxu0 %v6382_v4  ;;  %2338 = vmatprep.mubr.f32.mxu1 %v6382_v4 }
 0x398   :  { %4245 = vmatpush1.bf16.msra.mxu0 %v5402_v44  ;;  %4277 = vmatpush1.bf16.msra.mxu1 %v5404_v45 }
 0x399   :  { %4247 = vmatprep.subr.bf16.mxu0 %v6444_v11  ;;  %4279 = vmatprep.subr.bf16.mxu1 %v6445_v26 }
 0x39c   :  { %4249 = vmatpush1.bf16.msra.mxu0 %v6446_v47  ;;  %4281 = vmatpush1.bf16.msra.mxu1 %v6447_v63 }
 0x39d   :  { %4251 = vmatprep.subr.bf16.mxu0 %v6448_v57  ;;  %4283 = vmatprep.subr.bf16.mxu1 %v6449_v8  ;;  %v6460_v8 = vld [vmem:[#allocation27_spill] sm:$0xff] }
 0x39e   :  { %v6470_v57 = vld [vmem:[#allocation47_spill] sm:$0xff] }
 0x3a0   :  { %4253 = vmatpush1.bf16.msra.mxu0 %v6450_v6  ;;  %4285 = vmatpush1.bf16.msra.mxu1 %v6451_v62  ;;  %v6461_v6 = vld [vmem:[#allocation28_spill] sm:$0xff]  ;;  %v6462_v62 = vld [vmem:[#allocation29_spill] sm:$0xff] }
 0x3a1   :  { %4255 = vmatprep.subr.bf16.mxu0 %v6452_v40  ;;  %4287 = vmatprep.subr.bf16.mxu1 %v6453_v51  ;;  %v6463_v40 = vld [vmem:[#allocation30_spill] sm:$0xff]  ;;  %v6464_v51 = vld [vmem:[#allocation31_spill] sm:$0xff] }
 0x3a4   :  { %4257 = vmatpush1.bf16.msra.mxu0 %v6454_v50  ;;  %4289 = vmatpush1.bf16.msra.mxu1 %v6455_v12  ;;  %v6465_v50 = vld [vmem:[#allocation32_spill] sm:$0xff]  ;;  %v6466_v12 = vld [vmem:[#allocation33_spill] sm:$0xff] }
 0x3a5   :  { %4259 = vmatprep.subr.bf16.mxu0 %v6456_v25  ;;  %4291 = vmatprep.subr.bf16.mxu1 %v6457_v52  ;;  %v6467_v25 = vld [vmem:[#allocation34_spill] sm:$0xff]  ;;  %v6468_v52 = vld [vmem:[#allocation35_spill] sm:$0xff] }
 0x3a8   :  { %4261 = vmatpush1.bf16.msra.mxu0 %v6458_v48  ;;  %4293 = vmatpush1.bf16.msra.mxu1 %v6459_v18  ;;  %v6469_v48 = vld [vmem:[#allocation36_spill] sm:$0xff] }
 0x3a9   :  { %4263 = vmatprep.subr.bf16.mxu0 %v6460_v8  ;;  %4295 = vmatprep.subr.bf16.mxu1 %v6461_v6 }
 0x3ac   :  { %4265 = vmatpush1.bf16.msra.mxu0 %v6462_v62  ;;  %4297 = vmatpush1.bf16.msra.mxu1 %v6463_v40 }
 0x3ad   :  { %4267 = vmatprep.subr.bf16.mxu0 %v6464_v51  ;;  %4299 = vmatprep.subr.bf16.mxu1 %v6465_v50 }
 0x3b0   :  { %4269 = vmatpush1.bf16.msra.mxu0 %v6466_v12  ;;  %4301 = vmatpush1.bf16.msra.mxu1 %v6467_v25 }
 0x3b1   :  { %4303 = vmatprep.subr.bf16.mxu0 %v6468_v52  ;;  %4335 = vmatprep.subr.bf16.mxu1 %v6469_v48 }
 0x446   :  { %v1921_v18 = vpop.f32.mrb[6].mxu0  ;;  %v1992_v8 = vpop.f32.mrb[6].mxu1 }
 0x447   :  { %v4756_v6 = vadd.f32 %v1921_v18, %v6470_v57  ;;  %v1923_v63 = vpop.f32.mrb[7].mxu0  ;;  %v1994_v62 = vpop.f32.mrb[7].mxu1  ;;  %v4772_v25 = vadd.f32 %v1992_v8, %v6443_v56 }
 0x448   :  { %v4757_v40 = vadd.f32 %v1923_v63, %v6442_v5  ;;  %v4773_v12 = vadd.f32 %v1994_v62, %v6413_v24 }
 0x449   :  { %v3692_v47 = vmul.f32 -1.442695, %v4756_v6 }
 0x44a   :  { %v3693_v51 = vmul.f32 -1.442695, %v4757_v40  ;;  %v3694_v50 = vmul.f32 -1.442695, %v4773_v12 }
 0x44b   :  { %4983 = vpow2.f32 %v3692_v47 }
 0x44c   :  { %4985 = vpow2.f32 %v3693_v51 }
 0x44d   :  { %4987 = vpow2.f32 %v3694_v50 }
 0x44e   :  { %4989 = vtanh.f32 %v4772_v25 }
 0x455   :  { %v4984_v52 = vpop.eup %4983 }
 0x456   :  { %v4986_v26 = vpop.eup %4985  ;;  %v2154_v48 = vadd.f32 1.0, %v4984_v52 }
 0x457   :  { %v2160_v11 = vadd.f32 1.0, %v4986_v26  ;;  %v4988_v18 = vpop.eup %4987 }
 0x458   :  { %4991 = vrcp.f32 %v2154_v48  ;;  %v4990_v57 = vpop.eup %4989  ;;  %v2167_v47 = vadd.f32 1.0, %v4988_v18 }
 0x459   :  { %4993 = vrcp.f32 %v2160_v11 }
 0x45a   :  { %4995 = vrcp.f32 %v2167_v47 }
 0x462   :  { %v4992_v63 = vpop.eup %4991 }
 0x463   :  { %v4994_v6 = vpop.eup %4993  ;;  %v2171_v40 = vmul.f32 %v4992_v63, %v4990_v57 }
 0x464   :  { %v2170_v51 = vmul.f32 %v4994_v6, %v5854_v30  ;;  %v4996_v30 = vpop.eup %4995 }
 0x466   :  { %v5938_v62 = vadd.f32 %v2171_v40, %v2170_v51  ;;  %v2071_v12 = vpop.f32.mrb[24].mxu0  ;;  %v2142_v8 = vpop.f32.mrb[24].mxu1 }
 0x467   :  { %v4790_v52 = vadd.f32 %v2071_v12, %v6416_v19  ;;  %v2073_v50 = vpop.f32.mrb[25].mxu0  ;;  %v2144_v25 = vpop.f32.mrb[25].mxu1  ;;  %v4806_v6 = vadd.f32 %v2142_v8, %v5691_v0 }
 0x468   :  { %v4791_v26 = vadd.f32 %v2073_v50, %v5681_v49  ;;  %4997 = vtanh.f32 %v5938_v62  ;;  %v4807_v57 = vadd.f32 %v2144_v25, %v5688_v21 }
 0x469   :  { %v3695_v11 = vmul.f32 -1.442695, %v4790_v52 }
 0x46a   :  { %v3696_v48 = vmul.f32 -1.442695, %v4791_v26  ;;  %v3697_v63 = vmul.f32 -1.442695, %v4807_v57 }
 0x46b   :  { %4999 = vpow2.f32 %v3695_v11 }
 0x46c   :  { %5001 = vpow2.f32 %v3696_v48 }
 0x46d   :  { %5003 = vpow2.f32 %v3697_v63 }
 0x46e   :  { %5005 = vtanh.f32 %v4806_v6  ;;  %v6471_v6 = vld [vmem:[#allocation11_spill] sm:$0xff] }
 0x472   :  { %v4998_v18 = vpop.eup %4997 }
 0x473   :  { %v2174_v40 = vmul.f32 %v4998_v18, %v4996_v30 }
 0x475   :  { %v5000_v47 = vpop.eup %4999  ;;  %2268 = vmatmul.mubr.f32.vlgmr.msra.gmra.mrb[8].mxu0 %v2174_v40  ;;  %2339 = vmatmul.mubr.f32.vlgmr.msra.gmra.mrb[8].mxu1 %v2174_v40  ;;  %v6472_v40 = vld [vmem:[#allocation12_spill] sm:$0xff] }
 0x476   :  { %v5002_v51 = vpop.eup %5001  ;;  %v2178_v12 = vadd.f32 1.0, %v5000_v47  ;;  %4305 = vmatpush1.bf16.msra.mxu0 %v5528_v31  ;;  %4337 = vmatpush1.bf16.msra.mxu1 %v5530_v34  ;;  %v6473_v47 = vld [vmem:[#allocation13_spill] sm:$0xff] }
 0x477   :  { %v2184_v52 = vadd.f32 1.0, %v5002_v51  ;;  %4307 = vmatprep.subr.bf16.mxu0 %v5534_v41  ;;  %4339 = vmatprep.subr.bf16.mxu1 %v5536_v42  ;;  %v5004_v8 = vpop.eup %5003  ;;  %v6474_v51 = vld [vmem:[#allocation14_spill] sm:$0xff] }
 0x478   :  { %5007 = vrcp.f32 %v2178_v12  ;;  %2417 = vmatprep.mubr.f32.mxu0 %v6382_v4  ;;  %2488 = vmatprep.mubr.f32.mxu1 %v6382_v4  ;;  %v5006_v50 = vpop.eup %5005  ;;  %v2191_v48 = vadd.f32 1.0, %v5004_v8  ;;  %v6475_v12 = vld [vmem:[#allocation15_spill] sm:$0xff]  ;;  %v6477_v8 = vld [vmem:[#allocation17_spill] sm:$0xff] }
 0x479   :  { %5009 = vrcp.f32 %v2184_v52  ;;  %v6476_v52 = vld [vmem:[#allocation16_spill] sm:$0xff] }
 0x47a   :  { %4309 = vmatpush1.bf16.msra.mxu0 %v5544_v53  ;;  %4341 = vmatpush1.bf16.msra.mxu1 %v5546_v58  ;;  %5011 = vrcp.f32 %v2191_v48  ;;  %v6482_v48 = vld [vmem:[#allocation22_spill] sm:$0xff] }
 0x47b   :  { %4311 = vmatprep.subr.bf16.mxu0 %v5550_v61  ;;  %4343 = vmatprep.subr.bf16.mxu1 %v5552_v2 }
 0x47e   :  { %4313 = vmatpush1.bf16.msra.mxu0 %v6389_v37  ;;  %4345 = vmatpush1.bf16.msra.mxu1 %v6390_v55 }
 0x47f   :  { %4315 = vmatprep.subr.bf16.mxu0 %v6391_v22  ;;  %4347 = vmatprep.subr.bf16.mxu1 %v6392_v15 }
 0x482   :  { %v5008_v25 = vpop.eup %5007  ;;  %4317 = vmatpush1.bf16.msra.mxu0 %v6393_v7  ;;  %4349 = vmatpush1.bf16.msra.mxu1 %v6394_v9 }
 0x483   :  { %v5010_v26 = vpop.eup %5009  ;;  %v2195_v11 = vmul.f32 %v5008_v25, %v5006_v50  ;;  %4319 = vmatprep.subr.bf16.mxu0 %v6395_v54  ;;  %4351 = vmatprep.subr.bf16.mxu1 %v6396_v28  ;;  %v6478_v50 = vld [vmem:[#allocation18_spill] sm:$0xff]  ;;  %v6479_v25 = vld [vmem:[#allocation19_spill] sm:$0xff] }
 0x484   :  { %v2194_v57 = vmul.f32 %v5010_v26, %v5880_v20  ;;  %v5012_v20 = vpop.eup %5011  ;;  %v6480_v26 = vld [vmem:[#allocation20_spill] sm:$0xff] }
 0x486   :  { %v5964_v30 = vadd.f32 %v2195_v11, %v2194_v57  ;;  %4321 = vmatpush1.bf16.msra.mxu0 %v6397_v59  ;;  %4353 = vmatpush1.bf16.msra.mxu1 %v6398_v27  ;;  %v6481_v11 = vld [vmem:[#allocation21_spill] sm:$0xff]  ;;  %v6483_v57 = vld [vmem:[#allocation23_spill] sm:$0xff] }
 0x487   :  { %4323 = vmatprep.subr.bf16.mxu0 %v5588_v23  ;;  %4355 = vmatprep.subr.bf16.mxu1 %v5590_v46 }
 0x488   :  { %5013 = vtanh.f32 %v5964_v30 }
 0x48a   :  { %4325 = vmatpush1.bf16.msra.mxu0 %v5594_v60  ;;  %4357 = vmatpush1.bf16.msra.mxu1 %v5596_v3 }
 0x48b   :  { %4327 = vmatprep.subr.bf16.mxu0 %v5600_v1  ;;  %4359 = vmatprep.subr.bf16.mxu1 %v5602_v16 }
 0x48e   :  { %4329 = vmatpush1.bf16.msra.mxu0 %v5606_v36  ;;  %4361 = vmatpush1.bf16.msra.mxu1 %v5608_v43 }
 0x48f   :  { %4331 = vmatprep.subr.bf16.mxu0 %v5612_v29  ;;  %4363 = vmatprep.subr.bf16.mxu1 %v5614_v35 }
 0x492   :  { %v5014_v18 = vpop.eup %5013  ;;  %4333 = vmatpush1.bf16.msra.mxu0 %v5618_v10  ;;  %4365 = vmatpush1.bf16.msra.mxu1 %v5620_v14 }
 0x493   :  { %v2198_v63 = vmul.f32 %v5014_v18, %v5012_v20  ;;  %4367 = vmatprep.subr.bf16.mxu0 %v5299_v13  ;;  %4399 = vmatprep.subr.bf16.mxu1 %v5312_v17  ;;  %v6484_v20 = vld [vmem:[#allocation24_spill] sm:$0xff]  ;;  %v6485_v18 = vld [vmem:[#allocation25_spill] sm:$0xff] }
 0x495   :  { %2418 = vmatmul.mubr.f32.vlgmr.msra.gmra.mrb[22].mxu0 %v2198_v63  ;;  %2489 = vmatmul.mubr.f32.vlgmr.msra.gmra.mrb[22].mxu1 %v2198_v63  ;;  %v6486_v63 = vld [vmem:[#allocation26_spill] sm:$0xff] }
 0x496   :  { %4369 = vmatpush1.bf16.msra.mxu0 %v5388_v32  ;;  %4401 = vmatpush1.bf16.msra.mxu1 %v5390_v33 }
 0x497   :  { %4371 = vmatprep.subr.bf16.mxu0 %v5392_v38  ;;  %4403 = vmatprep.subr.bf16.mxu1 %v5394_v39 }
 0x498   :  { %2615 = vmatprep.mubr.f32.mxu0 %v6382_v4  ;;  %2686 = vmatprep.mubr.f32.mxu1 %v6382_v4 }
 0x49a   :  { %4373 = vmatpush1.bf16.msra.mxu0 %v5402_v44  ;;  %4405 = vmatpush1.bf16.msra.mxu1 %v5404_v45 }
 0x49b   :  { %4375 = vmatprep.subr.bf16.mxu0 %v6471_v6  ;;  %4407 = vmatprep.subr.bf16.mxu1 %v6472_v40 }
 0x49e   :  { %4377 = vmatpush1.bf16.msra.mxu0 %v6473_v47  ;;  %4409 = vmatpush1.bf16.msra.mxu1 %v6474_v51 }
 0x49f   :  { %4379 = vmatprep.subr.bf16.mxu0 %v6475_v12  ;;  %4411 = vmatprep.subr.bf16.mxu1 %v6476_v52  ;;  %v6487_v52 = vld [vmem:[#allocation27_spill] sm:$0xff] }
 0x4a0   :  { %v6497_v12 = vld [vmem:[#allocation47_spill] sm:$0xff] }
 0x4a2   :  { %4381 = vmatpush1.bf16.msra.mxu0 %v6477_v8  ;;  %4413 = vmatpush1.bf16.msra.mxu1 %v6478_v50  ;;  %v6488_v8 = vld [vmem:[#allocation28_spill] sm:$0xff]  ;;  %v6489_v50 = vld [vmem:[#allocation29_spill] sm:$0xff] }
 0x4a3   :  { %4383 = vmatprep.subr.bf16.mxu0 %v6479_v25  ;;  %4415 = vmatprep.subr.bf16.mxu1 %v6480_v26  ;;  %v6490_v25 = vld [vmem:[#allocation30_spill] sm:$0xff]  ;;  %v6491_v26 = vld [vmem:[#allocation31_spill] sm:$0xff] }
 0x4a6   :  { %4385 = vmatpush1.bf16.msra.mxu0 %v6481_v11  ;;  %4417 = vmatpush1.bf16.msra.mxu1 %v6482_v48  ;;  %v6492_v11 = vld [vmem:[#allocation32_spill] sm:$0xff]  ;;  %v6493_v48 = vld [vmem:[#allocation33_spill] sm:$0xff] }
 0x4a7   :  { %4387 = vmatprep.subr.bf16.mxu0 %v6483_v57  ;;  %4419 = vmatprep.subr.bf16.mxu1 %v6484_v20  ;;  %v6494_v57 = vld [vmem:[#allocation34_spill] sm:$0xff]  ;;  %v6495_v20 = vld [vmem:[#allocation35_spill] sm:$0xff] }
 0x4aa   :  { %4389 = vmatpush1.bf16.msra.mxu0 %v6485_v18  ;;  %4421 = vmatpush1.bf16.msra.mxu1 %v6486_v63  ;;  %v6496_v18 = vld [vmem:[#allocation36_spill] sm:$0xff] }
 0x4ab   :  { %4391 = vmatprep.subr.bf16.mxu0 %v6487_v52  ;;  %4423 = vmatprep.subr.bf16.mxu1 %v6488_v8 }
 0x4ae   :  { %4393 = vmatpush1.bf16.msra.mxu0 %v6489_v50  ;;  %4425 = vmatpush1.bf16.msra.mxu1 %v6490_v25 }
 0x4af   :  { %4395 = vmatprep.subr.bf16.mxu0 %v6491_v26  ;;  %4427 = vmatprep.subr.bf16.mxu1 %v6492_v11 }
 0x4b2   :  { %4397 = vmatpush1.bf16.msra.mxu0 %v6493_v48  ;;  %4429 = vmatpush1.bf16.msra.mxu1 %v6494_v57 }
 0x4b3   :  { %4431 = vmatprep.subr.bf16.mxu0 %v6495_v20  ;;  %4463 = vmatprep.subr.bf16.mxu1 %v6496_v18 }
 0x548   :  { %v2269_v63 = vpop.f32.mrb[8].mxu0  ;;  %v2340_v52 = vpop.f32.mrb[8].mxu1 }
 0x549   :  { %v4758_v8 = vadd.f32 %v2269_v63, %v6497_v12  ;;  %v2271_v51 = vpop.f32.mrb[9].mxu0  ;;  %v2342_v50 = vpop.f32.mrb[9].mxu1  ;;  %v4774_v57 = vadd.f32 %v2340_v52, %v6443_v56 }
 0x54a   :  { %v4759_v25 = vadd.f32 %v2271_v51, %v6442_v5  ;;  %v4775_v48 = vadd.f32 %v2342_v50, %v6413_v24 }
 0x54b   :  { %v3698_v47 = vmul.f32 -1.442695, %v4758_v8 }
 0x54c   :  { %v3699_v26 = vmul.f32 -1.442695, %v4759_v25  ;;  %v3700_v11 = vmul.f32 -1.442695, %v4775_v48 }
 0x54d   :  { %5015 = vpow2.f32 %v3698_v47 }
 0x54e   :  { %5017 = vpow2.f32 %v3699_v26 }
 0x54f   :  { %5019 = vpow2.f32 %v3700_v11 }
 0x550   :  { %5021 = vtanh.f32 %v4774_v57 }
 0x557   :  { %v5016_v20 = vpop.eup %5015 }
 0x558   :  { %v5018_v40 = vpop.eup %5017  ;;  %v2502_v18 = vadd.f32 1.0, %v5016_v20 }
 0x559   :  { %v2508_v6 = vadd.f32 1.0, %v5018_v40  ;;  %v5020_v63 = vpop.eup %5019 }
 0x55a   :  { %5023 = vrcp.f32 %v2502_v18  ;;  %v5022_v12 = vpop.eup %5021  ;;  %v2515_v47 = vadd.f32 1.0, %v5020_v63 }
 0x55b   :  { %5025 = vrcp.f32 %v2508_v6 }
 0x55c   :  { %5027 = vrcp.f32 %v2515_v47 }
 0x564   :  { %v5024_v51 = vpop.eup %5023 }
 0x565   :  { %v5026_v8 = vpop.eup %5025  ;;  %v2519_v25 = vmul.f32 %v5024_v51, %v5022_v12 }
 0x566   :  { %v2518_v26 = vmul.f32 %v5026_v8, %v5938_v62  ;;  %v5028_v62 = vpop.eup %5027 }
 0x568   :  { %v6022_v50 = vadd.f32 %v2519_v25, %v2518_v26  ;;  %v2419_v48 = vpop.f32.mrb[22].mxu0  ;;  %v2490_v52 = vpop.f32.mrb[22].mxu1 }
 0x569   :  { %v4788_v20 = vadd.f32 %v2419_v48, %v6416_v19  ;;  %v2421_v11 = vpop.f32.mrb[23].mxu0  ;;  %v2492_v57 = vpop.f32.mrb[23].mxu1  ;;  %v4804_v8 = vadd.f32 %v2490_v52, %v5691_v0 }
 0x56a   :  { %v4789_v40 = vadd.f32 %v2421_v11, %v5681_v49  ;;  %5029 = vtanh.f32 %v6022_v50  ;;  %v4805_v12 = vadd.f32 %v2492_v57, %v5688_v21 }
 0x56b   :  { %v3701_v6 = vmul.f32 -1.442695, %v4788_v20 }
 0x56c   :  { %v3702_v18 = vmul.f32 -1.442695, %v4789_v40  ;;  %v3703_v51 = vmul.f32 -1.442695, %v4805_v12 }
 0x56d   :  { %5031 = vpow2.f32 %v3701_v6 }
 0x56e   :  { %5033 = vpow2.f32 %v3702_v18 }
 0x56f   :  { %5035 = vpow2.f32 %v3703_v51 }
 0x570   :  { %5037 = vtanh.f32 %v4804_v8  ;;  %v6498_v8 = vld [vmem:[#allocation11_spill] sm:$0xff] }
 0x574   :  { %v5030_v63 = vpop.eup %5029 }
 0x575   :  { %v2522_v25 = vmul.f32 %v5030_v63, %v5028_v62 }
 0x577   :  { %v5032_v47 = vpop.eup %5031  ;;  %2616 = vmatmul.mubr.f32.vlgmr.msra.gmra.mrb[10].mxu0 %v2522_v25  ;;  %2687 = vmatmul.mubr.f32.vlgmr.msra.gmra.mrb[10].mxu1 %v2522_v25  ;;  %v6499_v25 = vld [vmem:[#allocation12_spill] sm:$0xff] }
 0x578   :  { %v5034_v26 = vpop.eup %5033  ;;  %v2526_v48 = vadd.f32 1.0, %v5032_v47  ;;  %4433 = vmatpush1.bf16.msra.mxu0 %v5528_v31  ;;  %4465 = vmatpush1.bf16.msra.mxu1 %v5530_v34  ;;  %v6500_v47 = vld [vmem:[#allocation13_spill] sm:$0xff] }
 0x579   :  { %v2532_v20 = vadd.f32 1.0, %v5034_v26  ;;  %4435 = vmatprep.subr.bf16.mxu0 %v5534_v41  ;;  %4467 = vmatprep.subr.bf16.mxu1 %v5536_v42  ;;  %v5036_v52 = vpop.eup %5035  ;;  %v6501_v26 = vld [vmem:[#allocation14_spill] sm:$0xff] }
 0x57a   :  { %5039 = vrcp.f32 %v2526_v48  ;;  %2765 = vmatprep.mubr.f32.mxu0 %v6382_v4  ;;  %2836 = vmatprep.mubr.f32.mxu1 %v6382_v4  ;;  %v5038_v11 = vpop.eup %5037  ;;  %v2539_v18 = vadd.f32 1.0, %v5036_v52  ;;  %v6502_v48 = vld [vmem:[#allocation15_spill] sm:$0xff]  ;;  %v6504_v52 = vld [vmem:[#allocation17_spill] sm:$0xff] }
 0x57b   :  { %5041 = vrcp.f32 %v2532_v20  ;;  %v6503_v20 = vld [vmem:[#allocation16_spill] sm:$0xff] }
 0x57c   :  { %4437 = vmatpush1.bf16.msra.mxu0 %v5544_v53  ;;  %4469 = vmatpush1.bf16.msra.mxu1 %v5546_v58  ;;  %5043 = vrcp.f32 %v2539_v18  ;;  %v6509_v18 = vld [vmem:[#allocation22_spill] sm:$0xff] }
 0x57d   :  { %4439 = vmatprep.subr.bf16.mxu0 %v5550_v61  ;;  %4471 = vmatprep.subr.bf16.mxu1 %v5552_v2 }
 0x580   :  { %4441 = vmatpush1.bf16.msra.mxu0 %v6389_v37  ;;  %4473 = vmatpush1.bf16.msra.mxu1 %v6390_v55 }
 0x581   :  { %4443 = vmatprep.subr.bf16.mxu0 %v6391_v22  ;;  %4475 = vmatprep.subr.bf16.mxu1 %v6392_v15 }
 0x584   :  { %v5040_v57 = vpop.eup %5039  ;;  %4445 = vmatpush1.bf16.msra.mxu0 %v6393_v7  ;;  %4477 = vmatpush1.bf16.msra.mxu1 %v6394_v9 }
 0x585   :  { %v5042_v40 = vpop.eup %5041  ;;  %v2543_v6 = vmul.f32 %v5040_v57, %v5038_v11  ;;  %4447 = vmatprep.subr.bf16.mxu0 %v6395_v54  ;;  %4479 = vmatprep.subr.bf16.mxu1 %v6396_v28  ;;  %v6505_v11 = vld [vmem:[#allocation18_spill] sm:$0xff]  ;;  %v6506_v57 = vld [vmem:[#allocation19_spill] sm:$0xff] }
 0x586   :  { %v2542_v12 = vmul.f32 %v5042_v40, %v5964_v30  ;;  %v5044_v30 = vpop.eup %5043  ;;  %v6507_v40 = vld [vmem:[#allocation20_spill] sm:$0xff] }
 0x588   :  { %v6048_v62 = vadd.f32 %v2543_v6, %v2542_v12  ;;  %4449 = vmatpush1.bf16.msra.mxu0 %v6397_v59  ;;  %4481 = vmatpush1.bf16.msra.mxu1 %v6398_v27  ;;  %v6508_v6 = vld [vmem:[#allocation21_spill] sm:$0xff]  ;;  %v6510_v12 = vld [vmem:[#allocation23_spill] sm:$0xff] }
 0x589   :  { %4451 = vmatprep.subr.bf16.mxu0 %v5588_v23  ;;  %4483 = vmatprep.subr.bf16.mxu1 %v5590_v46 }
 0x58a   :  { %5045 = vtanh.f32 %v6048_v62 }
 0x58c   :  { %4453 = vmatpush1.bf16.msra.mxu0 %v5594_v60  ;;  %4485 = vmatpush1.bf16.msra.mxu1 %v5596_v3 }
 0x58d   :  { %4455 = vmatprep.subr.bf16.mxu0 %v5600_v1  ;;  %4487 = vmatprep.subr.bf16.mxu1 %v5602_v16 }
 0x590   :  { %4457 = vmatpush1.bf16.msra.mxu0 %v5606_v36  ;;  %4489 = vmatpush1.bf16.msra.mxu1 %v5608_v43 }
 0x591   :  { %4459 = vmatprep.subr.bf16.mxu0 %v5612_v29  ;;  %4491 = vmatprep.subr.bf16.mxu1 %v5614_v35 }
 0x594   :  { %v5046_v63 = vpop.eup %5045  ;;  %4461 = vmatpush1.bf16.msra.mxu0 %v5618_v10  ;;  %4493 = vmatpush1.bf16.msra.mxu1 %v5620_v14 }
 0x595   :  { %v2546_v51 = vmul.f32 %v5046_v63, %v5044_v30  ;;  %4495 = vmatprep.subr.bf16.mxu0 %v5299_v13  ;;  %4527 = vmatprep.subr.bf16.mxu1 %v5312_v17  ;;  %v6511_v30 = vld [vmem:[#allocation24_spill] sm:$0xff]  ;;  %v6512_v63 = vld [vmem:[#allocation25_spill] sm:$0xff] }
 0x597   :  { %2766 = vmatmul.mubr.f32.vlgmr.msra.gmra.mrb[20].mxu0 %v2546_v51  ;;  %2837 = vmatmul.mubr.f32.vlgmr.msra.gmra.mrb[20].mxu1 %v2546_v51  ;;  %v6513_v51 = vld [vmem:[#allocation26_spill] sm:$0xff] }
 0x598   :  { %4497 = vmatpush1.bf16.msra.mxu0 %v5388_v32  ;;  %4529 = vmatpush1.bf16.msra.mxu1 %v5390_v33 }
 0x599   :  { %4499 = vmatprep.subr.bf16.mxu0 %v5392_v38  ;;  %4531 = vmatprep.subr.bf16.mxu1 %v5394_v39 }
 0x59a   :  { %2963 = vmatprep.mubr.f32.mxu0 %v6382_v4  ;;  %3034 = vmatprep.mubr.f32.mxu1 %v6382_v4 }
 0x59c   :  { %4501 = vmatpush1.bf16.msra.mxu0 %v5402_v44  ;;  %4533 = vmatpush1.bf16.msra.mxu1 %v5404_v45 }
 0x59d   :  { %4503 = vmatprep.subr.bf16.mxu0 %v6498_v8  ;;  %4535 = vmatprep.subr.bf16.mxu1 %v6499_v25 }
 0x5a0   :  { %4505 = vmatpush1.bf16.msra.mxu0 %v6500_v47  ;;  %4537 = vmatpush1.bf16.msra.mxu1 %v6501_v26 }
 0x5a1   :  { %4507 = vmatprep.subr.bf16.mxu0 %v6502_v48  ;;  %4539 = vmatprep.subr.bf16.mxu1 %v6503_v20  ;;  %v6514_v20 = vld [vmem:[#allocation27_spill] sm:$0xff] }
 0x5a2   :  { %v6524_v48 = vld [vmem:[#allocation47_spill] sm:$0xff] }
 0x5a4   :  { %4509 = vmatpush1.bf16.msra.mxu0 %v6504_v52  ;;  %4541 = vmatpush1.bf16.msra.mxu1 %v6505_v11  ;;  %v6515_v52 = vld [vmem:[#allocation28_spill] sm:$0xff]  ;;  %v6516_v11 = vld [vmem:[#allocation29_spill] sm:$0xff] }
 0x5a5   :  { %4511 = vmatprep.subr.bf16.mxu0 %v6506_v57  ;;  %4543 = vmatprep.subr.bf16.mxu1 %v6507_v40  ;;  %v6517_v57 = vld [vmem:[#allocation30_spill] sm:$0xff]  ;;  %v6518_v40 = vld [vmem:[#allocation31_spill] sm:$0xff] }
 0x5a8   :  { %4513 = vmatpush1.bf16.msra.mxu0 %v6508_v6  ;;  %4545 = vmatpush1.bf16.msra.mxu1 %v6509_v18  ;;  %v6519_v6 = vld [vmem:[#allocation32_spill] sm:$0xff]  ;;  %v6520_v18 = vld [vmem:[#allocation33_spill] sm:$0xff] }
 0x5a9   :  { %4515 = vmatprep.subr.bf16.mxu0 %v6510_v12  ;;  %4547 = vmatprep.subr.bf16.mxu1 %v6511_v30  ;;  %v6521_v12 = vld [vmem:[#allocation34_spill] sm:$0xff]  ;;  %v6522_v30 = vld [vmem:[#allocation35_spill] sm:$0xff] }
 0x5ac   :  { %4517 = vmatpush1.bf16.msra.mxu0 %v6512_v63  ;;  %4549 = vmatpush1.bf16.msra.mxu1 %v6513_v51  ;;  %v6523_v63 = vld [vmem:[#allocation36_spill] sm:$0xff] }
 0x5ad   :  { %4519 = vmatprep.subr.bf16.mxu0 %v6514_v20  ;;  %4551 = vmatprep.subr.bf16.mxu1 %v6515_v52 }
 0x5b0   :  { %4521 = vmatpush1.bf16.msra.mxu0 %v6516_v11  ;;  %4553 = vmatpush1.bf16.msra.mxu1 %v6517_v57 }
 0x5b1   :  { %4523 = vmatprep.subr.bf16.mxu0 %v6518_v40  ;;  %4555 = vmatprep.subr.bf16.mxu1 %v6519_v6 }
 0x5b4   :  { %4525 = vmatpush1.bf16.msra.mxu0 %v6520_v18  ;;  %4557 = vmatpush1.bf16.msra.mxu1 %v6521_v12 }
 0x5b5   :  { %4559 = vmatprep.subr.bf16.mxu0 %v6522_v30  ;;  %4591 = vmatprep.subr.bf16.mxu1 %v6523_v63 }
 0x64a   :  { %v2617_v51 = vpop.f32.mrb[10].mxu0  ;;  %v2688_v20 = vpop.f32.mrb[10].mxu1 }
 0x64b   :  { %v4760_v52 = vadd.f32 %v2617_v51, %v6524_v48  ;;  %v2619_v26 = vpop.f32.mrb[11].mxu0  ;;  %v2690_v11 = vpop.f32.mrb[11].mxu1  ;;  %v4776_v12 = vadd.f32 %v2688_v20, %v6443_v56 }
 0x64c   :  { %v4761_v57 = vadd.f32 %v2619_v26, %v6442_v5  ;;  %v4777_v18 = vadd.f32 %v2690_v11, %v6413_v24 }
 0x64d   :  { %v3704_v47 = vmul.f32 -1.442695, %v4760_v52 }
 0x64e   :  { %v3705_v40 = vmul.f32 -1.442695, %v4761_v57  ;;  %v3706_v6 = vmul.f32 -1.442695, %v4777_v18 }
 0x64f   :  { %5047 = vpow2.f32 %v3704_v47 }
 0x650   :  { %5049 = vpow2.f32 %v3705_v40 }
 0x651   :  { %5051 = vpow2.f32 %v3706_v6 }
 0x652   :  { %5053 = vtanh.f32 %v4776_v12 }
 0x659   :  { %v5048_v30 = vpop.eup %5047 }
 0x65a   :  { %v5050_v25 = vpop.eup %5049  ;;  %v2850_v63 = vadd.f32 1.0, %v5048_v30 }
 0x65b   :  { %v2856_v8 = vadd.f32 1.0, %v5050_v25  ;;  %v5052_v51 = vpop.eup %5051 }
 0x65c   :  { %5055 = vrcp.f32 %v2850_v63  ;;  %v5054_v48 = vpop.eup %5053  ;;  %v2863_v47 = vadd.f32 1.0, %v5052_v51 }
 0x65d   :  { %5057 = vrcp.f32 %v2856_v8 }
 0x65e   :  { %5059 = vrcp.f32 %v2863_v47 }
 0x666   :  { %v5056_v26 = vpop.eup %5055 }
 0x667   :  { %v5058_v52 = vpop.eup %5057  ;;  %v2867_v57 = vmul.f32 %v5056_v26, %v5054_v48 }
 0x668   :  { %v2866_v40 = vmul.f32 %v5058_v52, %v6022_v50  ;;  %v5060_v50 = vpop.eup %5059 }
 0x66a   :  { %v6106_v11 = vadd.f32 %v2867_v57, %v2866_v40  ;;  %v2767_v18 = vpop.f32.mrb[20].mxu0  ;;  %v2838_v20 = vpop.f32.mrb[20].mxu1 }
 0x66b   :  { %v4786_v30 = vadd.f32 %v2767_v18, %v6416_v19  ;;  %v2769_v6 = vpop.f32.mrb[21].mxu0  ;;  %v2840_v12 = vpop.f32.mrb[21].mxu1  ;;  %v4802_v52 = vadd.f32 %v2838_v20, %v5691_v0 }
 0x66c   :  { %v4787_v25 = vadd.f32 %v2769_v6, %v5681_v49  ;;  %5061 = vtanh.f32 %v6106_v11  ;;  %v4803_v48 = vadd.f32 %v2840_v12, %v5688_v21 }
 0x66d   :  { %v3707_v8 = vmul.f32 -1.442695, %v4786_v30 }
 0x66e   :  { %v3708_v63 = vmul.f32 -1.442695, %v4787_v25  ;;  %v3709_v26 = vmul.f32 -1.442695, %v4803_v48 }
 0x66f   :  { %5063 = vpow2.f32 %v3707_v8 }
 0x670   :  { %5065 = vpow2.f32 %v3708_v63 }
 0x671   :  { %5067 = vpow2.f32 %v3709_v26 }
 0x672   :  { %5069 = vtanh.f32 %v4802_v52  ;;  %v6527_v52 = vld [vmem:[#allocation13_spill] sm:$0xff] }
 0x676   :  { %v5062_v51 = vpop.eup %5061 }
 0x677   :  { %v2870_v57 = vmul.f32 %v5062_v51, %v5060_v50 }
 0x679   :  { %v5064_v47 = vpop.eup %5063  ;;  %2964 = vmatmul.mubr.f32.vlgmr.msra.gmra.mrb[12].mxu0 %v2870_v57  ;;  %3035 = vmatmul.mubr.f32.vlgmr.msra.gmra.mrb[12].mxu1 %v2870_v57  ;;  %v6532_v57 = vld [vmem:[#allocation18_spill] sm:$0xff] }
 0x67a   :  { %v5066_v40 = vpop.eup %5065  ;;  %v2874_v18 = vadd.f32 1.0, %v5064_v47  ;;  %4561 = vmatpush1.bf16.msra.mxu0 %v5528_v31  ;;  %4593 = vmatpush1.bf16.msra.mxu1 %v5530_v34  ;;  %v6533_v47 = vld [vmem:[#allocation19_spill] sm:$0xff] }
 0x67b   :  { %v2880_v30 = vadd.f32 1.0, %v5066_v40  ;;  %4563 = vmatprep.subr.bf16.mxu0 %v5534_v41  ;;  %4595 = vmatprep.subr.bf16.mxu1 %v5536_v42  ;;  %v5068_v20 = vpop.eup %5067  ;;  %v6536_v40 = vld [vmem:[#allocation22_spill] sm:$0xff] }
 0x67c   :  { %5071 = vrcp.f32 %v2874_v18  ;;  %3113 = vmatprep.mubr.f32.mxu0 %v6382_v4  ;;  %3184 = vmatprep.mubr.f32.mxu1 %v6382_v4  ;;  %v5070_v6 = vpop.eup %5069  ;;  %v2887_v63 = vadd.f32 1.0, %v5068_v20  ;;  %v6537_v18 = vld [vmem:[#allocation23_spill] sm:$0xff]  ;;  %v6539_v20 = vld [vmem:[#allocation25_spill] sm:$0xff] }
 0x67d   :  { %5073 = vrcp.f32 %v2880_v30  ;;  %v6538_v30 = vld [vmem:[#allocation24_spill] sm:$0xff] }
 0x67e   :  { %4565 = vmatpush1.bf16.msra.mxu0 %v5544_v53  ;;  %4597 = vmatpush1.bf16.msra.mxu1 %v5546_v58  ;;  %5075 = vrcp.f32 %v2887_v63  ;;  %v6544_v63 = vld [vmem:[#allocation30_spill] sm:$0xff] }
 0x67f   :  { %4567 = vmatprep.subr.bf16.mxu0 %v5550_v61  ;;  %4599 = vmatprep.subr.bf16.mxu1 %v5552_v2 }
 0x682   :  { %4569 = vmatpush1.bf16.msra.mxu0 %v6389_v37  ;;  %4601 = vmatpush1.bf16.msra.mxu1 %v6390_v55 }
 0x683   :  { %4571 = vmatprep.subr.bf16.mxu0 %v6391_v22  ;;  %4603 = vmatprep.subr.bf16.mxu1 %v6392_v15 }
 0x686   :  { %v5072_v12 = vpop.eup %5071  ;;  %4573 = vmatpush1.bf16.msra.mxu0 %v6393_v7  ;;  %4605 = vmatpush1.bf16.msra.mxu1 %v6394_v9 }
 0x687   :  { %v5074_v25 = vpop.eup %5073  ;;  %v2891_v8 = vmul.f32 %v5072_v12, %v5070_v6  ;;  %4575 = vmatprep.subr.bf16.mxu0 %v6395_v54  ;;  %4607 = vmatprep.subr.bf16.mxu1 %v6396_v28  ;;  %v6540_v6 = vld [vmem:[#allocation26_spill] sm:$0xff]  ;;  %v6541_v12 = vld [vmem:[#allocation27_spill] sm:$0xff] }
 0x688   :  { %v2890_v48 = vmul.f32 %v5074_v25, %v6048_v62  ;;  %v5076_v62 = vpop.eup %5075  ;;  %v6542_v25 = vld [vmem:[#allocation28_spill] sm:$0xff] }
 0x68a   :  { %v6132_v50 = vadd.f32 %v2891_v8, %v2890_v48  ;;  %4577 = vmatpush1.bf16.msra.mxu0 %v6397_v59  ;;  %4609 = vmatpush1.bf16.msra.mxu1 %v6398_v27  ;;  %v6543_v8 = vld [vmem:[#allocation29_spill] sm:$0xff]  ;;  %v6545_v48 = vld [vmem:[#allocation31_spill] sm:$0xff] }
 0x68b   :  { %4579 = vmatprep.subr.bf16.mxu0 %v5588_v23  ;;  %4611 = vmatprep.subr.bf16.mxu1 %v5590_v46 }
 0x68c   :  { %5077 = vtanh.f32 %v6132_v50 }
 0x68e   :  { %4581 = vmatpush1.bf16.msra.mxu0 %v5594_v60  ;;  %4613 = vmatpush1.bf16.msra.mxu1 %v5596_v3 }
 0x68f   :  { %4583 = vmatprep.subr.bf16.mxu0 %v5600_v1  ;;  %4615 = vmatprep.subr.bf16.mxu1 %v5602_v16 }
 0x692   :  { %4585 = vmatpush1.bf16.msra.mxu0 %v5606_v36  ;;  %4617 = vmatpush1.bf16.msra.mxu1 %v5608_v43 }
 0x693   :  { %4587 = vmatprep.subr.bf16.mxu0 %v5612_v29  ;;  %4619 = vmatprep.subr.bf16.mxu1 %v5614_v35 }
 0x696   :  { %v5078_v51 = vpop.eup %5077  ;;  %4589 = vmatpush1.bf16.msra.mxu0 %v5618_v10  ;;  %4621 = vmatpush1.bf16.msra.mxu1 %v5620_v14 }
 0x697   :  { %v2894_v26 = vmul.f32 %v5078_v51, %v5076_v62  ;;  %4623 = vmatprep.subr.bf16.mxu0 %v5299_v13  ;;  %4655 = vmatprep.subr.bf16.mxu1 %v5312_v17  ;;  %v6525_v13 = vld [vmem:[#allocation11_spill] sm:$0xff]  ;;  %v6526_v17 = vld [vmem:[#allocation12_spill] sm:$0xff]  ;;  %v6547_v51 = vld [vmem:[#allocation33_spill] sm:$0xff] }
 0x698   :  { %v6546_v62 = vld [vmem:[#allocation32_spill] sm:$0xff] }
 0x699   :  { %3114 = vmatmul.mubr.f32.vlgmr.msra.gmra.mrb[18].mxu0 %v2894_v26  ;;  %3185 = vmatmul.mubr.f32.vlgmr.msra.gmra.mrb[18].mxu1 %v2894_v26  ;;  %v6548_v26 = vld [vmem:[#allocation34_spill] sm:$0xff] }
 0x69a   :  { %4625 = vmatpush1.bf16.msra.mxu0 %v5388_v32  ;;  %4657 = vmatpush1.bf16.msra.mxu1 %v5390_v33  ;;  %v6528_v32 = vld [vmem:[#allocation14_spill] sm:$0xff]  ;;  %v6529_v33 = vld [vmem:[#allocation15_spill] sm:$0xff] }
 0x69b   :  { %4627 = vmatprep.subr.bf16.mxu0 %v5392_v38  ;;  %4659 = vmatprep.subr.bf16.mxu1 %v5394_v39  ;;  %v6530_v38 = vld [vmem:[#allocation16_spill] sm:$0xff]  ;;  %v6531_v39 = vld [vmem:[#allocation17_spill] sm:$0xff] }
 0x69c   :  { %3311 = vmatprep.mubr.f32.mxu0 %v6382_v4  ;;  %3382 = vmatprep.mubr.f32.mxu1 %v6382_v4 }
 0x69e   :  { %4629 = vmatpush1.bf16.msra.mxu0 %v5402_v44  ;;  %4661 = vmatpush1.bf16.msra.mxu1 %v5404_v45  ;;  %v6534_v44 = vld [vmem:[#allocation20_spill] sm:$0xff]  ;;  %v6535_v45 = vld [vmem:[#allocation21_spill] sm:$0xff] }
 0x69f   :  { %4631 = vmatprep.subr.bf16.mxu0 %v6525_v13  ;;  %4663 = vmatprep.subr.bf16.mxu1 %v6526_v17  ;;  %v6549_v13 = vld [vmem:[#allocation35_spill] sm:$0xff]  ;;  %v6550_v17 = vld [vmem:[#allocation36_spill] sm:$0xff] }
 0x6a2   :  { %4633 = vmatpush1.bf16.msra.mxu0 %v6527_v52  ;;  %4665 = vmatpush1.bf16.msra.mxu1 %v6528_v32 }
 0x6a3   :  { %4635 = vmatprep.subr.bf16.mxu0 %v6529_v33  ;;  %4667 = vmatprep.subr.bf16.mxu1 %v6530_v38  ;;  %v6551_v33 = vld [vmem:[#allocation47_spill] sm:$0xff] }
 0x6a6   :  { %4637 = vmatpush1.bf16.msra.mxu0 %v6531_v39  ;;  %4669 = vmatpush1.bf16.msra.mxu1 %v6532_v57 }
 0x6a7   :  { %4639 = vmatprep.subr.bf16.mxu0 %v6533_v47  ;;  %4671 = vmatprep.subr.bf16.mxu1 %v6534_v44 }
 0x6aa   :  { %4641 = vmatpush1.bf16.msra.mxu0 %v6535_v45  ;;  %4673 = vmatpush1.bf16.msra.mxu1 %v6536_v40 }
 0x6ab   :  { %4643 = vmatprep.subr.bf16.mxu0 %v6537_v18  ;;  %4675 = vmatprep.subr.bf16.mxu1 %v6538_v30 }
 0x6ae   :  { %4645 = vmatpush1.bf16.msra.mxu0 %v6539_v20  ;;  %4677 = vmatpush1.bf16.msra.mxu1 %v6540_v6 }
 0x6af   :  { %4647 = vmatprep.subr.bf16.mxu0 %v6541_v12  ;;  %4679 = vmatprep.subr.bf16.mxu1 %v6542_v25 }
 0x6b2   :  { %4649 = vmatpush1.bf16.msra.mxu0 %v6543_v8  ;;  %4681 = vmatpush1.bf16.msra.mxu1 %v6544_v63 }
 0x6b3   :  { %4651 = vmatprep.subr.bf16.mxu0 %v6545_v48  ;;  %4683 = vmatprep.subr.bf16.mxu1 %v6546_v62 }
 0x6b6   :  { %4653 = vmatpush1.bf16.msra.mxu0 %v6547_v51  ;;  %4685 = vmatpush1.bf16.msra.mxu1 %v6548_v26 }
 0x6b7   :  { %4687 = vmatprep.subr.bf16.mxu0 %v6549_v13  ;;  %4719 = vmatprep.subr.bf16.mxu1 %v6550_v17 }
 0x74c   :  { %v2965_v52 = vpop.f32.mrb[12].mxu0  ;;  %v3036_v32 = vpop.f32.mrb[12].mxu1 }
 0x74d   :  { %v4762_v38 = vadd.f32 %v2965_v52, %v6551_v33  ;;  %v2967_v39 = vpop.f32.mrb[13].mxu0  ;;  %v3038_v57 = vpop.f32.mrb[13].mxu1  ;;  %v4778_v30 = vadd.f32 %v3036_v32, %v6443_v56 }
 0x74e   :  { %v4763_v47 = vadd.f32 %v2967_v39, %v6442_v5  ;;  %v4779_v40 = vadd.f32 %v3038_v57, %v6413_v24 }
 0x74f   :  { %v3710_v44 = vmul.f32 -1.442695, %v4762_v38 }
 0x750   :  { %v3711_v45 = vmul.f32 -1.442695, %v4763_v47  ;;  %v3712_v18 = vmul.f32 -1.442695, %v4779_v40 }
 0x751   :  { %5079 = vpow2.f32 %v3710_v44 }
 0x752   :  { %5081 = vpow2.f32 %v3711_v45 }
 0x753   :  { %5083 = vpow2.f32 %v3712_v18 }
 0x754   :  { %5085 = vtanh.f32 %v4778_v30 }
 0x75b   :  { %v5080_v20 = vpop.eup %5079 }
 0x75c   :  { %v5082_v6 = vpop.eup %5081  ;;  %v3198_v12 = vadd.f32 1.0, %v5080_v20 }
 0x75d   :  { %v3204_v25 = vadd.f32 1.0, %v5082_v6  ;;  %v5084_v8 = vpop.eup %5083 }
 0x75e   :  { %5087 = vrcp.f32 %v3198_v12  ;;  %v5086_v63 = vpop.eup %5085  ;;  %v3211_v26 = vadd.f32 1.0, %v5084_v8 }
 0x75f   :  { %5089 = vrcp.f32 %v3204_v25 }
 0x760   :  { %5091 = vrcp.f32 %v3211_v26 }
 0x768   :  { %v5088_v48 = vpop.eup %5087 }
 0x769   :  { %v5090_v62 = vpop.eup %5089  ;;  %v3215_v51 = vmul.f32 %v5088_v48, %v5086_v63 }
 0x76a   :  { %v3214_v13 = vmul.f32 %v5090_v62, %v6106_v11  ;;  %v5092_v11 = vpop.eup %5091 }
 0x76c   :  { %v6190_v17 = vadd.f32 %v3215_v51, %v3214_v13  ;;  %v3115_v52 = vpop.f32.mrb[18].mxu0  ;;  %v3186_v32 = vpop.f32.mrb[18].mxu1 }
 0x76d   :  { %v4784_v38 = vadd.f32 %v3115_v52, %v6416_v19  ;;  %v3117_v39 = vpop.f32.mrb[19].mxu0  ;;  %v3188_v57 = vpop.f32.mrb[19].mxu1  ;;  %v4800_v20 = vadd.f32 %v3186_v32, %v5691_v0 }
 0x76e   :  { %v4785_v47 = vadd.f32 %v3117_v39, %v5681_v49  ;;  %5093 = vtanh.f32 %v6190_v17  ;;  %v4801_v40 = vadd.f32 %v3188_v57, %v5688_v21  ;;  %v3722_v57 = vld [vmem:[%s6257_s5] ss:$0 sm:$0xff] }
 0x76f   :  { %v3713_v44 = vmul.f32 -1.442695, %v4784_v38 }
 0x770   :  { %v3714_v45 = vmul.f32 -1.442695, %v4785_v47  ;;  %v3715_v30 = vmul.f32 -1.442695, %v4801_v40 }
 0x771   :  { %5095 = vpow2.f32 %v3713_v44 }
 0x772   :  { %5097 = vpow2.f32 %v3714_v45 }
 0x773   :  { %5099 = vpow2.f32 %v3715_v30 }
 0x774   :  { %5101 = vtanh.f32 %v4800_v20 }
 0x778   :  { %v5094_v18 = vpop.eup %5093 }
 0x779   :  { %v3218_v6 = vmul.f32 %v5094_v18, %v5092_v11 }
 0x77b   :  { %v5096_v12 = vpop.eup %5095  ;;  %3312 = vmatmul.mubr.f32.vlgmr.msra.gmra.mrb[14].mxu0 %v3218_v6  ;;  %3383 = vmatmul.mubr.f32.vlgmr.msra.gmra.mrb[14].mxu1 %v3218_v6 }
 0x77c   :  { %v5098_v25 = vpop.eup %5097  ;;  %v3222_v8 = vadd.f32 1.0, %v5096_v12  ;;  %4689 = vmatpush1.bf16.msra.mxu0 %v5528_v31  ;;  %4721 = vmatpush1.bf16.msra.mxu1 %v5530_v34 }
 0x77d   :  { %v3228_v63 = vadd.f32 1.0, %v5098_v25  ;;  %4691 = vmatprep.subr.bf16.mxu0 %v5534_v41  ;;  %4723 = vmatprep.subr.bf16.mxu1 %v5536_v42  ;;  %v5100_v31 = vpop.eup %5099 }
 0x77e   :  { %5103 = vrcp.f32 %v3222_v8  ;;  %3461 = vmatprep.mubr.f32.mxu0 %v6382_v4  ;;  %3532 = vmatprep.mubr.f32.mxu1 %v6382_v4  ;;  %v5102_v34 = vpop.eup %5101 }
 0x77f   :  { %5105 = vrcp.f32 %v3228_v63 }
 0x780   :  { %4693 = vmatpush1.bf16.msra.mxu0 %v5544_v53  ;;  %4725 = vmatpush1.bf16.msra.mxu1 %v5546_v58  ;;  %v3235_v58 = vadd.f32 1.0, %v5100_v31  ;;  %v3723_v31 = vld [vmem:[%s6258_s6] ss:$0 sm:$0xff] }
 0x781   :  { %4695 = vmatprep.subr.bf16.mxu0 %v5550_v61  ;;  %4727 = vmatprep.subr.bf16.mxu1 %v5552_v2 }
 0x782   :  { %5107 = vrcp.f32 %v3235_v58 }
 0x784   :  { %4697 = vmatpush1.bf16.msra.mxu0 %v6389_v37  ;;  %4729 = vmatpush1.bf16.msra.mxu1 %v6390_v55 }
 0x785   :  { %4699 = vmatprep.subr.bf16.mxu0 %v6391_v22  ;;  %4731 = vmatprep.subr.bf16.mxu1 %v6392_v15 }
 0x788   :  { %v5104_v41 = vpop.eup %5103  ;;  %4701 = vmatpush1.bf16.msra.mxu0 %v6393_v7  ;;  %4733 = vmatpush1.bf16.msra.mxu1 %v6394_v9 }
 0x789   :  { %v5106_v42 = vpop.eup %5105  ;;  %v3239_v53 = vmul.f32 %v5104_v41, %v5102_v34  ;;  %4703 = vmatprep.subr.bf16.mxu0 %v6395_v54  ;;  %4735 = vmatprep.subr.bf16.mxu1 %v6396_v28 }
 0x78a   :  { %v3238_v61 = vmul.f32 %v5106_v42, %v6132_v50 }
 0x78c   :  { %v6216_v2 = vadd.f32 %v3239_v53, %v3238_v61  ;;  %4705 = vmatpush1.bf16.msra.mxu0 %v6397_v59  ;;  %4737 = vmatpush1.bf16.msra.mxu1 %v6398_v27  ;;  %v3724_v53 = vld [vmem:[#allocation4] ss:$0 sm:$0xff] }
 0x78d   :  { %4707 = vmatprep.subr.bf16.mxu0 %v5588_v23  ;;  %4739 = vmatprep.subr.bf16.mxu1 %v5590_v46  ;;  %v5108_v23 = vpop.eup %5107 }
 0x78e   :  { %5109 = vtanh.f32 %v6216_v2 }
 0x790   :  { %4709 = vmatpush1.bf16.msra.mxu0 %v5594_v60  ;;  %4741 = vmatpush1.bf16.msra.mxu1 %v5596_v3 }
 0x791   :  { %4711 = vmatprep.subr.bf16.mxu0 %v5600_v1  ;;  %4743 = vmatprep.subr.bf16.mxu1 %v5602_v16 }
 0x794   :  { %4713 = vmatpush1.bf16.msra.mxu0 %v5606_v36  ;;  %4745 = vmatpush1.bf16.msra.mxu1 %v5608_v43 }
 0x795   :  { %4715 = vmatprep.subr.bf16.mxu0 %v5612_v29  ;;  %4747 = vmatprep.subr.bf16.mxu1 %v5614_v35 }
 0x798   :  { %v5110_v46 = vpop.eup %5109  ;;  %4717 = vmatpush1.bf16.msra.mxu0 %v5618_v10  ;;  %4749 = vmatpush1.bf16.msra.mxu1 %v5620_v14 }
 0x799   :  { %v3242_v60 = vmul.f32 %v5110_v46, %v5108_v23 }
 0x79b   :  { %3462 = vmatmul.mubr.f32.vlgmr.msra.gmra.mrb[16].mxu0 %v3242_v60  ;;  %3533 = vmatmul.mubr.f32.vlgmr.msra.gmra.mrb[16].mxu1 %v3242_v60 }
 0x84e   :  { %v3313_v3 = vpop.f32.mrb[14].mxu0  ;;  %v3384_v1 = vpop.f32.mrb[14].mxu1 }
 0x84f   :  { %v4764_v16 = vadd.f32 %v3313_v3, %v6551_v33  ;;  %v3315_v36 = vpop.f32.mrb[15].mxu0  ;;  %v3386_v4 = vpop.f32.mrb[15].mxu1  ;;  %v4780_v14 = vadd.f32 %v3384_v1, %v6443_v56 }
 0x850   :  { %v4765_v43 = vadd.f32 %v3315_v36, %v6442_v5  ;;  %v4781_v35 = vadd.f32 %v3386_v4, %v6413_v24 }
 0x851   :  { %v3716_v29 = vmul.f32 -1.442695, %v4764_v16 }
 0x852   :  { %v3717_v37 = vmul.f32 -1.442695, %v4765_v43  ;;  %v3718_v10 = vmul.f32 -1.442695, %v4781_v35 }
 0x853   :  { %5111 = vpow2.f32 %v3716_v29 }
 0x854   :  { %5113 = vpow2.f32 %v3717_v37 }
 0x855   :  { %5115 = vpow2.f32 %v3718_v10 }
 0x856   :  { %5117 = vtanh.f32 %v4780_v14 }
 0x85d   :  { %v5112_v55 = vpop.eup %5111 }
 0x85e   :  { %v5114_v22 = vpop.eup %5113  ;;  %v3546_v15 = vadd.f32 1.0, %v5112_v55 }
 0x85f   :  { %v3552_v7 = vadd.f32 1.0, %v5114_v22  ;;  %v5116_v9 = vpop.eup %5115 }
 0x860   :  { %5119 = vrcp.f32 %v3546_v15  ;;  %v5118_v54 = vpop.eup %5117  ;;  %v3559_v5 = vadd.f32 1.0, %v5116_v9 }
 0x861   :  { %5121 = vrcp.f32 %v3552_v7 }
 0x862   :  { %5123 = vrcp.f32 %v3559_v5 }
 0x86a   :  { %v5120_v28 = vpop.eup %5119 }
 0x86b   :  { %v5122_v59 = vpop.eup %5121  ;;  %v3563_v27 = vmul.f32 %v5120_v28, %v5118_v54 }
 0x86c   :  { %v3562_v50 = vmul.f32 %v5122_v59, %v6190_v17  ;;  %v5124_v38 = vpop.eup %5123 }
 0x86e   :  { %v3463_v24 = vpop.f32.mrb[16].mxu0  ;;  %v3534_v33 = vpop.f32.mrb[16].mxu1  ;;  %v3564_v48 = vadd.f32 %v3563_v27, %v3562_v50 }
 0x86f   :  { %v4782_v56 = vadd.f32 %v3463_v24, %v6416_v19  ;;  %v3465_v62 = vpop.f32.mrb[17].mxu0  ;;  %v3536_v51 = vpop.f32.mrb[17].mxu1  ;;  %v4798_v19 = vadd.f32 %v3534_v33, %v5691_v0 }
 0x870   :  { %v4783_v26 = vadd.f32 %v3465_v62, %v5681_v49  ;;  %5125 = vtanh.f32 %v3564_v48  ;;  %v4799_v32 = vadd.f32 %v3536_v51, %v5688_v21 }
 0x871   :  { %v3719_v13 = vmul.f32 -1.442695, %v4782_v56 }
 0x872   :  { %v3720_v52 = vmul.f32 -1.442695, %v4783_v26  ;;  %v3721_v17 = vmul.f32 -1.442695, %v4799_v32 }
 0x873   :  { %5127 = vpow2.f32 %v3719_v13 }
 0x874   :  { %5129 = vpow2.f32 %v3720_v52 }
 0x875   :  { %5131 = vpow2.f32 %v3721_v17 }
 0x876   :  { %5133 = vtanh.f32 %v4798_v19 }
 0x87a   :  { %v5126_v39 = vpop.eup %5125 }
 0x87b   :  { %v3566_v47 = vmul.f32 %v5126_v39, %v5124_v38 }
 0x87d   :  { %v5128_v44 = vpop.eup %5127  ;;  %v3598_v45 = vmul.f32 %v3722_v57, %v3566_v47 }
 0x87e   :  { %v5130_v49 = vpop.eup %5129  ;;  %v3570_v40 = vadd.f32 1.0, %v5128_v44 }
 0x87f   :  { %v3576_v11 = vadd.f32 1.0, %v5130_v49  ;;  %3599 = vadd.xlane.f32.xlu0 %v3598_v45  ;;  %v5132_v21 = vpop.eup %5131 }
 0x880   :  { %5135 = vrcp.f32 %v3570_v40  ;;  %v5134_v18 = vpop.eup %5133  ;;  %v3583_v12 = vadd.f32 1.0, %v5132_v21 }
 0x881   :  { %5137 = vrcp.f32 %v3576_v11 }
 0x882   :  { %5139 = vrcp.f32 %v3583_v12 }
 0x88a   :  { %v5136_v30 = vpop.eup %5135 }
 0x88b   :  { %v5138_v20 = vpop.eup %5137  ;;  %v3587_v6 = vmul.f32 %v5136_v30, %v5134_v18 }
 0x88c   :  { %v3586_v25 = vmul.f32 %v5138_v20, %v6216_v2  ;;  %v5140_v8 = vpop.eup %5139 }
 0x88e   :  { %v3588_v0 = vadd.f32 %v3587_v6, %v3586_v25 }
 0x890   :  { %5141 = vtanh.f32 %v3588_v0 }
 0x89a   :  { %v5142_v63 = vpop.eup %5141 }
 0x89b   :  { %v3590_v34 = vmul.f32 %v5142_v63, %v5140_v8 }
 0x89d   :  { %v3608_v41 = vmul.f32 %v3723_v31, %v3590_v34 }
 0x89f   :  { %3609 = vadd.xlane.f32.xlu0 %v3608_v41 }
 0x90c   :  { %v3600_v42 = vpop.xlane.xlu0 %3599 }
 0x92c   :  { %v3610_v58 = vpop.xlane.xlu0 %3609 }
 0x92d   :  { %v3611_v61 = vadd.f32 %v3610_v58, %v3600_v42 }
 0x92f   :  { %v3619_v23 = vadd.f32 %v3724_v53, %v3611_v61 }
 0x931   :  { %v3725_v46 = vmul.f32 -1.442695, %v3619_v23 }
 0x933   :  { %5143 = vpow2.f32 %v3725_v46 }
 0x93d   :  { %v5144_v2 = vpop.eup %5143 }
 0x93e   :  { %v3623_v60 = vadd.f32 1.0, %v5144_v2 }
 0x940   :  { %5145 = vrcp.f32 %v3623_v60 }
 0x94a   :  { %v5146_v3 = vpop.eup %5145 }
 0x94b   :  { %3627 = vst.msk [vmem:[%s6260_s8] sm:$0xff] %vm3626_vm2, %v5146_v3 }
 0x94c   :  { %3632 = vsyncpa [#allocation6], 1 }
 0x94d   :  { %3633 = vsyncpa [#allocation8], 1 }

</bundles_post_ra>
